<compile_context>
chip_gen: v6e
topology: v6e:2x2x1
jax: 0.10.0
libtpu: 0.0.40
codegen_flags: <defaults>
</compile_context>

<pallas_src>
import functools
from collections import OrderedDict

import jax
import jax.numpy as jnp
from jax.experimental import pallas as pl
from jax.experimental.pallas import tpu as pltpu

CPAD = 128  # internal lane-dense channel padding (multiple of the 128 lanes)


def _round_up(x, m):
    return ((x + m - 1) // m) * m


def _pick_tile(dim, cap, quantum):
    """Return (tile, padded_dim): the full dim if it fits under `cap`,
    otherwise the largest multiple of `quantum` <= cap dividing the padded dim."""
    if dim <= cap:
        return dim, dim
    padded = _round_up(dim, quantum)
    best = quantum
    t = quantum
    while t <= cap:
        if padded % t == 0:
            best = t
        t += quantum
    return best, padded


# ----------------------------------------------------------------------------
# Pallas GEMM kernel: C = A @ B + bias [+ add] [ReLU], f32 accumulation
# ----------------------------------------------------------------------------
def _gemm_kernel(*refs, relu, n_k, has_add):
    if has_add:
        a_ref, b_ref, bias_ref, add_ref, o_ref, acc_ref = refs
    else:
        a_ref, b_ref, bias_ref, o_ref, acc_ref = refs
        add_ref = None
    k = pl.program_id(2)

    @pl.when(k == 0)
    def _():
        acc_ref[...] = jnp.zeros_like(acc_ref)

    acc_ref[...] += jnp.dot(a_ref[...], b_ref[...],
                            preferred_element_type=jnp.float32)

    @pl.when(k == n_k - 1)
    def _():
        r = acc_ref[...] + bias_ref[...]
        if relu:
            r = jnp.maximum(r, 0.0)
        if add_ref is not None:
            r = r + add_ref[...].astype(jnp.float32)
        o_ref[...] = r.astype(o_ref.dtype)


def matmul_bias(a, b, bias, *, relu=False, add=None, out_dtype=jnp.bfloat16):
    """a:(M,K) @ b:(K,N) + bias:(1,N) [+ add:(M,N)] [ReLU] -> (M,N).

    bf16 operands / f32 MXU accumulation, tiled (M,N,K) grid with a VMEM f32
    accumulator.  N is lane-dense (weights pre-packed to multiples of 128 at
    init time), so padding below only triggers for degenerate shapes.
    """
    M, K = a.shape
    Kb, N = b.shape
    assert K == Kb and bias.shape == (1, N)

    tm, Mp = _pick_tile(M, 256, 8)
    tn, Np = _pick_tile(N, 256, 128)
    tk, Kp = _pick_tile(K, 512, 128)

    if Mp != M or Kp != K:
        a = jnp.pad(a, ((0, Mp - M), (0, Kp - K)))
    if Kp != K or Np != N:
        b = jnp.pad(b, ((0, Kp - K), (0, Np - N)))
    if Np != N:
        bias = jnp.pad(bias, ((0, 0), (0, Np - N)))
    if add is not None and (Mp != M or Np != N):
        add = jnp.pad(add, ((0, Mp - M), (0, Np - N)))

    a = a.astype(jnp.bfloat16)
    b = b.astype(jnp.bfloat16)

    grid = (Mp // tm, Np // tn, Kp // tk)
    n_k = grid[2]

    kernel = functools.partial(_gemm_kernel, relu=relu, n_k=n_k,
                               has_add=add is not None)
    in_specs = [
        pl.BlockSpec((tm, tk), lambda i, j, k: (i, k)),   # activation tile
        pl.BlockSpec((tk, tn), lambda i, j, k: (k, j)),   # weight tile
        pl.BlockSpec((1, tn), lambda i, j, k: (0, j)),    # bias row
    ]
    operands = [a, b, bias]
    if add is not None:
        in_specs.append(pl.BlockSpec((tm, tn), lambda i, j, k: (i, j)))
        operands.append(add.astype(jnp.bfloat16))

    bytes_accessed = (a.size * 2 + b.size * 2 + bias.size * 4
                      + (add.size * 2 if add is not None else 0)
                      + Mp * Np * jnp.dtype(out_dtype).itemsize)

    out = pl.pallas_call(
        kernel,
        out_shape=jax.ShapeDtypeStruct((Mp, Np), out_dtype),
        grid=grid,
        in_specs=in_specs,
        out_specs=pl.BlockSpec((tm, tn), lambda i, j, k: (i, j)),
        scratch_shapes=[pltpu.VMEM((tm, tn), jnp.float32)],
        compiler_params=pltpu.CompilerParams(
            dimension_semantics=("parallel", "parallel", "arbitrary"),
            vmem_limit_bytes=32 * 1024 * 1024),
        cost_estimate=pl.CostEstimate(
            flops=2 * Mp * Np * Kp, transcendentals=0,
            bytes_accessed=int(bytes_accessed)),
    )(*operands)

    if Mp != M or Np != N:
        out = out[:M, :N]
    return out


# ----------------------------------------------------------------------------
# Conv / pooling / upsample built on the GEMM kernel
# ----------------------------------------------------------------------------
def conv2d(x, w2, b2, *, kh, kw, stride, pad, relu,
           add=None, out_dtype=jnp.bfloat16):
    """Conv on NHWC (lane-dense channels) activations using pre-packed GEMM
    weights w2:(kh*kw*Cin_pad, Cout_pad), b2:(1, Cout_pad).  `add` (same shape
    as the output) is fused into the GEMM epilogue (FPN top-down fusion)."""
    if pad:
        x = jnp.pad(x, ((0, 0), (pad, pad), (pad, pad), (0, 0)))
    N, H, W, C = x.shape
    Ho = (H - kh) // stride + 1
    Wo = (W - kw) // stride + 1
    if kh == 1 and kw == 1 and stride == 1:
        a = x.reshape(N * Ho * Wo, C)                     # 1x1 conv: pure GEMM
    else:
        # TODO(synk): fold the kh*kw taps into the GEMM grid (Element-offset
        # index_map over the padded activation) to avoid the kh*kw x HBM
        # blow-up of im2col at large spatial sizes; kept as bf16 glue here.
        cols = []
        for i in range(kh):
            for j in range(kw):
                cols.append(x[:, i:i + stride * Ho:stride,
                              j:j + stride * Wo:stride, :])
        a = jnp.concatenate(cols, axis=-1).reshape(N * Ho * Wo, kh * kw * C)
    Np = w2.shape[1]
    add2 = None if add is None else add.reshape(N * Ho * Wo, Np)
    y = matmul_bias(a, w2, b2, relu=relu, add=add2, out_dtype=out_dtype)
    return y.reshape(N, Ho, Wo, Np)


def max_pool2d(x, k, stride, pad):
    """3x3/2 stem max pool (minor op, shifted-slice max glue)."""
    x = jnp.pad(x, ((0, 0), (pad, pad), (pad, pad), (0, 0)),
                constant_values=-jnp.inf)
    N, H, W, C = x.shape
    Ho = (H - k) // stride + 1
    Wo = (W - k) // stride + 1
    out = None
    for i in range(k):
        for j in range(k):
            s = x[:, i:i + stride * Ho:stride, j:j + stride * Wo:stride, :]
            out = s if out is None else jnp.maximum(out, s)
    return out


def upsample2x_nearest(x):
    # TODO(synk): could be fused into the lateral GEMM via a half-resolution
    # index_map on the `add` operand instead of materializing the repeat.
    return jnp.repeat(jnp.repeat(x, 2, axis=1), 2, axis=2)


# ----------------------------------------------------------------------------
# Deterministic parameter init + one-time lane-dense GEMM packing
# ----------------------------------------------------------------------------
def _init_conv(key, o, i, kh, kw):
    fan_in = i * kh * kw
    w = jax.random.normal(key, (o, i, kh, kw), jnp.float32) / jnp.sqrt(float(fan_in))
    b = jnp.full((o,), 0.01, jnp.float32)
    return w, b


def _pack_conv(w, b, cin_pad, cout_pad):
    """Pack PyTorch-layout (O,I,kh,kw) conv weights into a lane-dense bf16 GEMM
    matrix (kh*kw*cin_pad, cout_pad) + f32 bias (1, cout_pad). Done once at
    init so no per-call pad/copy of weights is needed."""
    O, I, kh, kw = w.shape
    wt = jnp.transpose(w, (2, 3, 1, 0))                        # (kh,kw,I,O)
    wt = jnp.pad(wt, ((0, 0), (0, 0), (0, cin_pad - I), (0, cout_pad - O)))
    w2 = wt.reshape(kh * kw * cin_pad, cout_pad).astype(jnp.bfloat16)
    b2 = jnp.pad(b, (0, cout_pad - O)).astype(jnp.float32).reshape(1, cout_pad)
    return w2, b2


def init_params(key, in_ch=3, stem_ch=16,
                in_channels_list=(16, 32, 64, 128), out_channels=32):
    keys = jax.random.split(key, 13)
    weights = {}
    # TODO(synk): full ResNet50 bottleneck stacks + BatchNorm not reproduced;
    # each stage is a single strided 3x3 conv with the listed channel counts.
    w, b = _init_conv(keys[0], stem_ch, in_ch, 7, 7)
    weights["stem"] = _pack_conv(w, b, cin_pad=in_ch, cout_pad=CPAD)
    chans = [stem_ch] + list(in_channels_list)
    for li in range(4):
        w, b = _init_conv(keys[1 + li], in_channels_list[li], chans[li], 3, 3)
        weights[f"layer{li + 1}"] = _pack_conv(w, b, cin_pad=CPAD, cout_pad=CPAD)
    for li in range(4):
        w, b = _init_conv(keys[5 + li], out_channels, in_channels_list[li], 1, 1)
        weights[f"inner{li}"] = _pack_conv(w, b, cin_pad=CPAD, cout_pad=CPAD)
        w, b = _init_conv(keys[9 + li], out_channels, out_channels, 3, 3)
        weights[f"outer{li}"] = _pack_conv(w, b, cin_pad=CPAD, cout_pad=CPAD)
    return weights


# ----------------------------------------------------------------------------
# BackboneWithFPN forward (nums_bi = 1)
# ----------------------------------------------------------------------------
def backbone_with_fpn_forward(weights, x_nchw, out_channels=32):
    x = jnp.transpose(x_nchw, (0, 2, 3, 1)).astype(jnp.bfloat16)  # NCHW->NHWC

    # ---- body: IntermediateLayerGetter(backbone, {'layer1':'0',...,'layer4':'3'})
    x = conv2d(x, *weights["stem"], kh=7, kw=7, stride=2, pad=3, relu=True)
    x = max_pool2d(x, 3, 2, 1)
    feats = []
    strides = (1, 2, 2, 2)
    for li in range(4):
        x = conv2d(x, *weights[f"layer{li + 1}"], kh=3, kw=3,
                   stride=strides[li], pad=1, relu=True)
        feats.append(x)

    # ---- BiFPN1 (is_first=True) with LastLevelMaxPool extra block
    # TODO(synk): BiFeaturePyramidNetwork source not provided; the bidirectional
    # weighted fusion is implemented with standard FPN lateral + top-down
    # semantics (1x1 inner convs, nearest-upsample add, 3x3 output convs).
    td = [None] * 4
    td[3] = conv2d(feats[3], *weights["inner3"], kh=1, kw=1, stride=1, pad=0,
                   relu=False)
    for li in (2, 1, 0):
        up = upsample2x_nearest(td[li + 1])
        # lateral 1x1 conv with the top-down add fused into the GEMM epilogue
        td[li] = conv2d(feats[li], *weights[f"inner{li}"], kh=1, kw=1,
                        stride=1, pad=0, relu=False, add=up)

    outs = OrderedDict()
    for li in range(4):
        outs[str(li)] = conv2d(td[li], *weights[f"outer{li}"], kh=3, kw=3,
                               stride=1, pad=1, relu=False,
                               out_dtype=jnp.float32)

    # LastLevelMaxPool: F.max_pool2d(x, kernel=1, stride=2, pad=0)
    outs["pool"] = outs["3"][:, ::2, ::2, :]

    # strip channel padding, back to PyTorch NCHW layout, f32 at the boundary
    return OrderedDict(
        (k, jnp.transpose(v[..., :out_channels], (0, 3, 1, 2)).astype(jnp.float32))
        for k, v in outs.items())


# ----------------------------------------------------------------------------
if __name__ == "__main__":
    key = jax.random.PRNGKey(0)
    pkey, xkey = jax.random.split(key)
    weights = init_params(pkey)
    x = jax.random.normal(xkey, (2, 3, 32, 32), jnp.float32)   # NCHW like PyTorch

    fwd = jax.jit(backbone_with_fpn_forward)
    out = fwd(weights, x)
    out = jax.block_until_ready(out)

    expected = {"0": (2, 32, 8, 8), "1": (2, 32, 4, 4), "2": (2, 32, 2, 2),
                "3": (2, 32, 1, 1), "pool": (2, 32, 1, 1)}
    for k, shp in expected.items():
        assert out[k].shape == shp, (k, out[k].shape, shp)
        assert bool(jnp.all(jnp.isfinite(out[k])))
    print("KERNEL_OK")
</pallas_src>

<mosaic_0001>
module attributes {stable_mosaic.version = 11 : i64} {
  func.func @_gemm_kernel(%arg0: i32, %arg1: i32, %arg2: i32, %arg3: memref<256x147xbf16, #tpu.memory_space<vmem>>, %arg4: memref<147x128xbf16, #tpu.memory_space<vmem>>, %arg5: memref<1x128xf32, #tpu.memory_space<vmem>>, %arg6: memref<256x128xbf16, #tpu.memory_space<vmem>>, %arg7: memref<256x128xf32, #tpu.memory_space<vmem>>) attributes {dimension_semantics = [#tpu.dimension_semantics<parallel>, #tpu.dimension_semantics<parallel>, #tpu.dimension_semantics<arbitrary>], iteration_bounds = array<i64: 2, 1, 1>, scalar_prefetch = 0 : i64, scratch_operands = 1 : i64, tpu.core_type = #tpu.core_type<tc>, window_params = [{transform_indices = @transform_0, window_bounds = array<i64: 256, 147>}, {transform_indices = @transform_1, window_bounds = array<i64: 147, 128>}, {transform_indices = @transform_2, window_bounds = array<i64: 1, 128>}, {transform_indices = @transform_3, window_bounds = array<i64: 256, 128>}]} {
    %c0_i32 = arith.constant 0 : i32
    %0 = arith.cmpi eq, %arg2, %c0_i32 : i32
    %1 = arith.extui %0 : i1 to i32
    %c0_i32_0 = arith.constant 0 : i32
    %2 = arith.cmpi ne, %1, %c0_i32_0 : i32
    scf.if %2 {
      %cst_10 = arith.constant 0.000000e+00 : f32
      %12 = vector.broadcast %cst_10 : f32 to vector<256x128xf32>
      %c0_11 = arith.constant 0 : index
      %c0_12 = arith.constant 0 : index
      %13 = vector.load %arg7[%c0_11, %c0_12] : memref<256x128xf32, #tpu.memory_space<vmem>>, vector<256x128xf32>
      tpu.vector_store %arg7[%c0_11, %c0_12], %12 {strides = array<i32>} : memref<256x128xf32, #tpu.memory_space<vmem>>, vector<256x128xf32>,
    } else {
    }
    %c0 = arith.constant 0 : index
    %c0_1 = arith.constant 0 : index
    %3 = vector.load %arg7[%c0, %c0_1] : memref<256x128xf32, #tpu.memory_space<vmem>>, vector<256x128xf32>
    %c0_2 = arith.constant 0 : index
    %c0_3 = arith.constant 0 : index
    %4 = vector.load %arg3[%c0_2, %c0_3] : memref<256x147xbf16, #tpu.memory_space<vmem>>, vector<256x147xbf16>
    %c0_4 = arith.constant 0 : index
    %c0_5 = arith.constant 0 : index
    %5 = vector.load %arg4[%c0_4, %c0_5] : memref<147x128xbf16, #tpu.memory_space<vmem>>, vector<147x128xbf16>
    %cst = arith.constant dense<0.000000e+00> : vector<256x128xf32>
    %6 = tpu.matmul %4, %5, %cst {dimension_numbers = #tpu.dot_dimension_numbers<[1], [0], [0], [1], [0, 0, 1, 1], [], []>} : vector<256x147xbf16>, vector<147x128xbf16>, vector<256x128xf32> -> vector<256x128xf32>
    %7 = arith.addf %3, %6 : vector<256x128xf32>
    %c0_6 = arith.constant 0 : index
    %c0_7 = arith.constant 0 : index
    %8 = vector.load %arg7[%c0_6, %c0_7] : memref<256x128xf32, #tpu.memory_space<vmem>>, vector<256x128xf32>
    tpu.vector_store %arg7[%c0_6, %c0_7], %7 {strides = array<i32>} : memref<256x128xf32, #tpu.memory_space<vmem>>, vector<256x128xf32>,
    %c0_i32_8 = arith.constant 0 : i32
    %9 = arith.cmpi eq, %arg2, %c0_i32_8 : i32
    %10 = arith.extui %9 : i1 to i32
    %c0_i32_9 = arith.constant 0 : i32
    %11 = arith.cmpi ne, %10, %c0_i32_9 : i32
    scf.if %11 {
      %c0_10 = arith.constant 0 : index
      %c0_11 = arith.constant 0 : index
      %12 = vector.load %arg7[%c0_10, %c0_11] : memref<256x128xf32, #tpu.memory_space<vmem>>, vector<256x128xf32>
      %c0_12 = arith.constant 0 : index
      %c0_13 = arith.constant 0 : index
      %13 = vector.load %arg5[%c0_12, %c0_13] : memref<1x128xf32, #tpu.memory_space<vmem>>, vector<1x128xf32>
      %14 = vector.broadcast %13 : vector<1x128xf32> to vector<256x128xf32>
      %15 = arith.addf %12, %14 : vector<256x128xf32>
      %cst_14 = arith.constant 0.000000e+00 : f32
      %16 = vector.broadcast %cst_14 : f32 to vector<256x128xf32>
      %17 = arith.maximumf %15, %16 : vector<256x128xf32>
      %18 = arith.truncf %17 : vector<256x128xf32> to vector<256x128xbf16>
      %c0_15 = arith.constant 0 : index
      %c0_16 = arith.constant 0 : index
      %19 = vector.load %arg6[%c0_15, %c0_16] : memref<256x128xbf16, #tpu.memory_space<vmem>>, vector<256x128xbf16>
      tpu.vector_store %arg6[%c0_15, %c0_16], %18 {strides = array<i32>} : memref<256x128xbf16, #tpu.memory_space<vmem>>, vector<256x128xbf16>,
    } else {
    }
    return
  }
  func.func @transform_0(%arg0: i32, %arg1: i32, %arg2: i32) -> (i32, i32) {
    %c0_i32 = arith.constant 0 : i32
    return %arg0, %arg2 : i32, i32
  }
  func.func @transform_1(%arg0: i32, %arg1: i32, %arg2: i32) -> (i32, i32) {
    %c0_i32 = arith.constant 0 : i32
    return %arg2, %arg1 : i32, i32
  }
  func.func @transform_2(%arg0: i32, %arg1: i32, %arg2: i32) -> (i32, i32) {
    %c0_i32 = arith.constant 0 : i32
    %c0_i32_0 = arith.constant 0 : i32
    return %c0_i32, %arg1 : i32, i32
  }
  func.func @transform_3(%arg0: i32, %arg1: i32, %arg2: i32) -> (i32, i32) {
    %c0_i32 = arith.constant 0 : i32
    return %arg0, %arg1 : i32, i32
  }
}

module attributes {stable_mosaic.version = 11 : i64} {
  func.func @_gemm_kernel(%arg0: i32, %arg1: i32, %arg2: i32, %arg3: memref<128x384xbf16, #tpu.memory_space<vmem>>, %arg4: memref<384x128xbf16, #tpu.memory_space<vmem>>, %arg5: memref<1x128xf32, #tpu.memory_space<vmem>>, %arg6: memref<128x128xbf16, #tpu.memory_space<vmem>>, %arg7: memref<128x128xf32, #tpu.memory_space<vmem>>) attributes {dimension_semantics = [#tpu.dimension_semantics<parallel>, #tpu.dimension_semantics<parallel>, #tpu.dimension_semantics<arbitrary>], iteration_bounds = array<i64: 1, 1, 3>, scalar_prefetch = 0 : i64, scratch_operands = 1 : i64, tpu.core_type = #tpu.core_type<tc>, window_params = [{transform_indices = @transform_0, window_bounds = array<i64: 128, 384>}, {transform_indices = @transform_1, window_bounds = array<i64: 384, 128>}, {transform_indices = @transform_2, window_bounds = array<i64: 1, 128>}, {transform_indices = @transform_3, window_bounds = array<i64: 128, 128>}]} {
    %c0_i32 = arith.constant 0 : i32
    %0 = arith.cmpi eq, %arg2, %c0_i32 : i32
    %1 = arith.extui %0 : i1 to i32
    %c0_i32_0 = arith.constant 0 : i32
    %2 = arith.cmpi ne, %1, %c0_i32_0 : i32
    scf.if %2 {
      %cst_9 = arith.constant 0.000000e+00 : f32
      %12 = vector.broadcast %cst_9 : f32 to vector<128x128xf32>
      %c0_10 = arith.constant 0 : index
      %c0_11 = arith.constant 0 : index
      %13 = vector.load %arg7[%c0_10, %c0_11] : memref<128x128xf32, #tpu.memory_space<vmem>>, vector<128x128xf32>
      tpu.vector_store %arg7[%c0_10, %c0_11], %12 {strides = array<i32>} : memref<128x128xf32, #tpu.memory_space<vmem>>, vector<128x128xf32>,
    } else {
    }
    %c0 = arith.constant 0 : index
    %c0_1 = arith.constant 0 : index
    %3 = vector.load %arg7[%c0, %c0_1] : memref<128x128xf32, #tpu.memory_space<vmem>>, vector<128x128xf32>
    %c0_2 = arith.constant 0 : index
    %c0_3 = arith.constant 0 : index
    %4 = vector.load %arg3[%c0_2, %c0_3] : memref<128x384xbf16, #tpu.memory_space<vmem>>, vector<128x384xbf16>
    %c0_4 = arith.constant 0 : index
    %c0_5 = arith.constant 0 : index
    %5 = vector.load %arg4[%c0_4, %c0_5] : memref<384x128xbf16, #tpu.memory_space<vmem>>, vector<384x128xbf16>
    %cst = arith.constant dense<0.000000e+00> : vector<128x128xf32>
    %6 = tpu.matmul %4, %5, %cst {dimension_numbers = #tpu.dot_dimension_numbers<[1], [0], [0], [1], [0, 0, 1, 1], [], []>} : vector<128x384xbf16>, vector<384x128xbf16>, vector<128x128xf32> -> vector<128x128xf32>
    %7 = arith.addf %3, %6 : vector<128x128xf32>
    %c0_6 = arith.constant 0 : index
    %c0_7 = arith.constant 0 : index
    %8 = vector.load %arg7[%c0_6, %c0_7] : memref<128x128xf32, #tpu.memory_space<vmem>>, vector<128x128xf32>
    tpu.vector_store %arg7[%c0_6, %c0_7], %7 {strides = array<i32>} : memref<128x128xf32, #tpu.memory_space<vmem>>, vector<128x128xf32>,
    %c2_i32 = arith.constant 2 : i32
    %9 = arith.cmpi eq, %arg2, %c2_i32 : i32
    %10 = arith.extui %9 : i1 to i32
    %c0_i32_8 = arith.constant 0 : i32
    %11 = arith.cmpi ne, %10, %c0_i32_8 : i32
    scf.if %11 {
      %c0_9 = arith.constant 0 : index
      %c0_10 = arith.constant 0 : index
      %12 = vector.load %arg7[%c0_9, %c0_10] : memref<128x128xf32, #tpu.memory_space<vmem>>, vector<128x128xf32>
      %c0_11 = arith.constant 0 : index
      %c0_12 = arith.constant 0 : index
      %13 = vector.load %arg5[%c0_11, %c0_12] : memref<1x128xf32, #tpu.memory_space<vmem>>, vector<1x128xf32>
      %14 = vector.broadcast %13 : vector<1x128xf32> to vector<128x128xf32>
      %15 = arith.addf %12, %14 : vector<128x128xf32>
      %cst_13 = arith.constant 0.000000e+00 : f32
      %16 = vector.broadcast %cst_13 : f32 to vector<128x128xf32>
      %17 = arith.maximumf %15, %16 : vector<128x128xf32>
      %18 = arith.truncf %17 : vector<128x128xf32> to vector<128x128xbf16>
      %c0_14 = arith.constant 0 : index
      %c0_15 = arith.constant 0 : index
      %19 = vector.load %arg6[%c0_14, %c0_15] : memref<128x128xbf16, #tpu.memory_space<vmem>>, vector<128x128xbf16>
      tpu.vector_store %arg6[%c0_14, %c0_15], %18 {strides = array<i32>} : memref<128x128xbf16, #tpu.memory_space<vmem>>, vector<128x128xbf16>,
    } else {
    }
    return
  }
  func.func @transform_0(%arg0: i32, %arg1: i32, %arg2: i32) -> (i32, i32) {
    %c0_i32 = arith.constant 0 : i32
    return %arg0, %arg2 : i32, i32
  }
  func.func @transform_1(%arg0: i32, %arg1: i32, %arg2: i32) -> (i32, i32) {
    %c0_i32 = arith.constant 0 : i32
    return %arg2, %arg1 : i32, i32
  }
  func.func @transform_2(%arg0: i32, %arg1: i32, %arg2: i32) -> (i32, i32) {
    %c0_i32 = arith.constant 0 : i32
    %c0_i32_0 = arith.constant 0 : i32
    return %c0_i32, %arg1 : i32, i32
  }
  func.func @transform_3(%arg0: i32, %arg1: i32, %arg2: i32) -> (i32, i32) {
    %c0_i32 = arith.constant 0 : i32
    return %arg0, %arg1 : i32, i32
  }
}

module attributes {stable_mosaic.version = 11 : i64} {
  func.func @_gemm_kernel(%arg0: i32, %arg1: i32, %arg2: i32, %arg3: memref<32x384xbf16, #tpu.memory_space<vmem>>, %arg4: memref<384x128xbf16, #tpu.memory_space<vmem>>, %arg5: memref<1x128xf32, #tpu.memory_space<vmem>>, %arg6: memref<32x128xbf16, #tpu.memory_space<vmem>>, %arg7: memref<32x128xf32, #tpu.memory_space<vmem>>) attributes {dimension_semantics = [#tpu.dimension_semantics<parallel>, #tpu.dimension_semantics<parallel>, #tpu.dimension_semantics<arbitrary>], iteration_bounds = array<i64: 1, 1, 3>, scalar_prefetch = 0 : i64, scratch_operands = 1 : i64, tpu.core_type = #tpu.core_type<tc>, window_params = [{transform_indices = @transform_0, window_bounds = array<i64: 32, 384>}, {transform_indices = @transform_1, window_bounds = array<i64: 384, 128>}, {transform_indices = @transform_2, window_bounds = array<i64: 1, 128>}, {transform_indices = @transform_3, window_bounds = array<i64: 32, 128>}]} {
    %c0_i32 = arith.constant 0 : i32
    %0 = arith.cmpi eq, %arg2, %c0_i32 : i32
    %1 = arith.extui %0 : i1 to i32
    %c0_i32_0 = arith.constant 0 : i32
    %2 = arith.cmpi ne, %1, %c0_i32_0 : i32
    scf.if %2 {
      %cst_9 = arith.constant 0.000000e+00 : f32
      %12 = vector.broadcast %cst_9 : f32 to vector<32x128xf32>
      %c0_10 = arith.constant 0 : index
      %c0_11 = arith.constant 0 : index
      %13 = vector.load %arg7[%c0_10, %c0_11] : memref<32x128xf32, #tpu.memory_space<vmem>>, vector<32x128xf32>
      tpu.vector_store %arg7[%c0_10, %c0_11], %12 {strides = array<i32>} : memref<32x128xf32, #tpu.memory_space<vmem>>, vector<32x128xf32>,
    } else {
    }
    %c0 = arith.constant 0 : index
    %c0_1 = arith.constant 0 : index
    %3 = vector.load %arg7[%c0, %c0_1] : memref<32x128xf32, #tpu.memory_space<vmem>>, vector<32x128xf32>
    %c0_2 = arith.constant 0 : index
    %c0_3 = arith.constant 0 : index
    %4 = vector.load %arg3[%c0_2, %c0_3] : memref<32x384xbf16, #tpu.memory_space<vmem>>, vector<32x384xbf16>
    %c0_4 = arith.constant 0 : index
    %c0_5 = arith.constant 0 : index
    %5 = vector.load %arg4[%c0_4, %c0_5] : memref<384x128xbf16, #tpu.memory_space<vmem>>, vector<384x128xbf16>
    %cst = arith.constant dense<0.000000e+00> : vector<32x128xf32>
    %6 = tpu.matmul %4, %5, %cst {dimension_numbers = #tpu.dot_dimension_numbers<[1], [0], [0], [1], [0, 0, 1, 1], [], []>} : vector<32x384xbf16>, vector<384x128xbf16>, vector<32x128xf32> -> vector<32x128xf32>
    %7 = arith.addf %3, %6 : vector<32x128xf32>
    %c0_6 = arith.constant 0 : index
    %c0_7 = arith.constant 0 : index
    %8 = vector.load %arg7[%c0_6, %c0_7] : memref<32x128xf32, #tpu.memory_space<vmem>>, vector<32x128xf32>
    tpu.vector_store %arg7[%c0_6, %c0_7], %7 {strides = array<i32>} : memref<32x128xf32, #tpu.memory_space<vmem>>, vector<32x128xf32>,
    %c2_i32 = arith.constant 2 : i32
    %9 = arith.cmpi eq, %arg2, %c2_i32 : i32
    %10 = arith.extui %9 : i1 to i32
    %c0_i32_8 = arith.constant 0 : i32
    %11 = arith.cmpi ne, %10, %c0_i32_8 : i32
    scf.if %11 {
      %c0_9 = arith.constant 0 : index
      %c0_10 = arith.constant 0 : index
      %12 = vector.load %arg7[%c0_9, %c0_10] : memref<32x128xf32, #tpu.memory_space<vmem>>, vector<32x128xf32>
      %c0_11 = arith.constant 0 : index
      %c0_12 = arith.constant 0 : index
      %13 = vector.load %arg5[%c0_11, %c0_12] : memref<1x128xf32, #tpu.memory_space<vmem>>, vector<1x128xf32>
      %14 = vector.broadcast %13 : vector<1x128xf32> to vector<32x128xf32>
      %15 = arith.addf %12, %14 : vector<32x128xf32>
      %cst_13 = arith.constant 0.000000e+00 : f32
      %16 = vector.broadcast %cst_13 : f32 to vector<32x128xf32>
      %17 = arith.maximumf %15, %16 : vector<32x128xf32>
      %18 = arith.truncf %17 : vector<32x128xf32> to vector<32x128xbf16>
      %c0_14 = arith.constant 0 : index
      %c0_15 = arith.constant 0 : index
      %19 = vector.load %arg6[%c0_14, %c0_15] : memref<32x128xbf16, #tpu.memory_space<vmem>>, vector<32x128xbf16>
      tpu.vector_store %arg6[%c0_14, %c0_15], %18 {strides = array<i32>} : memref<32x128xbf16, #tpu.memory_space<vmem>>, vector<32x128xbf16>,
    } else {
    }
    return
  }
  func.func @transform_0(%arg0: i32, %arg1: i32, %arg2: i32) -> (i32, i32) {
    %c0_i32 = arith.constant 0 : i32
    return %arg0, %arg2 : i32, i32
  }
  func.func @transform_1(%arg0: i32, %arg1: i32, %arg2: i32) -> (i32, i32) {
    %c0_i32 = arith.constant 0 : i32
    return %arg2, %arg1 : i32, i32
  }
  func.func @transform_2(%arg0: i32, %arg1: i32, %arg2: i32) -> (i32, i32) {
    %c0_i32 = arith.constant 0 : i32
    %c0_i32_0 = arith.constant 0 : i32
    return %c0_i32, %arg1 : i32, i32
  }
  func.func @transform_3(%arg0: i32, %arg1: i32, %arg2: i32) -> (i32, i32) {
    %c0_i32 = arith.constant 0 : i32
    return %arg0, %arg1 : i32, i32
  }
}

module attributes {stable_mosaic.version = 11 : i64} {
  func.func @_gemm_kernel(%arg0: i32, %arg1: i32, %arg2: i32, %arg3: memref<8x384xbf16, #tpu.memory_space<vmem>>, %arg4: memref<384x128xbf16, #tpu.memory_space<vmem>>, %arg5: memref<1x128xf32, #tpu.memory_space<vmem>>, %arg6: memref<8x128xbf16, #tpu.memory_space<vmem>>, %arg7: memref<8x128xf32, #tpu.memory_space<vmem>>) attributes {dimension_semantics = [#tpu.dimension_semantics<parallel>, #tpu.dimension_semantics<parallel>, #tpu.dimension_semantics<arbitrary>], iteration_bounds = array<i64: 1, 1, 3>, scalar_prefetch = 0 : i64, scratch_operands = 1 : i64, tpu.core_type = #tpu.core_type<tc>, window_params = [{transform_indices = @transform_0, window_bounds = array<i64: 8, 384>}, {transform_indices = @transform_1, window_bounds = array<i64: 384, 128>}, {transform_indices = @transform_2, window_bounds = array<i64: 1, 128>}, {transform_indices = @transform_3, window_bounds = array<i64: 8, 128>}]} {
    %c0_i32 = arith.constant 0 : i32
    %0 = arith.cmpi eq, %arg2, %c0_i32 : i32
    %1 = arith.extui %0 : i1 to i32
    %c0_i32_0 = arith.constant 0 : i32
    %2 = arith.cmpi ne, %1, %c0_i32_0 : i32
    scf.if %2 {
      %cst_9 = arith.constant 0.000000e+00 : f32
      %12 = vector.broadcast %cst_9 : f32 to vector<8x128xf32>
      %c0_10 = arith.constant 0 : index
      %c0_11 = arith.constant 0 : index
      %13 = vector.load %arg7[%c0_10, %c0_11] : memref<8x128xf32, #tpu.memory_space<vmem>>, vector<8x128xf32>
      tpu.vector_store %arg7[%c0_10, %c0_11], %12 {strides = array<i32>} : memref<8x128xf32, #tpu.memory_space<vmem>>, vector<8x128xf32>,
    } else {
    }
    %c0 = arith.constant 0 : index
    %c0_1 = arith.constant 0 : index
    %3 = vector.load %arg7[%c0, %c0_1] : memref<8x128xf32, #tpu.memory_space<vmem>>, vector<8x128xf32>
    %c0_2 = arith.constant 0 : index
    %c0_3 = arith.constant 0 : index
    %4 = vector.load %arg3[%c0_2, %c0_3] : memref<8x384xbf16, #tpu.memory_space<vmem>>, vector<8x384xbf16>
    %c0_4 = arith.constant 0 : index
    %c0_5 = arith.constant 0 : index
    %5 = vector.load %arg4[%c0_4, %c0_5] : memref<384x128xbf16, #tpu.memory_space<vmem>>, vector<384x128xbf16>
    %cst = arith.constant dense<0.000000e+00> : vector<8x128xf32>
    %6 = tpu.matmul %4, %5, %cst {dimension_numbers = #tpu.dot_dimension_numbers<[1], [0], [0], [1], [0, 0, 1, 1], [], []>} : vector<8x384xbf16>, vector<384x128xbf16>, vector<8x128xf32> -> vector<8x128xf32>
    %7 = arith.addf %3, %6 : vector<8x128xf32>
    %c0_6 = arith.constant 0 : index
    %c0_7 = arith.constant 0 : index
    %8 = vector.load %arg7[%c0_6, %c0_7] : memref<8x128xf32, #tpu.memory_space<vmem>>, vector<8x128xf32>
    tpu.vector_store %arg7[%c0_6, %c0_7], %7 {strides = array<i32>} : memref<8x128xf32, #tpu.memory_space<vmem>>, vector<8x128xf32>,
    %c2_i32 = arith.constant 2 : i32
    %9 = arith.cmpi eq, %arg2, %c2_i32 : i32
    %10 = arith.extui %9 : i1 to i32
    %c0_i32_8 = arith.constant 0 : i32
    %11 = arith.cmpi ne, %10, %c0_i32_8 : i32
    scf.if %11 {
      %c0_9 = arith.constant 0 : index
      %c0_10 = arith.constant 0 : index
      %12 = vector.load %arg7[%c0_9, %c0_10] : memref<8x128xf32, #tpu.memory_space<vmem>>, vector<8x128xf32>
      %c0_11 = arith.constant 0 : index
      %c0_12 = arith.constant 0 : index
      %13 = vector.load %arg5[%c0_11, %c0_12] : memref<1x128xf32, #tpu.memory_space<vmem>>, vector<1x128xf32>
      %14 = vector.broadcast %13 : vector<1x128xf32> to vector<8x128xf32>
      %15 = arith.addf %12, %14 : vector<8x128xf32>
      %cst_13 = arith.constant 0.000000e+00 : f32
      %16 = vector.broadcast %cst_13 : f32 to vector<8x128xf32>
      %17 = arith.maximumf %15, %16 : vector<8x128xf32>
      %18 = arith.truncf %17 : vector<8x128xf32> to vector<8x128xbf16>
      %c0_14 = arith.constant 0 : index
      %c0_15 = arith.constant 0 : index
      %19 = vector.load %arg6[%c0_14, %c0_15] : memref<8x128xbf16, #tpu.memory_space<vmem>>, vector<8x128xbf16>
      tpu.vector_store %arg6[%c0_14, %c0_15], %18 {strides = array<i32>} : memref<8x128xbf16, #tpu.memory_space<vmem>>, vector<8x128xbf16>,
    } else {
    }
    return
  }
  func.func @transform_0(%arg0: i32, %arg1: i32, %arg2: i32) -> (i32, i32) {
    %c0_i32 = arith.constant 0 : i32
    return %arg0, %arg2 : i32, i32
  }
  func.func @transform_1(%arg0: i32, %arg1: i32, %arg2: i32) -> (i32, i32) {
    %c0_i32 = arith.constant 0 : i32
    return %arg2, %arg1 : i32, i32
  }
  func.func @transform_2(%arg0: i32, %arg1: i32, %arg2: i32) -> (i32, i32) {
    %c0_i32 = arith.constant 0 : i32
    %c0_i32_0 = arith.constant 0 : i32
    return %c0_i32, %arg1 : i32, i32
  }
  func.func @transform_3(%arg0: i32, %arg1: i32, %arg2: i32) -> (i32, i32) {
    %c0_i32 = arith.constant 0 : i32
    return %arg0, %arg1 : i32, i32
  }
}

module attributes {stable_mosaic.version = 11 : i64} {
  func.func @_gemm_kernel(%arg0: i32, %arg1: i32, %arg2: i32, %arg3: memref<8x128xbf16, #tpu.memory_space<vmem>>, %arg4: memref<128x128xbf16, #tpu.memory_space<vmem>>, %arg5: memref<1x128xf32, #tpu.memory_space<vmem>>, %arg6: memref<8x128xbf16, #tpu.memory_space<vmem>>, %arg7: memref<8x128xbf16, #tpu.memory_space<vmem>>, %arg8: memref<8x128xf32, #tpu.memory_space<vmem>>) attributes {dimension_semantics = [#tpu.dimension_semantics<parallel>, #tpu.dimension_semantics<parallel>, #tpu.dimension_semantics<arbitrary>], iteration_bounds = array<i64: 1, 1, 1>, scalar_prefetch = 0 : i64, scratch_operands = 1 : i64, tpu.core_type = #tpu.core_type<tc>, window_params = [{transform_indices = @transform_0, window_bounds = array<i64: 8, 128>}, {transform_indices = @transform_1, window_bounds = array<i64: 128, 128>}, {transform_indices = @transform_2, window_bounds = array<i64: 1, 128>}, {transform_indices = @transform_3, window_bounds = array<i64: 8, 128>}, {transform_indices = @transform_4, window_bounds = array<i64: 8, 128>}]} {
    %c0_i32 = arith.constant 0 : i32
    %0 = arith.cmpi eq, %arg2, %c0_i32 : i32
    %1 = arith.extui %0 : i1 to i32
    %c0_i32_0 = arith.constant 0 : i32
    %2 = arith.cmpi ne, %1, %c0_i32_0 : i32
    scf.if %2 {
      %cst_10 = arith.constant 0.000000e+00 : f32
      %12 = vector.broadcast %cst_10 : f32 to vector<8x128xf32>
      %c0_11 = arith.constant 0 : index
      %c0_12 = arith.constant 0 : index
      %13 = vector.load %arg8[%c0_11, %c0_12] : memref<8x128xf32, #tpu.memory_space<vmem>>, vector<8x128xf32>
      tpu.vector_store %arg8[%c0_11, %c0_12], %12 {strides = array<i32>} : memref<8x128xf32, #tpu.memory_space<vmem>>, vector<8x128xf32>,
    } else {
    }
    %c0 = arith.constant 0 : index
    %c0_1 = arith.constant 0 : index
    %3 = vector.load %arg8[%c0, %c0_1] : memref<8x128xf32, #tpu.memory_space<vmem>>, vector<8x128xf32>
    %c0_2 = arith.constant 0 : index
    %c0_3 = arith.constant 0 : index
    %4 = vector.load %arg3[%c0_2, %c0_3] : memref<8x128xbf16, #tpu.memory_space<vmem>>, vector<8x128xbf16>
    %c0_4 = arith.constant 0 : index
    %c0_5 = arith.constant 0 : index
    %5 = vector.load %arg4[%c0_4, %c0_5] : memref<128x128xbf16, #tpu.memory_space<vmem>>, vector<128x128xbf16>
    %cst = arith.constant dense<0.000000e+00> : vector<8x128xf32>
    %6 = tpu.matmul %4, %5, %cst {dimension_numbers = #tpu.dot_dimension_numbers<[1], [0], [0], [1], [0, 0, 1, 1], [], []>} : vector<8x128xbf16>, vector<128x128xbf16>, vector<8x128xf32> -> vector<8x128xf32>
    %7 = arith.addf %3, %6 : vector<8x128xf32>
    %c0_6 = arith.constant 0 : index
    %c0_7 = arith.constant 0 : index
    %8 = vector.load %arg8[%c0_6, %c0_7] : memref<8x128xf32, #tpu.memory_space<vmem>>, vector<8x128xf32>
    tpu.vector_store %arg8[%c0_6, %c0_7], %7 {strides = array<i32>} : memref<8x128xf32, #tpu.memory_space<vmem>>, vector<8x128xf32>,
    %c0_i32_8 = arith.constant 0 : i32
    %9 = arith.cmpi eq, %arg2, %c0_i32_8 : i32
    %10 = arith.extui %9 : i1 to i32
    %c0_i32_9 = arith.constant 0 : i32
    %11 = arith.cmpi ne, %10, %c0_i32_9 : i32
    scf.if %11 {
      %c0_10 = arith.constant 0 : index
      %c0_11 = arith.constant 0 : index
      %12 = vector.load %arg8[%c0_10, %c0_11] : memref<8x128xf32, #tpu.memory_space<vmem>>, vector<8x128xf32>
      %c0_12 = arith.constant 0 : index
      %c0_13 = arith.constant 0 : index
      %13 = vector.load %arg5[%c0_12, %c0_13] : memref<1x128xf32, #tpu.memory_space<vmem>>, vector<1x128xf32>
      %14 = vector.broadcast %13 : vector<1x128xf32> to vector<8x128xf32>
      %15 = arith.addf %12, %14 : vector<8x128xf32>
      %c0_14 = arith.constant 0 : index
      %c0_15 = arith.constant 0 : index
      %16 = vector.load %arg6[%c0_14, %c0_15] : memref<8x128xbf16, #tpu.memory_space<vmem>>, vector<8x128xbf16>
      %17 = arith.extf %16 : vector<8x128xbf16> to vector<8x128xf32>
      %18 = arith.addf %15, %17 : vector<8x128xf32>
      %19 = arith.truncf %18 : vector<8x128xf32> to vector<8x128xbf16>
      %c0_16 = arith.constant 0 : index
      %c0_17 = arith.constant 0 : index
      %20 = vector.load %arg7[%c0_16, %c0_17] : memref<8x128xbf16, #tpu.memory_space<vmem>>, vector<8x128xbf16>
      tpu.vector_store %arg7[%c0_16, %c0_17], %19 {strides = array<i32>} : memref<8x128xbf16, #tpu.memory_space<vmem>>, vector<8x128xbf16>,
    } else {
    }
    return
  }
  func.func @transform_0(%arg0: i32, %arg1: i32, %arg2: i32) -> (i32, i32) {
    %c0_i32 = arith.constant 0 : i32
    return %arg0, %arg2 : i32, i32
  }
  func.func @transform_1(%arg0: i32, %arg1: i32, %arg2: i32) -> (i32, i32) {
    %c0_i32 = arith.constant 0 : i32
    return %arg2, %arg1 : i32, i32
  }
  func.func @transform_2(%arg0: i32, %arg1: i32, %arg2: i32) -> (i32, i32) {
    %c0_i32 = arith.constant 0 : i32
    %c0_i32_0 = arith.constant 0 : i32
    return %c0_i32, %arg1 : i32, i32
  }
  func.func @transform_3(%arg0: i32, %arg1: i32, %arg2: i32) -> (i32, i32) {
    %c0_i32 = arith.constant 0 : i32
    return %arg0, %arg1 : i32, i32
  }
  func.func @transform_4(%arg0: i32, %arg1: i32, %arg2: i32) -> (i32, i32) {
    %c0_i32 = arith.constant 0 : i32
    return %arg0, %arg1 : i32, i32
  }
}

module attributes {stable_mosaic.version = 11 : i64} {
  func.func @_gemm_kernel(%arg0: i32, %arg1: i32, %arg2: i32, %arg3: memref<2x384xbf16, #tpu.memory_space<vmem>>, %arg4: memref<384x128xbf16, #tpu.memory_space<vmem>>, %arg5: memref<1x128xf32, #tpu.memory_space<vmem>>, %arg6: memref<2x128xbf16, #tpu.memory_space<vmem>>, %arg7: memref<2x128xf32, #tpu.memory_space<vmem>>) attributes {dimension_semantics = [#tpu.dimension_semantics<parallel>, #tpu.dimension_semantics<parallel>, #tpu.dimension_semantics<arbitrary>], iteration_bounds = array<i64: 1, 1, 3>, scalar_prefetch = 0 : i64, scratch_operands = 1 : i64, tpu.core_type = #tpu.core_type<tc>, window_params = [{transform_indices = @transform_0, window_bounds = array<i64: 2, 384>}, {transform_indices = @transform_1, window_bounds = array<i64: 384, 128>}, {transform_indices = @transform_2, window_bounds = array<i64: 1, 128>}, {transform_indices = @transform_3, window_bounds = array<i64: 2, 128>}]} {
    %c0_i32 = arith.constant 0 : i32
    %0 = arith.cmpi eq, %arg2, %c0_i32 : i32
    %1 = arith.extui %0 : i1 to i32
    %c0_i32_0 = arith.constant 0 : i32
    %2 = arith.cmpi ne, %1, %c0_i32_0 : i32
    scf.if %2 {
      %cst_9 = arith.constant 0.000000e+00 : f32
      %12 = vector.broadcast %cst_9 : f32 to vector<2x128xf32>
      %c0_10 = arith.constant 0 : index
      %c0_11 = arith.constant 0 : index
      %13 = vector.load %arg7[%c0_10, %c0_11] : memref<2x128xf32, #tpu.memory_space<vmem>>, vector<2x128xf32>
      tpu.vector_store %arg7[%c0_10, %c0_11], %12 {strides = array<i32>} : memref<2x128xf32, #tpu.memory_space<vmem>>, vector<2x128xf32>,
    } else {
    }
    %c0 = arith.constant 0 : index
    %c0_1 = arith.constant 0 : index
    %3 = vector.load %arg7[%c0, %c0_1] : memref<2x128xf32, #tpu.memory_space<vmem>>, vector<2x128xf32>
    %c0_2 = arith.constant 0 : index
    %c0_3 = arith.constant 0 : index
    %4 = vector.load %arg3[%c0_2, %c0_3] : memref<2x384xbf16, #tpu.memory_space<vmem>>, vector<2x384xbf16>
    %c0_4 = arith.constant 0 : index
    %c0_5 = arith.constant 0 : index
    %5 = vector.load %arg4[%c0_4, %c0_5] : memref<384x128xbf16, #tpu.memory_space<vmem>>, vector<384x128xbf16>
    %cst = arith.constant dense<0.000000e+00> : vector<2x128xf32>
    %6 = tpu.matmul %4, %5, %cst {dimension_numbers = #tpu.dot_dimension_numbers<[1], [0], [0], [1], [0, 0, 1, 1], [], []>} : vector<2x384xbf16>, vector<384x128xbf16>, vector<2x128xf32> -> vector<2x128xf32>
    %7 = arith.addf %3, %6 : vector<2x128xf32>
    %c0_6 = arith.constant 0 : index
    %c0_7 = arith.constant 0 : index
    %8 = vector.load %arg7[%c0_6, %c0_7] : memref<2x128xf32, #tpu.memory_space<vmem>>, vector<2x128xf32>
    tpu.vector_store %arg7[%c0_6, %c0_7], %7 {strides = array<i32>} : memref<2x128xf32, #tpu.memory_space<vmem>>, vector<2x128xf32>,
    %c2_i32 = arith.constant 2 : i32
    %9 = arith.cmpi eq, %arg2, %c2_i32 : i32
    %10 = arith.extui %9 : i1 to i32
    %c0_i32_8 = arith.constant 0 : i32
    %11 = arith.cmpi ne, %10, %c0_i32_8 : i32
    scf.if %11 {
      %c0_9 = arith.constant 0 : index
      %c0_10 = arith.constant 0 : index
      %12 = vector.load %arg7[%c0_9, %c0_10] : memref<2x128xf32, #tpu.memory_space<vmem>>, vector<2x128xf32>
      %c0_11 = arith.constant 0 : index
      %c0_12 = arith.constant 0 : index
      %13 = vector.load %arg5[%c0_11, %c0_12] : memref<1x128xf32, #tpu.memory_space<vmem>>, vector<1x128xf32>
      %14 = vector.broadcast %13 : vector<1x128xf32> to vector<2x128xf32>
      %15 = arith.addf %12, %14 : vector<2x128xf32>
      %cst_13 = arith.constant 0.000000e+00 : f32
      %16 = vector.broadcast %cst_13 : f32 to vector<2x128xf32>
      %17 = arith.maximumf %15, %16 : vector<2x128xf32>
      %18 = arith.truncf %17 : vector<2x128xf32> to vector<2x128xbf16>
      %c0_14 = arith.constant 0 : index
      %c0_15 = arith.constant 0 : index
      %19 = vector.load %arg6[%c0_14, %c0_15] : memref<2x128xbf16, #tpu.memory_space<vmem>>, vector<2x128xbf16>
      tpu.vector_store %arg6[%c0_14, %c0_15], %18 {strides = array<i32>} : memref<2x128xbf16, #tpu.memory_space<vmem>>, vector<2x128xbf16>,
    } else {
    }
    return
  }
  func.func @transform_0(%arg0: i32, %arg1: i32, %arg2: i32) -> (i32, i32) {
    %c0_i32 = arith.constant 0 : i32
    return %arg0, %arg2 : i32, i32
  }
  func.func @transform_1(%arg0: i32, %arg1: i32, %arg2: i32) -> (i32, i32) {
    %c0_i32 = arith.constant 0 : i32
    return %arg2, %arg1 : i32, i32
  }
  func.func @transform_2(%arg0: i32, %arg1: i32, %arg2: i32) -> (i32, i32) {
    %c0_i32 = arith.constant 0 : i32
    %c0_i32_0 = arith.constant 0 : i32
    return %c0_i32, %arg1 : i32, i32
  }
  func.func @transform_3(%arg0: i32, %arg1: i32, %arg2: i32) -> (i32, i32) {
    %c0_i32 = arith.constant 0 : i32
    return %arg0, %arg1 : i32, i32
  }
}

module attributes {stable_mosaic.version = 11 : i64} {
  func.func @_gemm_kernel(%arg0: i32, %arg1: i32, %arg2: i32, %arg3: memref<2x128xbf16, #tpu.memory_space<vmem>>, %arg4: memref<128x128xbf16, #tpu.memory_space<vmem>>, %arg5: memref<1x128xf32, #tpu.memory_space<vmem>>, %arg6: memref<2x128xbf16, #tpu.memory_space<vmem>>, %arg7: memref<2x128xf32, #tpu.memory_space<vmem>>) attributes {dimension_semantics = [#tpu.dimension_semantics<parallel>, #tpu.dimension_semantics<parallel>, #tpu.dimension_semantics<arbitrary>], iteration_bounds = array<i64: 1, 1, 1>, scalar_prefetch = 0 : i64, scratch_operands = 1 : i64, tpu.core_type = #tpu.core_type<tc>, window_params = [{transform_indices = @transform_0, window_bounds = array<i64: 2, 128>}, {transform_indices = @transform_1, window_bounds = array<i64: 128, 128>}, {transform_indices = @transform_2, window_bounds = array<i64: 1, 128>}, {transform_indices = @transform_3, window_bounds = array<i64: 2, 128>}]} {
    %c0_i32 = arith.constant 0 : i32
    %0 = arith.cmpi eq, %arg2, %c0_i32 : i32
    %1 = arith.extui %0 : i1 to i32
    %c0_i32_0 = arith.constant 0 : i32
    %2 = arith.cmpi ne, %1, %c0_i32_0 : i32
    scf.if %2 {
      %cst_10 = arith.constant 0.000000e+00 : f32
      %12 = vector.broadcast %cst_10 : f32 to vector<2x128xf32>
      %c0_11 = arith.constant 0 : index
      %c0_12 = arith.constant 0 : index
      %13 = vector.load %arg7[%c0_11, %c0_12] : memref<2x128xf32, #tpu.memory_space<vmem>>, vector<2x128xf32>
      tpu.vector_store %arg7[%c0_11, %c0_12], %12 {strides = array<i32>} : memref<2x128xf32, #tpu.memory_space<vmem>>, vector<2x128xf32>,
    } else {
    }
    %c0 = arith.constant 0 : index
    %c0_1 = arith.constant 0 : index
    %3 = vector.load %arg7[%c0, %c0_1] : memref<2x128xf32, #tpu.memory_space<vmem>>, vector<2x128xf32>
    %c0_2 = arith.constant 0 : index
    %c0_3 = arith.constant 0 : index
    %4 = vector.load %arg3[%c0_2, %c0_3] : memref<2x128xbf16, #tpu.memory_space<vmem>>, vector<2x128xbf16>
    %c0_4 = arith.constant 0 : index
    %c0_5 = arith.constant 0 : index
    %5 = vector.load %arg4[%c0_4, %c0_5] : memref<128x128xbf16, #tpu.memory_space<vmem>>, vector<128x128xbf16>
    %cst = arith.constant dense<0.000000e+00> : vector<2x128xf32>
    %6 = tpu.matmul %4, %5, %cst {dimension_numbers = #tpu.dot_dimension_numbers<[1], [0], [0], [1], [0, 0, 1, 1], [], []>} : vector<2x128xbf16>, vector<128x128xbf16>, vector<2x128xf32> -> vector<2x128xf32>
    %7 = arith.addf %3, %6 : vector<2x128xf32>
    %c0_6 = arith.constant 0 : index
    %c0_7 = arith.constant 0 : index
    %8 = vector.load %arg7[%c0_6, %c0_7] : memref<2x128xf32, #tpu.memory_space<vmem>>, vector<2x128xf32>
    tpu.vector_store %arg7[%c0_6, %c0_7], %7 {strides = array<i32>} : memref<2x128xf32, #tpu.memory_space<vmem>>, vector<2x128xf32>,
    %c0_i32_8 = arith.constant 0 : i32
    %9 = arith.cmpi eq, %arg2, %c0_i32_8 : i32
    %10 = arith.extui %9 : i1 to i32
    %c0_i32_9 = arith.constant 0 : i32
    %11 = arith.cmpi ne, %10, %c0_i32_9 : i32
    scf.if %11 {
      %c0_10 = arith.constant 0 : index
      %c0_11 = arith.constant 0 : index
      %12 = vector.load %arg7[%c0_10, %c0_11] : memref<2x128xf32, #tpu.memory_space<vmem>>, vector<2x128xf32>
      %c0_12 = arith.constant 0 : index
      %c0_13 = arith.constant 0 : index
      %13 = vector.load %arg5[%c0_12, %c0_13] : memref<1x128xf32, #tpu.memory_space<vmem>>, vector<1x128xf32>
      %14 = vector.broadcast %13 : vector<1x128xf32> to vector<2x128xf32>
      %15 = arith.addf %12, %14 : vector<2x128xf32>
      %16 = arith.truncf %15 : vector<2x128xf32> to vector<2x128xbf16>
      %c0_14 = arith.constant 0 : index
      %c0_15 = arith.constant 0 : index
      %17 = vector.load %arg6[%c0_14, %c0_15] : memref<2x128xbf16, #tpu.memory_space<vmem>>, vector<2x128xbf16>
      tpu.vector_store %arg6[%c0_14, %c0_15], %16 {strides = array<i32>} : memref<2x128xbf16, #tpu.memory_space<vmem>>, vector<2x128xbf16>,
    } else {
    }
    return
  }
  func.func @transform_0(%arg0: i32, %arg1: i32, %arg2: i32) -> (i32, i32) {
    %c0_i32 = arith.constant 0 : i32
    return %arg0, %arg2 : i32, i32
  }
  func.func @transform_1(%arg0: i32, %arg1: i32, %arg2: i32) -> (i32, i32) {
    %c0_i32 = arith.constant 0 : i32
    return %arg2, %arg1 : i32, i32
  }
  func.func @transform_2(%arg0: i32, %arg1: i32, %arg2: i32) -> (i32, i32) {
    %c0_i32 = arith.constant 0 : i32
    %c0_i32_0 = arith.constant 0 : i32
    return %c0_i32, %arg1 : i32, i32
  }
  func.func @transform_3(%arg0: i32, %arg1: i32, %arg2: i32) -> (i32, i32) {
    %c0_i32 = arith.constant 0 : i32
    return %arg0, %arg1 : i32, i32
  }
}

module attributes {stable_mosaic.version = 11 : i64} {
  func.func @_gemm_kernel(%arg0: i32, %arg1: i32, %arg2: i32, %arg3: memref<8x384xbf16, #tpu.memory_space<vmem>>, %arg4: memref<384x128xbf16, #tpu.memory_space<vmem>>, %arg5: memref<1x128xf32, #tpu.memory_space<vmem>>, %arg6: memref<8x128xf32, #tpu.memory_space<vmem>>, %arg7: memref<8x128xf32, #tpu.memory_space<vmem>>) attributes {dimension_semantics = [#tpu.dimension_semantics<parallel>, #tpu.dimension_semantics<parallel>, #tpu.dimension_semantics<arbitrary>], iteration_bounds = array<i64: 1, 1, 3>, scalar_prefetch = 0 : i64, scratch_operands = 1 : i64, tpu.core_type = #tpu.core_type<tc>, window_params = [{transform_indices = @transform_0, window_bounds = array<i64: 8, 384>}, {transform_indices = @transform_1, window_bounds = array<i64: 384, 128>}, {transform_indices = @transform_2, window_bounds = array<i64: 1, 128>}, {transform_indices = @transform_3, window_bounds = array<i64: 8, 128>}]} {
    %c0_i32 = arith.constant 0 : i32
    %0 = arith.cmpi eq, %arg2, %c0_i32 : i32
    %1 = arith.extui %0 : i1 to i32
    %c0_i32_0 = arith.constant 0 : i32
    %2 = arith.cmpi ne, %1, %c0_i32_0 : i32
    scf.if %2 {
      %cst_9 = arith.constant 0.000000e+00 : f32
      %12 = vector.broadcast %cst_9 : f32 to vector<8x128xf32>
      %c0_10 = arith.constant 0 : index
      %c0_11 = arith.constant 0 : index
      %13 = vector.load %arg7[%c0_10, %c0_11] : memref<8x128xf32, #tpu.memory_space<vmem>>, vector<8x128xf32>
      tpu.vector_store %arg7[%c0_10, %c0_11], %12 {strides = array<i32>} : memref<8x128xf32, #tpu.memory_space<vmem>>, vector<8x128xf32>,
    } else {
    }
    %c0 = arith.constant 0 : index
    %c0_1 = arith.constant 0 : index
    %3 = vector.load %arg7[%c0, %c0_1] : memref<8x128xf32, #tpu.memory_space<vmem>>, vector<8x128xf32>
    %c0_2 = arith.constant 0 : index
    %c0_3 = arith.constant 0 : index
    %4 = vector.load %arg3[%c0_2, %c0_3] : memref<8x384xbf16, #tpu.memory_space<vmem>>, vector<8x384xbf16>
    %c0_4 = arith.constant 0 : index
    %c0_5 = arith.constant 0 : index
    %5 = vector.load %arg4[%c0_4, %c0_5] : memref<384x128xbf16, #tpu.memory_space<vmem>>, vector<384x128xbf16>
    %cst = arith.constant dense<0.000000e+00> : vector<8x128xf32>
    %6 = tpu.matmul %4, %5, %cst {dimension_numbers = #tpu.dot_dimension_numbers<[1], [0], [0], [1], [0, 0, 1, 1], [], []>} : vector<8x384xbf16>, vector<384x128xbf16>, vector<8x128xf32> -> vector<8x128xf32>
    %7 = arith.addf %3, %6 : vector<8x128xf32>
    %c0_6 = arith.constant 0 : index
    %c0_7 = arith.constant 0 : index
    %8 = vector.load %arg7[%c0_6, %c0_7] : memref<8x128xf32, #tpu.memory_space<vmem>>, vector<8x128xf32>
    tpu.vector_store %arg7[%c0_6, %c0_7], %7 {strides = array<i32>} : memref<8x128xf32, #tpu.memory_space<vmem>>, vector<8x128xf32>,
    %c2_i32 = arith.constant 2 : i32
    %9 = arith.cmpi eq, %arg2, %c2_i32 : i32
    %10 = arith.extui %9 : i1 to i32
    %c0_i32_8 = arith.constant 0 : i32
    %11 = arith.cmpi ne, %10, %c0_i32_8 : i32
    scf.if %11 {
      %c0_9 = arith.constant 0 : index
      %c0_10 = arith.constant 0 : index
      %12 = vector.load %arg7[%c0_9, %c0_10] : memref<8x128xf32, #tpu.memory_space<vmem>>, vector<8x128xf32>
      %c0_11 = arith.constant 0 : index
      %c0_12 = arith.constant 0 : index
      %13 = vector.load %arg5[%c0_11, %c0_12] : memref<1x128xf32, #tpu.memory_space<vmem>>, vector<1x128xf32>
      %14 = vector.broadcast %13 : vector<1x128xf32> to vector<8x128xf32>
      %15 = arith.addf %12, %14 : vector<8x128xf32>
      %c0_13 = arith.constant 0 : index
      %c0_14 = arith.constant 0 : index
      %16 = vector.load %arg6[%c0_13, %c0_14] : memref<8x128xf32, #tpu.memory_space<vmem>>, vector<8x128xf32>
      tpu.vector_store %arg6[%c0_13, %c0_14], %15 {strides = array<i32>} : memref<8x128xf32, #tpu.memory_space<vmem>>, vector<8x128xf32>,
    } else {
    }
    return
  }
  func.func @transform_0(%arg0: i32, %arg1: i32, %arg2: i32) -> (i32, i32) {
    %c0_i32 = arith.constant 0 : i32
    return %arg0, %arg2 : i32, i32
  }
  func.func @transform_1(%arg0: i32, %arg1: i32, %arg2: i32) -> (i32, i32) {
    %c0_i32 = arith.constant 0 : i32
    return %arg2, %arg1 : i32, i32
  }
  func.func @transform_2(%arg0: i32, %arg1: i32, %arg2: i32) -> (i32, i32) {
    %c0_i32 = arith.constant 0 : i32
    %c0_i32_0 = arith.constant 0 : i32
    return %c0_i32, %arg1 : i32, i32
  }
  func.func @transform_3(%arg0: i32, %arg1: i32, %arg2: i32) -> (i32, i32) {
    %c0_i32 = arith.constant 0 : i32
    return %arg0, %arg1 : i32, i32
  }
}

module attributes {stable_mosaic.version = 11 : i64} {
  func.func @_gemm_kernel(%arg0: i32, %arg1: i32, %arg2: i32, %arg3: memref<32x128xbf16, #tpu.memory_space<vmem>>, %arg4: memref<128x128xbf16, #tpu.memory_space<vmem>>, %arg5: memref<1x128xf32, #tpu.memory_space<vmem>>, %arg6: memref<32x128xbf16, #tpu.memory_space<vmem>>, %arg7: memref<32x128xbf16, #tpu.memory_space<vmem>>, %arg8: memref<32x128xf32, #tpu.memory_space<vmem>>) attributes {dimension_semantics = [#tpu.dimension_semantics<parallel>, #tpu.dimension_semantics<parallel>, #tpu.dimension_semantics<arbitrary>], iteration_bounds = array<i64: 1, 1, 1>, scalar_prefetch = 0 : i64, scratch_operands = 1 : i64, tpu.core_type = #tpu.core_type<tc>, window_params = [{transform_indices = @transform_0, window_bounds = array<i64: 32, 128>}, {transform_indices = @transform_1, window_bounds = array<i64: 128, 128>}, {transform_indices = @transform_2, window_bounds = array<i64: 1, 128>}, {transform_indices = @transform_3, window_bounds = array<i64: 32, 128>}, {transform_indices = @transform_4, window_bounds = array<i64: 32, 128>}]} {
    %c0_i32 = arith.constant 0 : i32
    %0 = arith.cmpi eq, %arg2, %c0_i32 : i32
    %1 = arith.extui %0 : i1 to i32
    %c0_i32_0 = arith.constant 0 : i32
    %2 = arith.cmpi ne, %1, %c0_i32_0 : i32
    scf.if %2 {
      %cst_10 = arith.constant 0.000000e+00 : f32
      %12 = vector.broadcast %cst_10 : f32 to vector<32x128xf32>
      %c0_11 = arith.constant 0 : index
      %c0_12 = arith.constant 0 : index
      %13 = vector.load %arg8[%c0_11, %c0_12] : memref<32x128xf32, #tpu.memory_space<vmem>>, vector<32x128xf32>
      tpu.vector_store %arg8[%c0_11, %c0_12], %12 {strides = array<i32>} : memref<32x128xf32, #tpu.memory_space<vmem>>, vector<32x128xf32>,
    } else {
    }
    %c0 = arith.constant 0 : index
    %c0_1 = arith.constant 0 : index
    %3 = vector.load %arg8[%c0, %c0_1] : memref<32x128xf32, #tpu.memory_space<vmem>>, vector<32x128xf32>
    %c0_2 = arith.constant 0 : index
    %c0_3 = arith.constant 0 : index
    %4 = vector.load %arg3[%c0_2, %c0_3] : memref<32x128xbf16, #tpu.memory_space<vmem>>, vector<32x128xbf16>
    %c0_4 = arith.constant 0 : index
    %c0_5 = arith.constant 0 : index
    %5 = vector.load %arg4[%c0_4, %c0_5] : memref<128x128xbf16, #tpu.memory_space<vmem>>, vector<128x128xbf16>
    %cst = arith.constant dense<0.000000e+00> : vector<32x128xf32>
    %6 = tpu.matmul %4, %5, %cst {dimension_numbers = #tpu.dot_dimension_numbers<[1], [0], [0], [1], [0, 0, 1, 1], [], []>} : vector<32x128xbf16>, vector<128x128xbf16>, vector<32x128xf32> -> vector<32x128xf32>
    %7 = arith.addf %3, %6 : vector<32x128xf32>
    %c0_6 = arith.constant 0 : index
    %c0_7 = arith.constant 0 : index
    %8 = vector.load %arg8[%c0_6, %c0_7] : memref<32x128xf32, #tpu.memory_space<vmem>>, vector<32x128xf32>
    tpu.vector_store %arg8[%c0_6, %c0_7], %7 {strides = array<i32>} : memref<32x128xf32, #tpu.memory_space<vmem>>, vector<32x128xf32>,
    %c0_i32_8 = arith.constant 0 : i32
    %9 = arith.cmpi eq, %arg2, %c0_i32_8 : i32
    %10 = arith.extui %9 : i1 to i32
    %c0_i32_9 = arith.constant 0 : i32
    %11 = arith.cmpi ne, %10, %c0_i32_9 : i32
    scf.if %11 {
      %c0_10 = arith.constant 0 : index
      %c0_11 = arith.constant 0 : index
      %12 = vector.load %arg8[%c0_10, %c0_11] : memref<32x128xf32, #tpu.memory_space<vmem>>, vector<32x128xf32>
      %c0_12 = arith.constant 0 : index
      %c0_13 = arith.constant 0 : index
      %13 = vector.load %arg5[%c0_12, %c0_13] : memref<1x128xf32, #tpu.memory_space<vmem>>, vector<1x128xf32>
      %14 = vector.broadcast %13 : vector<1x128xf32> to vector<32x128xf32>
      %15 = arith.addf %12, %14 : vector<32x128xf32>
      %c0_14 = arith.constant 0 : index
      %c0_15 = arith.constant 0 : index
      %16 = vector.load %arg6[%c0_14, %c0_15] : memref<32x128xbf16, #tpu.memory_space<vmem>>, vector<32x128xbf16>
      %17 = arith.extf %16 : vector<32x128xbf16> to vector<32x128xf32>
      %18 = arith.addf %15, %17 : vector<32x128xf32>
      %19 = arith.truncf %18 : vector<32x128xf32> to vector<32x128xbf16>
      %c0_16 = arith.constant 0 : index
      %c0_17 = arith.constant 0 : index
      %20 = vector.load %arg7[%c0_16, %c0_17] : memref<32x128xbf16, #tpu.memory_space<vmem>>, vector<32x128xbf16>
      tpu.vector_store %arg7[%c0_16, %c0_17], %19 {strides = array<i32>} : memref<32x128xbf16, #tpu.memory_space<vmem>>, vector<32x128xbf16>,
    } else {
    }
    return
  }
  func.func @transform_0(%arg0: i32, %arg1: i32, %arg2: i32) -> (i32, i32) {
    %c0_i32 = arith.constant 0 : i32
    return %arg0, %arg2 : i32, i32
  }
  func.func @transform_1(%arg0: i32, %arg1: i32, %arg2: i32) -> (i32, i32) {
    %c0_i32 = arith.constant 0 : i32
    return %arg2, %arg1 : i32, i32
  }
  func.func @transform_2(%arg0: i32, %arg1: i32, %arg2: i32) -> (i32, i32) {
    %c0_i32 = arith.constant 0 : i32
    %c0_i32_0 = arith.constant 0 : i32
    return %c0_i32, %arg1 : i32, i32
  }
  func.func @transform_3(%arg0: i32, %arg1: i32, %arg2: i32) -> (i32, i32) {
    %c0_i32 = arith.constant 0 : i32
    return %arg0, %arg1 : i32, i32
  }
  func.func @transform_4(%arg0: i32, %arg1: i32, %arg2: i32) -> (i32, i32) {
    %c0_i32 = arith.constant 0 : i32
    return %arg0, %arg1 : i32, i32
  }
}

module attributes {stable_mosaic.version = 11 : i64} {
  func.func @_gemm_kernel(%arg0: i32, %arg1: i32, %arg2: i32, %arg3: memref<32x384xbf16, #tpu.memory_space<vmem>>, %arg4: memref<384x128xbf16, #tpu.memory_space<vmem>>, %arg5: memref<1x128xf32, #tpu.memory_space<vmem>>, %arg6: memref<32x128xf32, #tpu.memory_space<vmem>>, %arg7: memref<32x128xf32, #tpu.memory_space<vmem>>) attributes {dimension_semantics = [#tpu.dimension_semantics<parallel>, #tpu.dimension_semantics<parallel>, #tpu.dimension_semantics<arbitrary>], iteration_bounds = array<i64: 1, 1, 3>, scalar_prefetch = 0 : i64, scratch_operands = 1 : i64, tpu.core_type = #tpu.core_type<tc>, window_params = [{transform_indices = @transform_0, window_bounds = array<i64: 32, 384>}, {transform_indices = @transform_1, window_bounds = array<i64: 384, 128>}, {transform_indices = @transform_2, window_bounds = array<i64: 1, 128>}, {transform_indices = @transform_3, window_bounds = array<i64: 32, 128>}]} {
    %c0_i32 = arith.constant 0 : i32
    %0 = arith.cmpi eq, %arg2, %c0_i32 : i32
    %1 = arith.extui %0 : i1 to i32
    %c0_i32_0 = arith.constant 0 : i32
    %2 = arith.cmpi ne, %1, %c0_i32_0 : i32
    scf.if %2 {
      %cst_9 = arith.constant 0.000000e+00 : f32
      %12 = vector.broadcast %cst_9 : f32 to vector<32x128xf32>
      %c0_10 = arith.constant 0 : index
      %c0_11 = arith.constant 0 : index
      %13 = vector.load %arg7[%c0_10, %c0_11] : memref<32x128xf32, #tpu.memory_space<vmem>>, vector<32x128xf32>
      tpu.vector_store %arg7[%c0_10, %c0_11], %12 {strides = array<i32>} : memref<32x128xf32, #tpu.memory_space<vmem>>, vector<32x128xf32>,
    } else {
    }
    %c0 = arith.constant 0 : index
    %c0_1 = arith.constant 0 : index
    %3 = vector.load %arg7[%c0, %c0_1] : memref<32x128xf32, #tpu.memory_space<vmem>>, vector<32x128xf32>
    %c0_2 = arith.constant 0 : index
    %c0_3 = arith.constant 0 : index
    %4 = vector.load %arg3[%c0_2, %c0_3] : memref<32x384xbf16, #tpu.memory_space<vmem>>, vector<32x384xbf16>
    %c0_4 = arith.constant 0 : index
    %c0_5 = arith.constant 0 : index
    %5 = vector.load %arg4[%c0_4, %c0_5] : memref<384x128xbf16, #tpu.memory_space<vmem>>, vector<384x128xbf16>
    %cst = arith.constant dense<0.000000e+00> : vector<32x128xf32>
    %6 = tpu.matmul %4, %5, %cst {dimension_numbers = #tpu.dot_dimension_numbers<[1], [0], [0], [1], [0, 0, 1, 1], [], []>} : vector<32x384xbf16>, vector<384x128xbf16>, vector<32x128xf32> -> vector<32x128xf32>
    %7 = arith.addf %3, %6 : vector<32x128xf32>
    %c0_6 = arith.constant 0 : index
    %c0_7 = arith.constant 0 : index
    %8 = vector.load %arg7[%c0_6, %c0_7] : memref<32x128xf32, #tpu.memory_space<vmem>>, vector<32x128xf32>
    tpu.vector_store %arg7[%c0_6, %c0_7], %7 {strides = array<i32>} : memref<32x128xf32, #tpu.memory_space<vmem>>, vector<32x128xf32>,
    %c2_i32 = arith.constant 2 : i32
    %9 = arith.cmpi eq, %arg2, %c2_i32 : i32
    %10 = arith.extui %9 : i1 to i32
    %c0_i32_8 = arith.constant 0 : i32
    %11 = arith.cmpi ne, %10, %c0_i32_8 : i32
    scf.if %11 {
      %c0_9 = arith.constant 0 : index
      %c0_10 = arith.constant 0 : index
      %12 = vector.load %arg7[%c0_9, %c0_10] : memref<32x128xf32, #tpu.memory_space<vmem>>, vector<32x128xf32>
      %c0_11 = arith.constant 0 : index
      %c0_12 = arith.constant 0 : index
      %13 = vector.load %arg5[%c0_11, %c0_12] : memref<1x128xf32, #tpu.memory_space<vmem>>, vector<1x128xf32>
      %14 = vector.broadcast %13 : vector<1x128xf32> to vector<32x128xf32>
      %15 = arith.addf %12, %14 : vector<32x128xf32>
      %c0_13 = arith.constant 0 : index
      %c0_14 = arith.constant 0 : index
      %16 = vector.load %arg6[%c0_13, %c0_14] : memref<32x128xf32, #tpu.memory_space<vmem>>, vector<32x128xf32>
      tpu.vector_store %arg6[%c0_13, %c0_14], %15 {strides = array<i32>} : memref<32x128xf32, #tpu.memory_space<vmem>>, vector<32x128xf32>,
    } else {
    }
    return
  }
  func.func @transform_0(%arg0: i32, %arg1: i32, %arg2: i32) -> (i32, i32) {
    %c0_i32 = arith.constant 0 : i32
    return %arg0, %arg2 : i32, i32
  }
  func.func @transform_1(%arg0: i32, %arg1: i32, %arg2: i32) -> (i32, i32) {
    %c0_i32 = arith.constant 0 : i32
    return %arg2, %arg1 : i32, i32
  }
  func.func @transform_2(%arg0: i32, %arg1: i32, %arg2: i32) -> (i32, i32) {
    %c0_i32 = arith.constant 0 : i32
    %c0_i32_0 = arith.constant 0 : i32
    return %c0_i32, %arg1 : i32, i32
  }
  func.func @transform_3(%arg0: i32, %arg1: i32, %arg2: i32) -> (i32, i32) {
    %c0_i32 = arith.constant 0 : i32
    return %arg0, %arg1 : i32, i32
  }
}

module attributes {stable_mosaic.version = 11 : i64} {
  func.func @_gemm_kernel(%arg0: i32, %arg1: i32, %arg2: i32, %arg3: memref<128x128xbf16, #tpu.memory_space<vmem>>, %arg4: memref<128x128xbf16, #tpu.memory_space<vmem>>, %arg5: memref<1x128xf32, #tpu.memory_space<vmem>>, %arg6: memref<128x128xbf16, #tpu.memory_space<vmem>>, %arg7: memref<128x128xbf16, #tpu.memory_space<vmem>>, %arg8: memref<128x128xf32, #tpu.memory_space<vmem>>) attributes {dimension_semantics = [#tpu.dimension_semantics<parallel>, #tpu.dimension_semantics<parallel>, #tpu.dimension_semantics<arbitrary>], iteration_bounds = array<i64: 1, 1, 1>, scalar_prefetch = 0 : i64, scratch_operands = 1 : i64, tpu.core_type = #tpu.core_type<tc>, window_params = [{transform_indices = @transform_0, window_bounds = array<i64: 128, 128>}, {transform_indices = @transform_1, window_bounds = array<i64: 128, 128>}, {transform_indices = @transform_2, window_bounds = array<i64: 1, 128>}, {transform_indices = @transform_3, window_bounds = array<i64: 128, 128>}, {transform_indices = @transform_4, window_bounds = array<i64: 128, 128>}]} {
    %c0_i32 = arith.constant 0 : i32
    %0 = arith.cmpi eq, %arg2, %c0_i32 : i32
    %1 = arith.extui %0 : i1 to i32
    %c0_i32_0 = arith.constant 0 : i32
    %2 = arith.cmpi ne, %1, %c0_i32_0 : i32
    scf.if %2 {
      %cst_10 = arith.constant 0.000000e+00 : f32
      %12 = vector.broadcast %cst_10 : f32 to vector<128x128xf32>
      %c0_11 = arith.constant 0 : index
      %c0_12 = arith.constant 0 : index
      %13 = vector.load %arg8[%c0_11, %c0_12] : memref<128x128xf32, #tpu.memory_space<vmem>>, vector<128x128xf32>
      tpu.vector_store %arg8[%c0_11, %c0_12], %12 {strides = array<i32>} : memref<128x128xf32, #tpu.memory_space<vmem>>, vector<128x128xf32>,
    } else {
    }
    %c0 = arith.constant 0 : index
    %c0_1 = arith.constant 0 : index
    %3 = vector.load %arg8[%c0, %c0_1] : memref<128x128xf32, #tpu.memory_space<vmem>>, vector<128x128xf32>
    %c0_2 = arith.constant 0 : index
    %c0_3 = arith.constant 0 : index
    %4 = vector.load %arg3[%c0_2, %c0_3] : memref<128x128xbf16, #tpu.memory_space<vmem>>, vector<128x128xbf16>
    %c0_4 = arith.constant 0 : index
    %c0_5 = arith.constant 0 : index
    %5 = vector.load %arg4[%c0_4, %c0_5] : memref<128x128xbf16, #tpu.memory_space<vmem>>, vector<128x128xbf16>
    %cst = arith.constant dense<0.000000e+00> : vector<128x128xf32>
    %6 = tpu.matmul %4, %5, %cst {dimension_numbers = #tpu.dot_dimension_numbers<[1], [0], [0], [1], [0, 0, 1, 1], [], []>} : vector<128x128xbf16>, vector<128x128xbf16>, vector<128x128xf32> -> vector<128x128xf32>
    %7 = arith.addf %3, %6 : vector<128x128xf32>
    %c0_6 = arith.constant 0 : index
    %c0_7 = arith.constant 0 : index
    %8 = vector.load %arg8[%c0_6, %c0_7] : memref<128x128xf32, #tpu.memory_space<vmem>>, vector<128x128xf32>
    tpu.vector_store %arg8[%c0_6, %c0_7], %7 {strides = array<i32>} : memref<128x128xf32, #tpu.memory_space<vmem>>, vector<128x128xf32>,
    %c0_i32_8 = arith.constant 0 : i32
    %9 = arith.cmpi eq, %arg2, %c0_i32_8 : i32
    %10 = arith.extui %9 : i1 to i32
    %c0_i32_9 = arith.constant 0 : i32
    %11 = arith.cmpi ne, %10, %c0_i32_9 : i32
    scf.if %11 {
      %c0_10 = arith.constant 0 : index
      %c0_11 = arith.constant 0 : index
      %12 = vector.load %arg8[%c0_10, %c0_11] : memref<128x128xf32, #tpu.memory_space<vmem>>, vector<128x128xf32>
      %c0_12 = arith.constant 0 : index
      %c0_13 = arith.constant 0 : index
      %13 = vector.load %arg5[%c0_12, %c0_13] : memref<1x128xf32, #tpu.memory_space<vmem>>, vector<1x128xf32>
      %14 = vector.broadcast %13 : vector<1x128xf32> to vector<128x128xf32>
      %15 = arith.addf %12, %14 : vector<128x128xf32>
      %c0_14 = arith.constant 0 : index
      %c0_15 = arith.constant 0 : index
      %16 = vector.load %arg6[%c0_14, %c0_15] : memref<128x128xbf16, #tpu.memory_space<vmem>>, vector<128x128xbf16>
      %17 = arith.extf %16 : vector<128x128xbf16> to vector<128x128xf32>
      %18 = arith.addf %15, %17 : vector<128x128xf32>
      %19 = arith.truncf %18 : vector<128x128xf32> to vector<128x128xbf16>
      %c0_16 = arith.constant 0 : index
      %c0_17 = arith.constant 0 : index
      %20 = vector.load %arg7[%c0_16, %c0_17] : memref<128x128xbf16, #tpu.memory_space<vmem>>, vector<128x128xbf16>
      tpu.vector_store %arg7[%c0_16, %c0_17], %19 {strides = array<i32>} : memref<128x128xbf16, #tpu.memory_space<vmem>>, vector<128x128xbf16>,
    } else {
    }
    return
  }
  func.func @transform_0(%arg0: i32, %arg1: i32, %arg2: i32) -> (i32, i32) {
    %c0_i32 = arith.constant 0 : i32
    return %arg0, %arg2 : i32, i32
  }
  func.func @transform_1(%arg0: i32, %arg1: i32, %arg2: i32) -> (i32, i32) {
    %c0_i32 = arith.constant 0 : i32
    return %arg2, %arg1 : i32, i32
  }
  func.func @transform_2(%arg0: i32, %arg1: i32, %arg2: i32) -> (i32, i32) {
    %c0_i32 = arith.constant 0 : i32
    %c0_i32_0 = arith.constant 0 : i32
    return %c0_i32, %arg1 : i32, i32
  }
  func.func @transform_3(%arg0: i32, %arg1: i32, %arg2: i32) -> (i32, i32) {
    %c0_i32 = arith.constant 0 : i32
    return %arg0, %arg1 : i32, i32
  }
  func.func @transform_4(%arg0: i32, %arg1: i32, %arg2: i32) -> (i32, i32) {
    %c0_i32 = arith.constant 0 : i32
    return %arg0, %arg1 : i32, i32
  }
}

module attributes {stable_mosaic.version = 11 : i64} {
  func.func @_gemm_kernel(%arg0: i32, %arg1: i32, %arg2: i32, %arg3: memref<128x384xbf16, #tpu.memory_space<vmem>>, %arg4: memref<384x128xbf16, #tpu.memory_space<vmem>>, %arg5: memref<1x128xf32, #tpu.memory_space<vmem>>, %arg6: memref<128x128xf32, #tpu.memory_space<vmem>>, %arg7: memref<128x128xf32, #tpu.memory_space<vmem>>) attributes {dimension_semantics = [#tpu.dimension_semantics<parallel>, #tpu.dimension_semantics<parallel>, #tpu.dimension_semantics<arbitrary>], iteration_bounds = array<i64: 1, 1, 3>, scalar_prefetch = 0 : i64, scratch_operands = 1 : i64, tpu.core_type = #tpu.core_type<tc>, window_params = [{transform_indices = @transform_0, window_bounds = array<i64: 128, 384>}, {transform_indices = @transform_1, window_bounds = array<i64: 384, 128>}, {transform_indices = @transform_2, window_bounds = array<i64: 1, 128>}, {transform_indices = @transform_3, window_bounds = array<i64: 128, 128>}]} {
    %c0_i32 = arith.constant 0 : i32
    %0 = arith.cmpi eq, %arg2, %c0_i32 : i32
    %1 = arith.extui %0 : i1 to i32
    %c0_i32_0 = arith.constant 0 : i32
    %2 = arith.cmpi ne, %1, %c0_i32_0 : i32
    scf.if %2 {
      %cst_9 = arith.constant 0.000000e+00 : f32
      %12 = vector.broadcast %cst_9 : f32 to vector<128x128xf32>
      %c0_10 = arith.constant 0 : index
      %c0_11 = arith.constant 0 : index
      %13 = vector.load %arg7[%c0_10, %c0_11] : memref<128x128xf32, #tpu.memory_space<vmem>>, vector<128x128xf32>
      tpu.vector_store %arg7[%c0_10, %c0_11], %12 {strides = array<i32>} : memref<128x128xf32, #tpu.memory_space<vmem>>, vector<128x128xf32>,
    } else {
    }
    %c0 = arith.constant 0 : index
    %c0_1 = arith.constant 0 : index
    %3 = vector.load %arg7[%c0, %c0_1] : memref<128x128xf32, #tpu.memory_space<vmem>>, vector<128x128xf32>
    %c0_2 = arith.constant 0 : index
    %c0_3 = arith.constant 0 : index
    %4 = vector.load %arg3[%c0_2, %c0_3] : memref<128x384xbf16, #tpu.memory_space<vmem>>, vector<128x384xbf16>
    %c0_4 = arith.constant 0 : index
    %c0_5 = arith.constant 0 : index
    %5 = vector.load %arg4[%c0_4, %c0_5] : memref<384x128xbf16, #tpu.memory_space<vmem>>, vector<384x128xbf16>
    %cst = arith.constant dense<0.000000e+00> : vector<128x128xf32>
    %6 = tpu.matmul %4, %5, %cst {dimension_numbers = #tpu.dot_dimension_numbers<[1], [0], [0], [1], [0, 0, 1, 1], [], []>} : vector<128x384xbf16>, vector<384x128xbf16>, vector<128x128xf32> -> vector<128x128xf32>
    %7 = arith.addf %3, %6 : vector<128x128xf32>
    %c0_6 = arith.constant 0 : index
    %c0_7 = arith.constant 0 : index
    %8 = vector.load %arg7[%c0_6, %c0_7] : memref<128x128xf32, #tpu.memory_space<vmem>>, vector<128x128xf32>
    tpu.vector_store %arg7[%c0_6, %c0_7], %7 {strides = array<i32>} : memref<128x128xf32, #tpu.memory_space<vmem>>, vector<128x128xf32>,
    %c2_i32 = arith.constant 2 : i32
    %9 = arith.cmpi eq, %arg2, %c2_i32 : i32
    %10 = arith.extui %9 : i1 to i32
    %c0_i32_8 = arith.constant 0 : i32
    %11 = arith.cmpi ne, %10, %c0_i32_8 : i32
    scf.if %11 {
      %c0_9 = arith.constant 0 : index
      %c0_10 = arith.constant 0 : index
      %12 = vector.load %arg7[%c0_9, %c0_10] : memref<128x128xf32, #tpu.memory_space<vmem>>, vector<128x128xf32>
      %c0_11 = arith.constant 0 : index
      %c0_12 = arith.constant 0 : index
      %13 = vector.load %arg5[%c0_11, %c0_12] : memref<1x128xf32, #tpu.memory_space<vmem>>, vector<1x128xf32>
      %14 = vector.broadcast %13 : vector<1x128xf32> to vector<128x128xf32>
      %15 = arith.addf %12, %14 : vector<128x128xf32>
      %c0_13 = arith.constant 0 : index
      %c0_14 = arith.constant 0 : index
      %16 = vector.load %arg6[%c0_13, %c0_14] : memref<128x128xf32, #tpu.memory_space<vmem>>, vector<128x128xf32>
      tpu.vector_store %arg6[%c0_13, %c0_14], %15 {strides = array<i32>} : memref<128x128xf32, #tpu.memory_space<vmem>>, vector<128x128xf32>,
    } else {
    }
    return
  }
  func.func @transform_0(%arg0: i32, %arg1: i32, %arg2: i32) -> (i32, i32) {
    %c0_i32 = arith.constant 0 : i32
    return %arg0, %arg2 : i32, i32
  }
  func.func @transform_1(%arg0: i32, %arg1: i32, %arg2: i32) -> (i32, i32) {
    %c0_i32 = arith.constant 0 : i32
    return %arg2, %arg1 : i32, i32
  }
  func.func @transform_2(%arg0: i32, %arg1: i32, %arg2: i32) -> (i32, i32) {
    %c0_i32 = arith.constant 0 : i32
    %c0_i32_0 = arith.constant 0 : i32
    return %c0_i32, %arg1 : i32, i32
  }
  func.func @transform_3(%arg0: i32, %arg1: i32, %arg2: i32) -> (i32, i32) {
    %c0_i32 = arith.constant 0 : i32
    return %arg0, %arg1 : i32, i32
  }
}

module attributes {stable_mosaic.version = 11 : i64} {
  func.func @_gemm_kernel(%arg0: i32, %arg1: i32, %arg2: i32, %arg3: memref<2x384xbf16, #tpu.memory_space<vmem>>, %arg4: memref<384x128xbf16, #tpu.memory_space<vmem>>, %arg5: memref<1x128xf32, #tpu.memory_space<vmem>>, %arg6: memref<2x128xf32, #tpu.memory_space<vmem>>, %arg7: memref<2x128xf32, #tpu.memory_space<vmem>>) attributes {dimension_semantics = [#tpu.dimension_semantics<parallel>, #tpu.dimension_semantics<parallel>, #tpu.dimension_semantics<arbitrary>], iteration_bounds = array<i64: 1, 1, 3>, scalar_prefetch = 0 : i64, scratch_operands = 1 : i64, tpu.core_type = #tpu.core_type<tc>, window_params = [{transform_indices = @transform_0, window_bounds = array<i64: 2, 384>}, {transform_indices = @transform_1, window_bounds = array<i64: 384, 128>}, {transform_indices = @transform_2, window_bounds = array<i64: 1, 128>}, {transform_indices = @transform_3, window_bounds = array<i64: 2, 128>}]} {
    %c0_i32 = arith.constant 0 : i32
    %0 = arith.cmpi eq, %arg2, %c0_i32 : i32
    %1 = arith.extui %0 : i1 to i32
    %c0_i32_0 = arith.constant 0 : i32
    %2 = arith.cmpi ne, %1, %c0_i32_0 : i32
    scf.if %2 {
      %cst_9 = arith.constant 0.000000e+00 : f32
      %12 = vector.broadcast %cst_9 : f32 to vector<2x128xf32>
      %c0_10 = arith.constant 0 : index
      %c0_11 = arith.constant 0 : index
      %13 = vector.load %arg7[%c0_10, %c0_11] : memref<2x128xf32, #tpu.memory_space<vmem>>, vector<2x128xf32>
      tpu.vector_store %arg7[%c0_10, %c0_11], %12 {strides = array<i32>} : memref<2x128xf32, #tpu.memory_space<vmem>>, vector<2x128xf32>,
    } else {
    }
    %c0 = arith.constant 0 : index
    %c0_1 = arith.constant 0 : index
    %3 = vector.load %arg7[%c0, %c0_1] : memref<2x128xf32, #tpu.memory_space<vmem>>, vector<2x128xf32>
    %c0_2 = arith.constant 0 : index
    %c0_3 = arith.constant 0 : index
    %4 = vector.load %arg3[%c0_2, %c0_3] : memref<2x384xbf16, #tpu.memory_space<vmem>>, vector<2x384xbf16>
    %c0_4 = arith.constant 0 : index
    %c0_5 = arith.constant 0 : index
    %5 = vector.load %arg4[%c0_4, %c0_5] : memref<384x128xbf16, #tpu.memory_space<vmem>>, vector<384x128xbf16>
    %cst = arith.constant dense<0.000000e+00> : vector<2x128xf32>
    %6 = tpu.matmul %4, %5, %cst {dimension_numbers = #tpu.dot_dimension_numbers<[1], [0], [0], [1], [0, 0, 1, 1], [], []>} : vector<2x384xbf16>, vector<384x128xbf16>, vector<2x128xf32> -> vector<2x128xf32>
    %7 = arith.addf %3, %6 : vector<2x128xf32>
    %c0_6 = arith.constant 0 : index
    %c0_7 = arith.constant 0 : index
    %8 = vector.load %arg7[%c0_6, %c0_7] : memref<2x128xf32, #tpu.memory_space<vmem>>, vector<2x128xf32>
    tpu.vector_store %arg7[%c0_6, %c0_7], %7 {strides = array<i32>} : memref<2x128xf32, #tpu.memory_space<vmem>>, vector<2x128xf32>,
    %c2_i32 = arith.constant 2 : i32
    %9 = arith.cmpi eq, %arg2, %c2_i32 : i32
    %10 = arith.extui %9 : i1 to i32
    %c0_i32_8 = arith.constant 0 : i32
    %11 = arith.cmpi ne, %10, %c0_i32_8 : i32
    scf.if %11 {
      %c0_9 = arith.constant 0 : index
      %c0_10 = arith.constant 0 : index
      %12 = vector.load %arg7[%c0_9, %c0_10] : memref<2x128xf32, #tpu.memory_space<vmem>>, vector<2x128xf32>
      %c0_11 = arith.constant 0 : index
      %c0_12 = arith.constant 0 : index
      %13 = vector.load %arg5[%c0_11, %c0_12] : memref<1x128xf32, #tpu.memory_space<vmem>>, vector<1x128xf32>
      %14 = vector.broadcast %13 : vector<1x128xf32> to vector<2x128xf32>
      %15 = arith.addf %12, %14 : vector<2x128xf32>
      %c0_13 = arith.constant 0 : index
      %c0_14 = arith.constant 0 : index
      %16 = vector.load %arg6[%c0_13, %c0_14] : memref<2x128xf32, #tpu.memory_space<vmem>>, vector<2x128xf32>
      tpu.vector_store %arg6[%c0_13, %c0_14], %15 {strides = array<i32>} : memref<2x128xf32, #tpu.memory_space<vmem>>, vector<2x128xf32>,
    } else {
    }
    return
  }
  func.func @transform_0(%arg0: i32, %arg1: i32, %arg2: i32) -> (i32, i32) {
    %c0_i32 = arith.constant 0 : i32
    return %arg0, %arg2 : i32, i32
  }
  func.func @transform_1(%arg0: i32, %arg1: i32, %arg2: i32) -> (i32, i32) {
    %c0_i32 = arith.constant 0 : i32
    return %arg2, %arg1 : i32, i32
  }
  func.func @transform_2(%arg0: i32, %arg1: i32, %arg2: i32) -> (i32, i32) {
    %c0_i32 = arith.constant 0 : i32
    %c0_i32_0 = arith.constant 0 : i32
    return %c0_i32, %arg1 : i32, i32
  }
  func.func @transform_3(%arg0: i32, %arg1: i32, %arg2: i32) -> (i32, i32) {
    %c0_i32 = arith.constant 0 : i32
    return %arg0, %arg1 : i32, i32
  }
}

</mosaic_0001>

<bundles_post_ra>
// kernel: backbone_with_fpn_forward.13
= control target key start
LH: loop header
LB: loop body
LE: loop exit
PB: predicated region body
PF: predicated region fallthrough
CT: control target
= control target key end

     0   :  { %s1632_s12 = smov 0   ;;  %s1634_s13 = smov 0   ;;  %s1804_s0 = inlined_call_operand.vmem [shape: bf16[512,147], index: 0, kind: input, shape index: {}]   ;;  %s1805_s1 = inlined_call_operand.vmem [shape: bf16[147,128], index: 1, kind: input, shape index: {}]   ;;  %s1806_s2 = inlined_call_operand.vmem [shape: f32[1,128], index: 2, kind: input, shape index: {}]   ;;  %s1807_s3 = inlined_call_operand.vmem [shape: bf16[512,128], index: 3, kind: output, shape index: {}]  }
   0x1   :  { %s1636_s14 = smov 0  }
   0x2 LB: > { %s32_s15 = sadd.s32 1, %s1604_s13  ;;  %p1255_p0 = scmp.ge.s32.totalorder %s1608_s14, 1  ;;  %s1608_s14 = sphi %s1636_s14, %s13_s14   ;;  %s1604_s13 = sphi %s1634_s13, %s1809_s13   ;;  %s1600_s12 = sphi %s1632_s12, %s1808_s12  }
   0x3   : > { %p34_p1 = scmp.ge.s32.totalorder %s32_s15, 2  ;;  %p191_p2 = scmp.lt.s32.totalorder %s1608_s14, 3 }
   0x5   : > { %s1811_s15 = smov (%p34_p1, %s32_s15), 0  ;;  %p192_p3 = pnand %p1255_p0, %p191_p2 }
   0x6   : > { %s1256_s22 = sshll.u32 (!%p192_p3), %s1600_s12, 5 }
   0x7   : > { %195 = sbr.rel (%p192_p3) target bundleno = 313 (0x139), region = 32  ;;  %p236_p4 = scmp.lt.s32.totalorder (!%p192_p3), %s1256_s22, 63 }
   0xc   : > { %v1528_v0 = vld [vmem:[%s1805_s1 + $0x38] sm:$0xff]   ;;  %v1610_v1 = vmov 0   ;;  %v1529_v2 = vld [vmem:[%s1805_s1 + $0x30] sm:$0xff]   ;;  %v1530_v3 = vld [vmem:[%s1805_s1 + $0x28] sm:$0xff]   ;;  %s1813_s22 = smov (!%p236_p4, %s1256_s22), 63  ;;  %vm588_vm0 = vcmask 154624  }
   0xd   : > { %644 = vmatprep.subr.bf16.mxu0 %v1610_v1  ;;  %1482 = vmatprep.subr.bf16.mxu1 %v1610_v1  ;;  %v1531_v4 = vld [vmem:[%s1805_s1 + $0x20] sm:$0xff]   ;;  %s1354_s25 = sshll.u32 %s1813_s22, 3  ;;  %v1532_v5 = vld [vmem:[%s1805_s1 + $0x18] sm:$0xff]   ;;  %v1533_v8 = vld [vmem:[%s1805_s1 + $0x10] sm:$0xff]   ;;  %vm637_vm1 = vcmask 1040384   ;;  %vm638_vm2 = vcmask 1041408  }
   0xe   : > { %645 = vmatpush1.bf16.msra.mxu0 %v1528_v0  ;;  %1492 = vmatpush1.bf16.msra.mxu1 %v1528_v0  ;;  %s1668_s28 = scalar_lea.vmem %s1804_s0, %s1354_s25  ;;  %v1534_v9 = vld [vmem:[%s1805_s1 + $0x8] sm:$0xff]   ;;  %v1611_v10 = vmov 65535   ;;  %v1535_v12 = vld [vmem:[%s1805_s1] sm:$0xff]   ;;  %s1260_s19 = sshll.u32 %s1813_s22, 2 }
   0xf   : > { %646 = vmatprep.subr.bf16.mxu0 %v1610_v1  ;;  %1483 = vmatprep.subr.bf16.mxu1 %v1610_v1  ;;  %v1540_v6 = vld [vmem:[%s1668_s28 + $0x4] ss:$8 sps:$4 sm:$0xff]   ;;  %v639_v11 = vsel %vm637_vm1, 4294967295, %v1611_v10  ;;  %v1536_v13 = vld [vmem:[%s1805_s1 + $0x48] ss:$0 sps:$4 sm:$0x33]   ;;  %s1749_s23 = scalar_lea.vmem %s1807_s3, %s1260_s19 }
  0x10   : > { %v1543_v7 = vld [vmem:[%s1668_s28 + $0x84] ss:$8 sps:$4 sm:$0xff]   ;;  %1303 = vmatprep.mubr.msk.bf16.mxu0 %vm588_vm0, %v1540_v6  ;;  %v640_v14 = vsel %vm638_vm2, %v639_v11, 0  ;;  %v1538_v17 = vld [vmem:[%s1668_s28] ss:$8 sps:$4 sm:$0xff]  }
  0x11   : > { %1311 = vmatprep.mubr.msk.bf16.mxu1 %vm588_vm0, %v1543_v7  ;;  %v642_v15 = vand.u32 %v1536_v13, %v640_v14  ;;  %v1537_v16 = vld [vmem:[%s1805_s1 + $0x40] sm:$0xff]   ;;  %v1544_v19 = vld [vmem:[%s1668_s28 + $0x14] ss:$8 sps:$4 sm:$0xff]   ;;  %v1548_v21 = vld [vmem:[%s1668_s28 + $0x10] ss:$8 sps:$4 sm:$0xff]  }
  0x12   : > { %647 = vmatpush1.bf16.msra.mxu0 %v1529_v2  ;;  %1493 = vmatpush1.bf16.msra.mxu1 %v1529_v2  ;;  %v1541_v18 = vld [vmem:[%s1668_s28 + $0x80] ss:$8 sps:$4 sm:$0xff]   ;;  %v1546_v20 = vld [vmem:[%s1668_s28 + $0x94] ss:$8 sps:$4 sm:$0xff]   ;;  %v1549_v22 = vld [vmem:[%s1668_s28 + $0x90] ss:$8 sps:$4 sm:$0xff]  }
  0x13   : > { %648 = vmatprep.subr.bf16.mxu0 %v1610_v1  ;;  %1484 = vmatprep.subr.bf16.mxu1 %v1610_v1  ;;  %v1550_v23 = vld [vmem:[%s1668_s28 + $0x24] ss:$8 sps:$4 sm:$0xff]   ;;  %v1554_v25 = vld [vmem:[%s1668_s28 + $0x20] ss:$8 sps:$4 sm:$0xff]   ;;  %v1556_v27 = vld [vmem:[%s1668_s28 + $0x34] ss:$8 sps:$4 sm:$0xff]  }
  0x14   : > { %v1552_v24 = vld [vmem:[%s1668_s28 + $0xa4] ss:$8 sps:$4 sm:$0xff]   ;;  %v1555_v26 = vld [vmem:[%s1668_s28 + $0xa0] ss:$8 sps:$4 sm:$0xff]   ;;  %v1558_v28 = vld [vmem:[%s1668_s28 + $0xb4] ss:$8 sps:$4 sm:$0xff]  }
  0x15   : > { %v1560_v29 = vld [vmem:[%s1668_s28 + $0x30] ss:$8 sps:$4 sm:$0xff]   ;;  %v1562_v31 = vld [vmem:[%s1668_s28 + $0x44] ss:$8 sps:$4 sm:$0xff]   ;;  %v1566_v33 = vld [vmem:[%s1668_s28 + $0x40] ss:$8 sps:$4 sm:$0xff]  }
  0x16   : > { %649 = vmatpush1.bf16.msra.mxu0 %v1530_v3  ;;  %1494 = vmatpush1.bf16.msra.mxu1 %v1530_v3  ;;  %v1561_v30 = vld [vmem:[%s1668_s28 + $0xb0] ss:$8 sps:$4 sm:$0xff]   ;;  %v1564_v32 = vld [vmem:[%s1668_s28 + $0xc4] ss:$8 sps:$4 sm:$0xff]   ;;  %v1567_v34 = vld [vmem:[%s1668_s28 + $0xc0] ss:$8 sps:$4 sm:$0xff]  }
  0x17   : > { %650 = vmatprep.subr.bf16.mxu0 %v1610_v1  ;;  %1485 = vmatprep.subr.bf16.mxu1 %v1610_v1  ;;  %v1568_v35 = vld [vmem:[%s1668_s28 + $0x54] ss:$8 sps:$4 sm:$0xff]   ;;  %v1572_v37 = vld [vmem:[%s1668_s28 + $0x50] ss:$8 sps:$4 sm:$0xff]   ;;  %v1574_v39 = vld [vmem:[%s1668_s28 + $0x64] ss:$8 sps:$4 sm:$0xff]  }
  0x18   : > { %v1570_v36 = vld [vmem:[%s1668_s28 + $0xd4] ss:$8 sps:$4 sm:$0xff]   ;;  %v1573_v38 = vld [vmem:[%s1668_s28 + $0xd0] ss:$8 sps:$4 sm:$0xff]   ;;  %v1576_v40 = vld [vmem:[%s1668_s28 + $0xe4] ss:$8 sps:$4 sm:$0xff]  }
  0x19   : > { %v1578_v41 = vld [vmem:[%s1668_s28 + $0x60] ss:$8 sps:$4 sm:$0xff]   ;;  %v1580_v43 = vld [vmem:[%s1668_s28 + $0x74] ss:$8 sps:$4 sm:$0xff]   ;;  %v1584_v45 = vld [vmem:[%s1668_s28 + $0x70] ss:$8 sps:$4 sm:$0xff]  }
  0x1a   : > { %651 = vmatpush1.bf16.msra.mxu0 %v1531_v4  ;;  %1495 = vmatpush1.bf16.msra.mxu1 %v1531_v4  ;;  %v1579_v42 = vld [vmem:[%s1668_s28 + $0xe0] ss:$8 sps:$4 sm:$0xff]   ;;  %v1582_v44 = vld [vmem:[%s1668_s28 + $0xf4] ss:$8 sps:$4 sm:$0xff]   ;;  %v1585_v46 = vld [vmem:[%s1668_s28 + $0xf0] ss:$8 sps:$4 sm:$0xff]  }
  0x1b   : > { %652 = vmatprep.subr.bf16.mxu0 %v1610_v1  ;;  %1486 = vmatprep.subr.bf16.mxu1 %v1610_v1  ;;  %v1739_v48 = vld [vmem:[%s1806_s2] ss:$0 sm:$0xff] }
  0x1e   : > { %653 = vmatpush1.bf16.msra.mxu0 %v1532_v5  ;;  %1496 = vmatpush1.bf16.msra.mxu1 %v1532_v5 }
  0x1f   : > { %654 = vmatprep.subr.bf16.mxu0 %v1610_v1  ;;  %1487 = vmatprep.subr.bf16.mxu1 %v1610_v1 }
  0x22   : > { %655 = vmatpush1.bf16.msra.mxu0 %v1533_v8  ;;  %1497 = vmatpush1.bf16.msra.mxu1 %v1533_v8 }
  0x23   : > { %656 = vmatprep.subr.bf16.mxu0 %v1610_v1  ;;  %1488 = vmatprep.subr.bf16.mxu1 %v1610_v1 }
  0x26   : > { %657 = vmatpush1.bf16.msra.mxu0 %v1534_v9  ;;  %1498 = vmatpush1.bf16.msra.mxu1 %v1534_v9 }
  0x27   : > { %658 = vmatprep.subr.bf16.mxu0 %v1610_v1  ;;  %1489 = vmatprep.subr.bf16.mxu1 %v1610_v1 }
  0x2a   : > { %659 = vmatpush1.bf16.msra.mxu0 %v1535_v12  ;;  %1499 = vmatpush1.bf16.msra.mxu1 %v1535_v12 }
  0x2b   : > { %672 = vmatprep.subr.bf16.mxu0 %v1610_v1  ;;  %1490 = vmatprep.subr.bf16.mxu1 %v1610_v1 }
  0x2e   : > { %673 = vmatpush2.bf16.msra.mxu0 %v642_v15  ;;  %1500 = vmatpush2.bf16.msra.mxu1 %v642_v15 }
  0x2f   : > { %674 = vmatprep.subr.bf16.mxu0 %v1610_v1  ;;  %1491 = vmatprep.subr.bf16.mxu1 %v1610_v1 }
  0x32   : > { %675 = vmatpush2.bf16.msra.mxu0 %v1537_v16  ;;  %1501 = vmatpush2.bf16.msra.mxu1 %v1537_v16 }
  0x35   : > { %677 = vmatmul.mubr.bf16.vlgmr.msra.gmra.mxu0 %v1538_v17  ;;  %741 = vmatmul.mubr.bf16.vlgmr.msra.gmra.mxu1 %v1541_v18 }
  0x36   : > { %1304 = vmatprep.mubr.msk.bf16.mxu0 %vm588_vm0, %v1544_v19  ;;  %1312 = vmatprep.mubr.msk.bf16.mxu1 %vm588_vm0, %v1546_v20 }
  0x3d   : > { %685 = vmatmul.mubr.bf16.gmra.mxu0 %v1548_v21  ;;  %749 = vmatmul.mubr.bf16.gmra.mxu1 %v1549_v22 }
  0x3e   : > { %1305 = vmatprep.mubr.msk.bf16.mxu0 %vm588_vm0, %v1550_v23  ;;  %1313 = vmatprep.mubr.msk.bf16.mxu1 %vm588_vm0, %v1552_v24 }
  0x45   : > { %693 = vmatmul.mubr.bf16.gmra.mxu0 %v1554_v25  ;;  %757 = vmatmul.mubr.bf16.gmra.mxu1 %v1555_v26 }
  0x46   : > { %1306 = vmatprep.mubr.msk.bf16.mxu0 %vm588_vm0, %v1556_v27  ;;  %1314 = vmatprep.mubr.msk.bf16.mxu1 %vm588_vm0, %v1558_v28 }
  0x4d   : > { %701 = vmatmul.mubr.bf16.gmra.mxu0 %v1560_v29  ;;  %765 = vmatmul.mubr.bf16.gmra.mxu1 %v1561_v30 }
  0x4e   : > { %1307 = vmatprep.mubr.msk.bf16.mxu0 %vm588_vm0, %v1562_v31  ;;  %1315 = vmatprep.mubr.msk.bf16.mxu1 %vm588_vm0, %v1564_v32 }
  0x55   : > { %709 = vmatmul.mubr.bf16.gmra.mxu0 %v1566_v33  ;;  %773 = vmatmul.mubr.bf16.gmra.mxu1 %v1567_v34 }
  0x56   : > { %1308 = vmatprep.mubr.msk.bf16.mxu0 %vm588_vm0, %v1568_v35  ;;  %1316 = vmatprep.mubr.msk.bf16.mxu1 %vm588_vm0, %v1570_v36 }
  0x5d   : > { %717 = vmatmul.mubr.bf16.gmra.mxu0 %v1572_v37  ;;  %781 = vmatmul.mubr.bf16.gmra.mxu1 %v1573_v38 }
  0x5e   : > { %1309 = vmatprep.mubr.msk.bf16.mxu0 %vm588_vm0, %v1574_v39  ;;  %1317 = vmatprep.mubr.msk.bf16.mxu1 %vm588_vm0, %v1576_v40 }
  0x65   : > { %725 = vmatmul.mubr.bf16.gmra.mxu0 %v1578_v41  ;;  %789 = vmatmul.mubr.bf16.gmra.mxu1 %v1579_v42 }
  0x66   : > { %1310 = vmatprep.mubr.msk.bf16.mxu0 %vm588_vm0, %v1580_v43  ;;  %1318 = vmatprep.mubr.msk.bf16.mxu1 %vm588_vm0, %v1582_v44 }
  0x6d   : > { %733 = vmatmul.mubr.bf16.gmra.mxu0 %v1584_v45  ;;  %797 = vmatmul.mubr.bf16.gmra.mxu1 %v1585_v46 }
  0xf5   : > { %v678_v47 = vpop.f32.mrf.mxu0  ;;  %v742_v49 = vpop.f32.mrf.mxu1 }
  0xf6   : > { %v911_v52 = vadd.f32 %v1739_v48, %v678_v47  ;;  %v927_v53 = vadd.f32 %v1739_v48, %v742_v49 }
  0xf7   : > { %v680_v50 = vpop.f32.mrf.mxu0  ;;  %v744_v51 = vpop.f32.mrf.mxu1 }
  0xf8   : > { %v943_v60 = vmax.f32 %v911_v52, 0.0  ;;  %v959_v61 = vmax.f32 %v927_v53, 0.0 }
  0xf9   : > { %v681_v54 = vpop.f32.mrf.mxu0  ;;  %v745_v55 = vpop.f32.mrf.mxu1 }
  0xfa   : > { %v912_v56 = vadd.f32 %v1739_v48, %v681_v54  ;;  %v928_v57 = vadd.f32 %v1739_v48, %v745_v55 }
  0xfb   : > { %v683_v58 = vpop.f32.mrf.mxu0  ;;  %v747_v59 = vpop.f32.mrf.mxu1 }
  0xfc   : > { %v944_v62 = vmax.f32 %v912_v56, 0.0  ;;  %v960_v63 = vmax.f32 %v928_v57, 0.0 }
  0xfd   : > { %v686_v0 = vpop.f32.mrf.mxu0  ;;  %v750_v1 = vpop.f32.mrf.mxu1 }
  0xfe   : > { %v1390_v2 = vpack.c.bf16 %v944_v62, %v943_v60  ;;  %v1430_v3 = vpack.c.bf16 %v960_v63, %v959_v61  ;;  %v913_v6 = vadd.f32 %v1739_v48, %v686_v0  ;;  %v929_v7 = vadd.f32 %v1739_v48, %v750_v1 }
  0xff   : > { %v688_v4 = vpop.f32.mrf.mxu0  ;;  %v752_v5 = vpop.f32.mrf.mxu1 }
 0x100   : > { %1391 = vst [vmem:[%s1749_s23] sm:$0xff] %v1390_v2   ;;  %1474 = vst [vmem:[%s1749_s23 + $0x40] sm:$0xff] %v1430_v3   ;;  %v945_v14 = vmax.f32 %v913_v6, 0.0  ;;  %v961_v15 = vmax.f32 %v929_v7, 0.0 }
 0x101   : > { %v689_v8 = vpop.f32.mrf.mxu0  ;;  %v753_v9 = vpop.f32.mrf.mxu1 }
 0x102   : > { %v914_v10 = vadd.f32 %v1739_v48, %v689_v8  ;;  %v930_v11 = vadd.f32 %v1739_v48, %v753_v9 }
 0x103   : > { %v691_v12 = vpop.f32.mrf.mxu0  ;;  %v755_v13 = vpop.f32.mrf.mxu1 }
 0x104   : > { %v946_v16 = vmax.f32 %v914_v10, 0.0  ;;  %v962_v17 = vmax.f32 %v930_v11, 0.0 }
 0x105   : > { %v694_v18 = vpop.f32.mrf.mxu0  ;;  %v758_v19 = vpop.f32.mrf.mxu1 }
 0x106   : > { %v1395_v20 = vpack.c.bf16 %v946_v16, %v945_v14  ;;  %v1435_v21 = vpack.c.bf16 %v962_v17, %v961_v15  ;;  %v915_v24 = vadd.f32 %v1739_v48, %v694_v18  ;;  %v931_v25 = vadd.f32 %v1739_v48, %v758_v19 }
 0x107   : > { %v696_v22 = vpop.f32.mrf.mxu0  ;;  %v760_v23 = vpop.f32.mrf.mxu1 }
 0x108   : > { %1467 = vst [vmem:[%s1749_s23 + $0x8] sm:$0xff] %v1395_v20   ;;  %1475 = vst [vmem:[%s1749_s23 + $0x48] sm:$0xff] %v1435_v21   ;;  %v947_v32 = vmax.f32 %v915_v24, 0.0  ;;  %v963_v33 = vmax.f32 %v931_v25, 0.0 }
 0x109   : > { %v697_v26 = vpop.f32.mrf.mxu0  ;;  %v761_v27 = vpop.f32.mrf.mxu1 }
 0x10a   : > { %v916_v28 = vadd.f32 %v1739_v48, %v697_v26  ;;  %v932_v29 = vadd.f32 %v1739_v48, %v761_v27 }
 0x10b   : > { %v699_v30 = vpop.f32.mrf.mxu0  ;;  %v763_v31 = vpop.f32.mrf.mxu1 }
 0x10c   : > { %v948_v34 = vmax.f32 %v916_v28, 0.0  ;;  %v964_v35 = vmax.f32 %v932_v29, 0.0 }
 0x10d   : > { %v702_v36 = vpop.f32.mrf.mxu0  ;;  %v766_v37 = vpop.f32.mrf.mxu1 }
 0x10e   : > { %v1400_v38 = vpack.c.bf16 %v948_v34, %v947_v32  ;;  %v1440_v39 = vpack.c.bf16 %v964_v35, %v963_v33  ;;  %v917_v42 = vadd.f32 %v1739_v48, %v702_v36  ;;  %v933_v43 = vadd.f32 %v1739_v48, %v766_v37 }
 0x10f   : > { %v704_v40 = vpop.f32.mrf.mxu0  ;;  %v768_v41 = vpop.f32.mrf.mxu1 }
 0x110   : > { %1468 = vst [vmem:[%s1749_s23 + $0x10] sm:$0xff] %v1400_v38   ;;  %1476 = vst [vmem:[%s1749_s23 + $0x50] sm:$0xff] %v1440_v39   ;;  %v949_v51 = vmax.f32 %v917_v42, 0.0  ;;  %v965_v52 = vmax.f32 %v933_v43, 0.0 }
 0x111   : > { %v705_v44 = vpop.f32.mrf.mxu0  ;;  %v769_v45 = vpop.f32.mrf.mxu1 }
 0x112   : > { %v918_v46 = vadd.f32 %v1739_v48, %v705_v44  ;;  %v934_v47 = vadd.f32 %v1739_v48, %v769_v45 }
 0x113   : > { %v707_v49 = vpop.f32.mrf.mxu0  ;;  %v771_v50 = vpop.f32.mrf.mxu1 }
 0x114   : > { %v950_v53 = vmax.f32 %v918_v46, 0.0  ;;  %v966_v54 = vmax.f32 %v934_v47, 0.0 }
 0x115   : > { %v710_v55 = vpop.f32.mrf.mxu0  ;;  %v774_v56 = vpop.f32.mrf.mxu1 }
 0x116   : > { %v1405_v57 = vpack.c.bf16 %v950_v53, %v949_v51  ;;  %v1445_v58 = vpack.c.bf16 %v966_v54, %v965_v52  ;;  %v919_v61 = vadd.f32 %v1739_v48, %v710_v55  ;;  %v935_v62 = vadd.f32 %v1739_v48, %v774_v56 }
 0x117   : > { %v712_v59 = vpop.f32.mrf.mxu0  ;;  %v776_v60 = vpop.f32.mrf.mxu1 }
 0x118   : > { %1469 = vst [vmem:[%s1749_s23 + $0x18] sm:$0xff] %v1405_v57   ;;  %1477 = vst [vmem:[%s1749_s23 + $0x58] sm:$0xff] %v1445_v58   ;;  %v951_v5 = vmax.f32 %v919_v61, 0.0  ;;  %v967_v6 = vmax.f32 %v935_v62, 0.0 }
 0x119   : > { %v713_v63 = vpop.f32.mrf.mxu0  ;;  %v777_v0 = vpop.f32.mrf.mxu1 }
 0x11a   : > { %v920_v1 = vadd.f32 %v1739_v48, %v713_v63  ;;  %v936_v2 = vadd.f32 %v1739_v48, %v777_v0 }
 0x11b   : > { %v715_v3 = vpop.f32.mrf.mxu0  ;;  %v779_v4 = vpop.f32.mrf.mxu1 }
 0x11c   : > { %v952_v7 = vmax.f32 %v920_v1, 0.0  ;;  %v968_v8 = vmax.f32 %v936_v2, 0.0 }
 0x11d   : > { %v718_v9 = vpop.f32.mrf.mxu0  ;;  %v782_v10 = vpop.f32.mrf.mxu1 }
 0x11e   : > { %v1410_v11 = vpack.c.bf16 %v952_v7, %v951_v5  ;;  %v1450_v12 = vpack.c.bf16 %v968_v8, %v967_v6  ;;  %v921_v15 = vadd.f32 %v1739_v48, %v718_v9  ;;  %v937_v16 = vadd.f32 %v1739_v48, %v782_v10 }
 0x11f   : > { %v720_v13 = vpop.f32.mrf.mxu0  ;;  %v784_v14 = vpop.f32.mrf.mxu1 }
 0x120   : > { %1470 = vst [vmem:[%s1749_s23 + $0x20] sm:$0xff] %v1410_v11   ;;  %1478 = vst [vmem:[%s1749_s23 + $0x60] sm:$0xff] %v1450_v12   ;;  %v953_v23 = vmax.f32 %v921_v15, 0.0  ;;  %v969_v24 = vmax.f32 %v937_v16, 0.0 }
 0x121   : > { %v721_v17 = vpop.f32.mrf.mxu0  ;;  %v785_v18 = vpop.f32.mrf.mxu1 }
 0x122   : > { %v922_v19 = vadd.f32 %v1739_v48, %v721_v17  ;;  %v938_v20 = vadd.f32 %v1739_v48, %v785_v18 }
 0x123   : > { %v723_v21 = vpop.f32.mrf.mxu0  ;;  %v787_v22 = vpop.f32.mrf.mxu1 }
 0x124   : > { %v954_v25 = vmax.f32 %v922_v19, 0.0  ;;  %v970_v26 = vmax.f32 %v938_v20, 0.0 }
 0x125   : > { %v726_v27 = vpop.f32.mrf.mxu0  ;;  %v790_v28 = vpop.f32.mrf.mxu1 }
 0x126   : > { %v1415_v29 = vpack.c.bf16 %v954_v25, %v953_v23  ;;  %v1455_v30 = vpack.c.bf16 %v970_v26, %v969_v24  ;;  %v923_v33 = vadd.f32 %v1739_v48, %v726_v27  ;;  %v939_v34 = vadd.f32 %v1739_v48, %v790_v28 }
 0x127   : > { %v728_v31 = vpop.f32.mrf.mxu0  ;;  %v792_v32 = vpop.f32.mrf.mxu1 }
 0x128   : > { %1471 = vst [vmem:[%s1749_s23 + $0x28] sm:$0xff] %v1415_v29   ;;  %1479 = vst [vmem:[%s1749_s23 + $0x68] sm:$0xff] %v1455_v30   ;;  %v955_v41 = vmax.f32 %v923_v33, 0.0  ;;  %v971_v42 = vmax.f32 %v939_v34, 0.0 }
 0x129   : > { %v729_v35 = vpop.f32.mrf.mxu0  ;;  %v793_v36 = vpop.f32.mrf.mxu1 }
 0x12a   : > { %v924_v37 = vadd.f32 %v1739_v48, %v729_v35  ;;  %v940_v38 = vadd.f32 %v1739_v48, %v793_v36 }
 0x12b   : > { %v731_v39 = vpop.f32.mrf.mxu0  ;;  %v795_v40 = vpop.f32.mrf.mxu1 }
 0x12c   : > { %v956_v43 = vmax.f32 %v924_v37, 0.0  ;;  %v972_v44 = vmax.f32 %v940_v38, 0.0 }
 0x12d   : > { %v734_v45 = vpop.f32.mrf.mxu0  ;;  %v798_v46 = vpop.f32.mrf.mxu1 }
 0x12e   : > { %v1420_v47 = vpack.c.bf16 %v956_v43, %v955_v41  ;;  %v1460_v49 = vpack.c.bf16 %v972_v44, %v971_v42  ;;  %v925_v52 = vadd.f32 %v1739_v48, %v734_v45  ;;  %v941_v53 = vadd.f32 %v1739_v48, %v798_v46 }
 0x12f   : > { %v736_v50 = vpop.f32.mrf.mxu0  ;;  %v800_v51 = vpop.f32.mrf.mxu1 }
 0x130   : > { %1472 = vst [vmem:[%s1749_s23 + $0x30] sm:$0xff] %v1420_v47   ;;  %1480 = vst [vmem:[%s1749_s23 + $0x70] sm:$0xff] %v1460_v49   ;;  %v957_v60 = vmax.f32 %v925_v52, 0.0  ;;  %v973_v61 = vmax.f32 %v941_v53, 0.0 }
 0x131   : > { %v737_v54 = vpop.f32.mrf.mxu0  ;;  %v801_v55 = vpop.f32.mrf.mxu1 }
 0x132   : > { %v926_v56 = vadd.f32 %v1739_v48, %v737_v54  ;;  %v942_v57 = vadd.f32 %v1739_v48, %v801_v55 }
 0x133   : > { %v739_v58 = vpop.f32.mrf.mxu0  ;;  %v803_v59 = vpop.f32.mrf.mxu1 }
 0x134   : > { %v958_v62 = vmax.f32 %v926_v56, 0.0  ;;  %v974_v63 = vmax.f32 %v942_v57, 0.0 }
 0x136   : > { %v1425_v0 = vpack.c.bf16 %v958_v62, %v957_v60  ;;  %v1465_v1 = vpack.c.bf16 %v974_v63, %v973_v61 }
 0x138   : > { %1473 = vst [vmem:[%s1749_s23 + $0x38] sm:$0xff] %v1425_v0   ;;  %1481 = vst [vmem:[%s1749_s23 + $0x78] sm:$0xff] %v1465_v1  }
 0x139 PF: > { %s13_s14 = sadd.s32 1, %s1608_s14   ;;  %s1808_s12 = smov %s1604_s13 }
 0x13a   : > { %p10_p5 = scmp.ge.s32.totalorder %s13_s14, 4   ;;  %s1809_s13 = smov %s1811_s15 }
 0x13c   :  { %12 = sbr.rel (!%p10_p5) target bundleno = 2 (0x2), region = 76 }

// kernel: backbone_with_fpn_forward.14
= control target key start
LH: loop header
LB: loop body
LE: loop exit
PB: predicated region body
PF: predicated region fallthrough
CT: control target
= control target key end

     0   :  { %s1660_s12 = smov 0   ;;  %s1662_s13 = smov 0   ;;  %s1874_s0 = inlined_call_operand.vmem [shape: bf16[128,1152], index: 0, kind: input, shape index: {}]   ;;  %s1875_s1 = inlined_call_operand.vmem [shape: bf16[1152,128], index: 1, kind: input, shape index: {}]   ;;  %s1876_s2 = inlined_call_operand.vmem [shape: f32[1,128], index: 2, kind: input, shape index: {}]   ;;  %s1877_s3 = inlined_call_operand.vmem [shape: bf16[128,128], index: 3, kind: output, shape index: {}]  }
   0x1   :  { %s1664_s14 = smov 0   ;;  %s1666_s15 = smov 0  }
   0x2   :  { %s1668_s16 = smov 0  }
   0x3 LB: > { %s25_s17 = sadd.s32 1, %s1633_s15  ;;  %p48_p1 = scmp.ne.s32.totalorder %s1625_s13, %s1621_s12  ;;  %s1637_s16 = sphi %s1668_s16, %s13_s16   ;;  %s1633_s15 = sphi %s1666_s15, %s1881_s15   ;;  %s1629_s14 = sphi %s1664_s14, %s1880_s14   ;;  %s1625_s13 = sphi %s1662_s13, %s1879_s13   ;;  %s1621_s12 = sphi %s1660_s12, %s1878_s12  }
   0x4   : > { %p26_p0 = scmp.ge.s32.totalorder %s25_s17, 3  ;;  %p49_p2 = scmp.eq.s32.totalorder %s1637_s16, 0 }
   0x5   : > { %s41_s19 = sadd.s32 1, %s1625_s13  ;;  %p1217_p5 = scmp.ge.s32.totalorder %s1637_s16, 3 }
   0x6   : > { %s1883_s17 = smov (%p26_p0, %s25_s17), 0  ;;  %p50_p3 = por %p49_p2, %p48_p1 }
   0x7   : > { %s37_s18 = ssub.s32 %s1633_s15, %s1883_s17  ;;  %162 = sbr.rel (%p1217_p5) target bundleno = 35 (0x23), region = 20 }
   0x8   : > { %p39_p4 = scmp.eq.s32.totalorder %s37_s18, 0 }
   0xa   : > { %s1695_s20 = scalar_select %p39_p4, %s1625_s13, %s41_s19  }
   0xc   : > { %165 = sbr.rel (!%p50_p3) target bundleno = 35 (0x23), region = 24  ;;  %s167_s21 = sand.u32 (%p50_p3), 1, %s1625_s13  }
   0xd   : > { %s1324_s22 = smul.u32 (%p50_p3), 12, %s1633_s15 }
   0xe   : > { %s1500_s23 = smul.u32 (%p50_p3), 192, %s167_s21 }
   0xf   : > { %s1703_s26 = scalar_lea.vmem (%p50_p3), %s1874_s0, %s1324_s22 }
  0x10   : > { %v190_v0 = vld [vmem:[%s1703_s26] sm:$0xff] (%p50_p3)  ;;  %v194_v2 = vld [vmem:[%s1703_s26 + $0x48] sm:$0xff] (%p50_p3)  ;;  %s1708_s27 = scalar_lea.vmem (%p50_p3), [#allocation3], %s1500_s23  ;;  %v198_v4 = vld [vmem:[%s1703_s26 + $0x90] sm:$0xff] (%p50_p3) }
  0x11   : > { %v192_v1 = vld [vmem:[%s1703_s26 + $0x24] sm:$0xff]  ;;  %191 = vst [vmem:[%s1708_s27] sm:$0xff] %v190_v0  ;;  %195 = vst [vmem:[%s1708_s27 + $0x18] sm:$0xff] %v194_v2  ;;  %v196_v3 = vld [vmem:[%s1703_s26 + $0x6c] sm:$0xff] }
  0x12   : > { %193 = vst [vmem:[%s1708_s27 + $0xc] sm:$0xff] %v192_v1  ;;  %v200_v5 = vld [vmem:[%s1703_s26 + $0xb4] sm:$0xff]  ;;  %197 = vst [vmem:[%s1708_s27 + $0x24] sm:$0xff] %v196_v3  ;;  %v204_v7 = vld [vmem:[%s1703_s26 + $0xfc] sm:$0xff] }
  0x13   : > { %199 = vst [vmem:[%s1708_s27 + $0x30] sm:$0xff] %v198_v4  ;;  %201 = vst [vmem:[%s1708_s27 + $0x3c] sm:$0xff] %v200_v5  ;;  %v202_v6 = vld [vmem:[%s1703_s26 + $0xd8] sm:$0xff]  ;;  %v206_v8 = vld [vmem:[%s1703_s26 + $0x120] sm:$0xff] }
  0x14   : > { %203 = vst [vmem:[%s1708_s27 + $0x48] sm:$0xff] %v202_v6  ;;  %205 = vst [vmem:[%s1708_s27 + $0x54] sm:$0xff] %v204_v7  ;;  %v208_v9 = vld [vmem:[%s1703_s26 + $0x144] sm:$0xff]  ;;  %v212_v11 = vld [vmem:[%s1703_s26 + $0x18c] sm:$0xff] }
  0x15   : > { %207 = vst [vmem:[%s1708_s27 + $0x60] sm:$0xff] %v206_v8  ;;  %v210_v10 = vld [vmem:[%s1703_s26 + $0x168] sm:$0xff]  ;;  %209 = vst [vmem:[%s1708_s27 + $0x6c] sm:$0xff] %v208_v9  ;;  %v214_v12 = vld [vmem:[%s1703_s26 + $0x1b0] sm:$0xff] }
  0x16   : > { %211 = vst [vmem:[%s1708_s27 + $0x78] sm:$0xff] %v210_v10  ;;  %213 = vst [vmem:[%s1708_s27 + $0x84] sm:$0xff] %v212_v11  ;;  %v216_v13 = vld [vmem:[%s1703_s26 + $0x1d4] sm:$0xff]  ;;  %v220_v15 = vld [vmem:[%s1703_s26 + $0x21c] sm:$0xff] }
  0x17   : > { %v218_v14 = vld [vmem:[%s1703_s26 + $0x1f8] sm:$0xff]  ;;  %215 = vst [vmem:[%s1708_s27 + $0x90] sm:$0xff] %v214_v12  ;;  %217 = vst [vmem:[%s1708_s27 + $0x9c] sm:$0xff] %v216_v13  ;;  %v1219_v16 = vld [vmem:[%s1703_s26 + $0x8] sm:$0xf] }
  0x18   : > { %219 = vst [vmem:[%s1708_s27 + $0xa8] sm:$0xff] %v218_v14  ;;  %v1221_v17 = vld [vmem:[%s1703_s26 + $0x2c] sm:$0xf]  ;;  %221 = vst [vmem:[%s1708_s27 + $0xb4] sm:$0xff] %v220_v15  ;;  %v1223_v18 = vld [vmem:[%s1703_s26 + $0x50] sm:$0xf] }
  0x19   : > { %1220 = vst [vmem:[%s1708_s27 + $0x8] sm:$0xf] %v1219_v16  ;;  %1222 = vst [vmem:[%s1708_s27 + $0x14] sm:$0xf] %v1221_v17  ;;  %v1225_v19 = vld [vmem:[%s1703_s26 + $0x74] sm:$0xf] }
  0x1a   : > { %v1227_v20 = vld [vmem:[%s1703_s26 + $0x98] sm:$0xf]  ;;  %1224 = vst [vmem:[%s1708_s27 + $0x20] sm:$0xf] %v1223_v18  ;;  %1226 = vst [vmem:[%s1708_s27 + $0x2c] sm:$0xf] %v1225_v19 }
  0x1b   : > { %1228 = vst [vmem:[%s1708_s27 + $0x38] sm:$0xf] %v1227_v20  ;;  %v1229_v21 = vld [vmem:[%s1703_s26 + $0xbc] sm:$0xf]  ;;  %v1231_v22 = vld [vmem:[%s1703_s26 + $0xe0] sm:$0xf] }
  0x1c   : > { %v1233_v23 = vld [vmem:[%s1703_s26 + $0x104] sm:$0xf]  ;;  %1230 = vst [vmem:[%s1708_s27 + $0x44] sm:$0xf] %v1229_v21  ;;  %1232 = vst [vmem:[%s1708_s27 + $0x50] sm:$0xf] %v1231_v22 }
  0x1d   : > { %1234 = vst [vmem:[%s1708_s27 + $0x5c] sm:$0xf] %v1233_v23  ;;  %v1235_v24 = vld [vmem:[%s1703_s26 + $0x128] sm:$0xf]  ;;  %v1237_v25 = vld [vmem:[%s1703_s26 + $0x14c] sm:$0xf] }
  0x1e   : > { %v1239_v26 = vld [vmem:[%s1703_s26 + $0x170] sm:$0xf]  ;;  %1236 = vst [vmem:[%s1708_s27 + $0x68] sm:$0xf] %v1235_v24  ;;  %1238 = vst [vmem:[%s1708_s27 + $0x74] sm:$0xf] %v1237_v25 }
  0x1f   : > { %1240 = vst [vmem:[%s1708_s27 + $0x80] sm:$0xf] %v1239_v26  ;;  %v1241_v27 = vld [vmem:[%s1703_s26 + $0x194] sm:$0xf]  ;;  %v1243_v28 = vld [vmem:[%s1703_s26 + $0x1b8] sm:$0xf] }
  0x20   : > { %v1245_v29 = vld [vmem:[%s1703_s26 + $0x1dc] sm:$0xf]  ;;  %1242 = vst [vmem:[%s1708_s27 + $0x8c] sm:$0xf] %v1241_v27  ;;  %1244 = vst [vmem:[%s1708_s27 + $0x98] sm:$0xf] %v1243_v28 }
  0x21   : > { %1246 = vst [vmem:[%s1708_s27 + $0xa4] sm:$0xf] %v1245_v29  ;;  %v1247_v30 = vld [vmem:[%s1703_s26 + $0x200] sm:$0xf]  ;;  %v1249_v31 = vld [vmem:[%s1703_s26 + $0x224] sm:$0xf] }
  0x22   : > { %1248 = vst [vmem:[%s1708_s27 + $0xb0] sm:$0xf] %v1247_v30  ;;  %1250 = vst [vmem:[%s1708_s27 + $0xbc] sm:$0xf] %v1249_v31 }
  0x23 PF: > { %p1251_p6 = scmp.ge.s32.totalorder %s1637_s16, 1  ;;  %p278_p7 = scmp.lt.s32.totalorder %s1637_s16, 4 }
  0x25   : > { %p279_p8 = pnand %p1251_p6, %p278_p7 }
  0x26   : > { %s285_s28 = sand.u32 (!%p279_p8), 1, %s1621_s12   ;;  %s324_s29 = smul.u32 (!%p279_p8), 48, %s1629_s14 }
  0x27   : > { %282 = sbr.rel (%p279_p8) target bundleno = 369 (0x171), region = 54  ;;  %p1253_p10 = scmp.ne.s32.totalorder (!%p279_p8), %s1629_s14, 0 }
  0x28   : > { %s1501_s30 = smul.u32 (!%p279_p8), 192, %s285_s28  ;;  %p325_p9 = scmp.lt.s32.totalorder (!%p279_p8), %s324_s29, 143 }
  0x2a   : > { %s1780_s8 = scalar_lea.vmem (!%p279_p8), [#allocation3], %s1501_s30 }
  0x2c   : > { %s1885_s29 = smov (!%p325_p9, %s324_s29), 143  ;;  %349 = sbr.rel (%p1253_p10) target bundleno = 58 (0x3a), region = 62 }
  0x2d   : > { %s1252_s4 = sshll.u32 %s1885_s29, 2 }
  0x2e   : > { %s1778_s7 = scalar_lea.vmem %s1875_s1, %s1252_s4 }
  0x31   : > { %v1639_v32 = vmov 0.0  }
  0x32   : > { %350 = vst [vmem:[#allocation2 + $0x30] sm:$0xff] %v1639_v32  ;;  %351 = vst [vmem:[#allocation2] sm:$0xff] %v1639_v32 }
  0x33   : > { %352 = vst [vmem:[#allocation2 + $0x58] sm:$0xff] %v1639_v32  ;;  %353 = vst [vmem:[#allocation2 + $0x18] sm:$0xff] %v1639_v32 }
  0x34   : > { %354 = vst [vmem:[#allocation2 + $0x50] sm:$0xff] %v1639_v32  ;;  %355 = vst [vmem:[#allocation2 + $0x68] sm:$0xff] %v1639_v32 }
  0x35   : > { %356 = vst [vmem:[#allocation2 + $0x8] sm:$0xff] %v1639_v32  ;;  %357 = vst [vmem:[#allocation2 + $0x48] sm:$0xff] %v1639_v32 }
  0x36   : > { %358 = vst [vmem:[#allocation2 + $0x40] sm:$0xff] %v1639_v32  ;;  %359 = vst [vmem:[#allocation2 + $0x20] sm:$0xff] %v1639_v32 }
  0x37   : > { %360 = vst [vmem:[#allocation2 + $0x10] sm:$0xff] %v1639_v32  ;;  %361 = vst [vmem:[#allocation2 + $0x38] sm:$0xff] %v1639_v32 }
  0x38   : > { %362 = vst [vmem:[#allocation2 + $0x60] sm:$0xff] %v1639_v32  ;;  %363 = vst [vmem:[#allocation2 + $0x70] sm:$0xff] %v1639_v32 }
  0x39   : > { %364 = vst [vmem:[#allocation2 + $0x78] sm:$0xff] %v1639_v32  ;;  %365 = vst [vmem:[#allocation2 + $0x28] sm:$0xff] %v1639_v32 }
  0x3a PF: > { %v1543_v33 = vld [vmem:[%s1778_s7 + $0x78] sm:$0xff]   ;;  %v1546_v36 = vld [vmem:[%s1778_s7 + $0x70] sm:$0xff]   ;;  %v1549_v39 = vld [vmem:[%s1778_s7 + $0x68] sm:$0xff]   ;;  %p1302_p11 = scmp.ne.s32.totalorder %s1629_s14, 2 }
  0x3b   : > { %v1544_v34 = vld [vmem:[%s1778_s7 + $0x38] sm:$0xff]   ;;  %1388 = vmatprep.subr.bf16.mxu0 %v1543_v33  ;;  %v1547_v37 = vld [vmem:[%s1778_s7 + $0x30] sm:$0xff]   ;;  %v1550_v40 = vld [vmem:[%s1778_s7 + $0x28] sm:$0xff]  }
  0x3c   : > { %v1545_v35 = vld [vmem:[%s1778_s7 + $0xb8] sm:$0xff]   ;;  %1389 = vmatpush3.bf16.msra.mxu0 %v1544_v34  ;;  %v1548_v38 = vld [vmem:[%s1778_s7 + $0xb0] sm:$0xff]   ;;  %v1551_v41 = vld [vmem:[%s1778_s7 + $0xa8] sm:$0xff]  }
  0x3d   : > { %1468 = vmatprep.subr.bf16.mxu1 %v1545_v35  ;;  %1390 = vmatprep.subr.bf16.mxu0 %v1546_v36  ;;  %v1552_v42 = vld [vmem:[%s1778_s7 + $0x60] sm:$0xff]   ;;  %v1555_v45 = vld [vmem:[%s1778_s7 + $0x58] sm:$0xff]   ;;  %v1558_v48 = vld [vmem:[%s1778_s7 + $0x50] sm:$0xff]  }
  0x3e   : > { %1469 = vmatpush3.bf16.msra.mxu1 %v1545_v35  ;;  %v1553_v43 = vld [vmem:[%s1778_s7 + $0x20] sm:$0xff]   ;;  %v1557_v46 = vld [vmem:[%s1778_s7 + $0x98] sm:$0xff]   ;;  %v1560_v49 = vld [vmem:[%s1778_s7 + $0x90] sm:$0xff]  }
  0x3f   : > { %1470 = vmatprep.subr.bf16.mxu1 %v1548_v38  ;;  %v1554_v44 = vld [vmem:[%s1778_s7 + $0xa0] sm:$0xff]   ;;  %v1556_v47 = vld [vmem:[%s1778_s7 + $0x18] sm:$0xff]   ;;  %v1559_v50 = vld [vmem:[%s1778_s7 + $0x10] sm:$0xff]  }
  0x40   : > { %1391 = vmatpush3.bf16.msra.mxu0 %v1547_v37  ;;  %v1561_v51 = vld [vmem:[%s1778_s7 + $0x48] sm:$0xff]   ;;  %v1564_v54 = vld [vmem:[%s1778_s7 + $0x40] sm:$0xff]   ;;  %v1579_v1 = vld [vmem:[%s1780_s8 + $0x50] ss:$12 sps:$4 sm:$0xff]  }
  0x41   : > { %1392 = vmatprep.subr.bf16.mxu0 %v1549_v39  ;;  %v1562_v52 = vld [vmem:[%s1778_s7 + $0x8] sm:$0xff]   ;;  %v1566_v55 = vld [vmem:[%s1778_s7 + $0x80] sm:$0xff]   ;;  %v1577_v3 = vld [vmem:[%s1780_s8 + $0x30] ss:$12 sps:$4 sm:$0xff]  }
  0x42   : > { %1471 = vmatpush3.bf16.msra.mxu1 %v1548_v38  ;;  %v1563_v53 = vld [vmem:[%s1778_s7 + $0x88] sm:$0xff]   ;;  %v1569_v56 = vld [vmem:[%s1780_s8 + $0x4] ss:$12 sps:$4 sm:$0xff]   ;;  %v1575_v0 = vld [vmem:[%s1780_s8 + $0x34] ss:$12 sps:$4 sm:$0xff]  }
  0x43   : > { %1472 = vmatprep.subr.bf16.mxu1 %v1551_v41  ;;  %v1570_v57 = vld [vmem:[%s1780_s8 + $0x8] ss:$12 sps:$4 sm:$0xff]   ;;  %v1565_v58 = vld [vmem:[%s1778_s7] sm:$0xff]   ;;  %766 = vmatprep.mubr.bf16.mxu0 %v1569_v56  ;;  %v1580_v4 = vld [vmem:[%s1780_s8 + $0x4c] ss:$12 sps:$4 sm:$0xff]  }
  0x44   : > { %1393 = vmatpush3.bf16.msra.mxu0 %v1550_v40  ;;  %1484 = vmatprep.mubr.bf16.mxu1 %v1570_v57  ;;  %v1567_v59 = vld [vmem:[%s1780_s8] ss:$12 sps:$4 sm:$0xff]   ;;  %v1572_v60 = vld [vmem:[%s1780_s8 + $0x1c] ss:$12 sps:$4 sm:$0xff]   ;;  %v1578_v62 = vld [vmem:[%s1780_s8 + $0x38] ss:$12 sps:$4 sm:$0xff]  }
  0x45   : > { %1394 = vmatprep.subr.bf16.mxu0 %v1552_v42  ;;  %v1571_v61 = vld [vmem:[%s1780_s8 + $0x20] ss:$12 sps:$4 sm:$0xff]   ;;  %v1574_v63 = vld [vmem:[%s1780_s8 + $0x18] ss:$12 sps:$4 sm:$0xff]   ;;  %v1586_v2 = vld [vmem:[%s1780_s8 + $0x68] ss:$12 sps:$4 sm:$0xff]  }
  0x46   : > { %1473 = vmatpush3.bf16.msra.mxu1 %v1551_v41  ;;  %v1587_v5 = vld [vmem:[%s1780_s8 + $0x80] ss:$12 sps:$4 sm:$0xff]   ;;  %v1594_v6 = vld [vmem:[%s1780_s8 + $0x98] ss:$12 sps:$4 sm:$0xff]   ;;  %v1582_v7 = vld [vmem:[%s1780_s8 + $0x48] ss:$12 sps:$4 sm:$0xff]  }
  0x47   : > { %1474 = vmatprep.subr.bf16.mxu1 %v1554_v44  ;;  %v1583_v8 = vld [vmem:[%s1780_s8 + $0x64] ss:$12 sps:$4 sm:$0xff]   ;;  %v1585_v10 = vld [vmem:[%s1780_s8 + $0x60] ss:$12 sps:$4 sm:$0xff]   ;;  %v1588_v11 = vld [vmem:[%s1780_s8 + $0x7c] ss:$12 sps:$4 sm:$0xff]  }
  0x48   : > { %1395 = vmatpush3.bf16.msra.mxu0 %v1553_v43  ;;  %v1595_v9 = vld [vmem:[%s1780_s8 + $0xb0] ss:$12 sps:$4 sm:$0xff]   ;;  %v1590_v12 = vld [vmem:[%s1780_s8 + $0x78] ss:$12 sps:$4 sm:$0xff]   ;;  %v1591_v13 = vld [vmem:[%s1780_s8 + $0x94] ss:$12 sps:$4 sm:$0xff]  }
  0x49   : > { %1396 = vmatprep.subr.bf16.mxu0 %v1555_v45  ;;  %v1593_v14 = vld [vmem:[%s1780_s8 + $0x90] ss:$12 sps:$4 sm:$0xff]   ;;  %v1596_v15 = vld [vmem:[%s1780_s8 + $0xac] ss:$12 sps:$4 sm:$0xff]   ;;  %v1598_v16 = vld [vmem:[%s1780_s8 + $0xa8] ss:$12 sps:$4 sm:$0xff]  }
  0x4a   : > { %1475 = vmatpush3.bf16.msra.mxu1 %v1554_v44  ;;  %v366_v22 = vld [vmem:[#allocation2 + $0x30] sm:$0xff]  ;;  %v367_v30 = vld [vmem:[#allocation2] sm:$0xff]  ;;  %v368_v37 = vld [vmem:[#allocation2 + $0x58] sm:$0xff] }
  0x4b   : > { %1476 = vmatprep.subr.bf16.mxu1 %v1557_v46  ;;  %v369_v44 = vld [vmem:[#allocation2 + $0x18] sm:$0xff] }
  0x4c   : > { %1397 = vmatpush3.bf16.msra.mxu0 %v1556_v47 }
  0x4d   : > { %1398 = vmatprep.subr.bf16.mxu0 %v1558_v48 }
  0x4e   : > { %1477 = vmatpush3.bf16.msra.mxu1 %v1557_v46 }
  0x4f   : > { %1478 = vmatprep.subr.bf16.mxu1 %v1560_v49 }
  0x50   : > { %1399 = vmatpush3.bf16.msra.mxu0 %v1559_v50 }
  0x51   : > { %1400 = vmatprep.subr.bf16.mxu0 %v1561_v51 }
  0x52   : > { %1479 = vmatpush3.bf16.msra.mxu1 %v1560_v49 }
  0x53   : > { %1480 = vmatprep.subr.bf16.mxu1 %v1563_v53 }
  0x54   : > { %1401 = vmatpush3.bf16.msra.mxu0 %v1562_v52  ;;  %v370_v52 = vld [vmem:[#allocation2 + $0x50] sm:$0xff] }
  0x55   : > { %1402 = vmatprep.subr.bf16.mxu0 %v1564_v54 }
  0x56   : > { %1481 = vmatpush3.bf16.msra.mxu1 %v1563_v53 }
  0x57   : > { %1482 = vmatprep.subr.bf16.mxu1 %v1566_v55 }
  0x58   : > { %1403 = vmatpush3.bf16.msra.mxu0 %v1565_v58 }
  0x5a   : > { %1483 = vmatpush3.bf16.msra.mxu1 %v1566_v55 }
  0x5b   : > { %767 = vmatmul.mubr.bf16.vlgmr.msra.gmra.mxu0 %v1567_v59  ;;  %v371_v59 = vld [vmem:[#allocation2 + $0x68] sm:$0xff] }
  0x5c   : > { %774 = vmatprep.mubr.bf16.mxu0 %v1572_v60 }
  0x5d   : > { %1485 = vmatmul.mubr.bf16.vlgmr.msra.gmra.mxu1 %v1571_v61 }
  0x5e   : > { %1488 = vmatprep.mubr.bf16.mxu1 %v1578_v62 }
  0x63   : > { %775 = vmatmul.mubr.bf16.gmra.mxu0 %v1574_v63 }
  0x64   : > { %782 = vmatprep.mubr.bf16.mxu0 %v1575_v0 }
  0x65   : > { %1489 = vmatmul.mubr.bf16.gmra.mxu1 %v1579_v1  ;;  %v372_v1 = vld [vmem:[#allocation2 + $0x8] sm:$0xff] }
  0x66   : > { %1492 = vmatprep.mubr.bf16.mxu1 %v1586_v2 }
  0x6b   : > { %783 = vmatmul.mubr.bf16.gmra.mxu0 %v1577_v3 }
  0x6c   : > { %790 = vmatprep.mubr.bf16.mxu0 %v1580_v4 }
  0x6d   : > { %1493 = vmatmul.mubr.bf16.gmra.mxu1 %v1587_v5 }
  0x6e   : > { %1496 = vmatprep.mubr.bf16.mxu1 %v1594_v6 }
  0x73   : > { %791 = vmatmul.mubr.bf16.gmra.mxu0 %v1582_v7 }
  0x74   : > { %798 = vmatprep.mubr.bf16.mxu0 %v1583_v8  ;;  %v373_v8 = vld [vmem:[#allocation2 + $0x48] sm:$0xff] }
  0x75   : > { %1497 = vmatmul.mubr.bf16.gmra.mxu1 %v1595_v9 }
  0x7b   : > { %799 = vmatmul.mubr.bf16.gmra.mxu0 %v1585_v10 }
  0x7c   : > { %806 = vmatprep.mubr.bf16.mxu0 %v1588_v11 }
  0x83   : > { %807 = vmatmul.mubr.bf16.gmra.mxu0 %v1590_v12 }
  0x84   : > { %814 = vmatprep.mubr.bf16.mxu0 %v1591_v13 }
  0x8b   : > { %815 = vmatmul.mubr.bf16.gmra.mxu0 %v1593_v14 }
  0x8c   : > { %822 = vmatprep.mubr.bf16.mxu0 %v1596_v15 }
  0x93   : > { %823 = vmatmul.mubr.bf16.gmra.mxu0 %v1598_v16  ;;  %v374_v16 = vld [vmem:[#allocation2 + $0x40] sm:$0xff] }
 0x11b   : > { %v1404_v17 = vpop.f32.mrf.mxu0 }
 0x11d   : > { %v1405_v18 = vpop.f32.mrf.mxu0  ;;  %v1486_v19 = vpop.f32.mrf.mxu1 }
 0x11e   : > { %v1406_v20 = vadd.f32 %v1405_v18, %v1404_v17 }
 0x11f   : > { %v1407_v21 = vpop.f32.mrf.mxu0  ;;  %v865_v23 = vpop.f32.mrf.mxu1 }
 0x120   : > { %v866_v24 = vadd.f32 %v1406_v20, %v865_v23  ;;  %v375_v23 = vld [vmem:[#allocation2 + $0x20] sm:$0xff] }
 0x121   : > { %v1408_v25 = vpop.f32.mrf.mxu0  ;;  %v1487_v26 = vpop.f32.mrf.mxu1 }
 0x122   : > { %v928_v27 = vadd.f32 %v866_v24, %v366_v22  ;;  %v1409_v28 = vadd.f32 %v1408_v25, %v1407_v21 }
 0x123   : > { %v1410_v29 = vpop.f32.mrf.mxu0  ;;  %v868_v31 = vpop.f32.mrf.mxu1 }
 0x124   : > { %944 = vst [vmem:[#allocation2 + $0x30] sm:$0xff] %v928_v27  ;;  %v869_v32 = vadd.f32 %v1409_v28, %v868_v31 }
 0x125   : > { %v1411_v33 = vpop.f32.mrf.mxu0  ;;  %v1490_v34 = vpop.f32.mrf.mxu1 }
 0x126   : > { %v929_v35 = vadd.f32 %v869_v32, %v367_v30  ;;  %v1412_v36 = vadd.f32 %v1411_v33, %v1410_v29  ;;  %v376_v29 = vld [vmem:[#allocation2 + $0x10] sm:$0xff] }
 0x127   : > { %v1413_v38 = vpop.f32.mrf.mxu0  ;;  %v881_v41 = vpop.f32.mrf.mxu1 }
 0x128   : > { %945 = vst [vmem:[#allocation2] sm:$0xff] %v929_v35  ;;  %v874_v39 = vadd.f32 %v1486_v19, %v1412_v36  ;;  %v377_v36 = vld [vmem:[#allocation2 + $0x38] sm:$0xff] }
 0x129   : > { %v1414_v40 = vpop.f32.mrf.mxu0  ;;  %v1491_v48 = vpop.f32.mrf.mxu1 }
 0x12a   : > { %v930_v42 = vadd.f32 %v874_v39, %v368_v37  ;;  %v1415_v43 = vadd.f32 %v1414_v40, %v1413_v38 }
 0x12b   : > { %v1416_v45 = vpop.f32.mrf.mxu0  ;;  %v884_v55 = vpop.f32.mrf.mxu1 }
 0x12c   : > { %946 = vst [vmem:[#allocation2 + $0x58] sm:$0xff] %v930_v42  ;;  %v877_v46 = vadd.f32 %v1487_v26, %v1415_v43 }
 0x12d   : > { %v1417_v47 = vpop.f32.mrf.mxu0  ;;  %v1494_v62 = vpop.f32.mrf.mxu1 }
 0x12e   : > { %v931_v49 = vadd.f32 %v877_v46, %v369_v44  ;;  %v1418_v50 = vadd.f32 %v1417_v47, %v1416_v45  ;;  %v378_v44 = vld [vmem:[#allocation2 + $0x60] sm:$0xff] }
 0x12f   : > { %v1419_v51 = vpop.f32.mrf.mxu0  ;;  %v897_v5 = vpop.f32.mrf.mxu1 }
 0x130   : > { %947 = vst [vmem:[#allocation2 + $0x18] sm:$0xff] %v931_v49  ;;  %v882_v53 = vadd.f32 %v1418_v50, %v881_v41 }
 0x131   : > { %v1420_v54 = vpop.f32.mrf.mxu0  ;;  %v1495_v12 = vpop.f32.mrf.mxu1 }
 0x132   : > { %v932_v56 = vadd.f32 %v882_v53, %v370_v52  ;;  %v1421_v57 = vadd.f32 %v1420_v54, %v1419_v51  ;;  %v379_v51 = vld [vmem:[#allocation2 + $0x70] sm:$0xff] }
 0x133   : > { %v1422_v58 = vpop.f32.mrf.mxu0  ;;  %v900_v19 = vpop.f32.mrf.mxu1 }
 0x134   : > { %948 = vst [vmem:[#allocation2 + $0x50] sm:$0xff] %v932_v56  ;;  %v885_v60 = vadd.f32 %v1421_v57, %v884_v55  ;;  %v380_v56 = vld [vmem:[#allocation2 + $0x78] sm:$0xff] }
 0x135   : > { %v1423_v61 = vpop.f32.mrf.mxu0  ;;  %v1498_v26 = vpop.f32.mrf.mxu1 }
 0x136   : > { %v933_v63 = vadd.f32 %v885_v60, %v371_v59  ;;  %v1424_v0 = vadd.f32 %v1423_v61, %v1422_v58 }
 0x137   : > { %v1425_v2 = vpop.f32.mrf.mxu0  ;;  %v913_v33 = vpop.f32.mrf.mxu1 }
 0x138   : > { %949 = vst [vmem:[#allocation2 + $0x68] sm:$0xff] %v933_v63  ;;  %v890_v3 = vadd.f32 %v1490_v34, %v1424_v0 }
 0x139   : > { %v1426_v4 = vpop.f32.mrf.mxu0  ;;  %v1499_v40 = vpop.f32.mrf.mxu1 }
 0x13a   : > { %v934_v6 = vadd.f32 %v890_v3, %v372_v1  ;;  %v1427_v7 = vadd.f32 %v1426_v4, %v1425_v2 }
 0x13b   : > { %v1428_v9 = vpop.f32.mrf.mxu0  ;;  %v916_v47 = vpop.f32.mrf.mxu1 }
 0x13c   : > { %950 = vst [vmem:[#allocation2 + $0x8] sm:$0xff] %v934_v6  ;;  %v893_v10 = vadd.f32 %v1491_v48, %v1427_v7 }
 0x13d   : > { %v1429_v11 = vpop.f32.mrf.mxu0 }
 0x13e   : > { %v935_v13 = vadd.f32 %v893_v10, %v373_v8  ;;  %v1430_v14 = vadd.f32 %v1429_v11, %v1428_v9 }
 0x13f   : > { %v1431_v15 = vpop.f32.mrf.mxu0 }
 0x140   : > { %951 = vst [vmem:[#allocation2 + $0x48] sm:$0xff] %v935_v13  ;;  %v898_v17 = vadd.f32 %v1430_v14, %v897_v5 }
 0x141   : > { %v1432_v18 = vpop.f32.mrf.mxu0 }
 0x142   : > { %v936_v20 = vadd.f32 %v898_v17, %v374_v16  ;;  %v1433_v21 = vadd.f32 %v1432_v18, %v1431_v15 }
 0x143   : > { %v1434_v22 = vpop.f32.mrf.mxu0 }
 0x144   : > { %952 = vst [vmem:[#allocation2 + $0x40] sm:$0xff] %v936_v20  ;;  %v901_v24 = vadd.f32 %v1433_v21, %v900_v19 }
 0x145   : > { %v1435_v25 = vpop.f32.mrf.mxu0 }
 0x146   : > { %v937_v27 = vadd.f32 %v901_v24, %v375_v23  ;;  %v1436_v28 = vadd.f32 %v1435_v25, %v1434_v22 }
 0x147   : > { %v1437_v30 = vpop.f32.mrf.mxu0 }
 0x148   : > { %953 = vst [vmem:[#allocation2 + $0x20] sm:$0xff] %v937_v27  ;;  %v906_v31 = vadd.f32 %v1494_v62, %v1436_v28  ;;  %v381_v62 = vld [vmem:[#allocation2 + $0x28] sm:$0xff] }
 0x149   : > { %v1438_v32 = vpop.f32.mrf.mxu0 }
 0x14a   : > { %v938_v34 = vadd.f32 %v906_v31, %v376_v29  ;;  %v1439_v35 = vadd.f32 %v1438_v32, %v1437_v30 }
 0x14b   : > { %v1440_v37 = vpop.f32.mrf.mxu0 }
 0x14c   : > { %954 = vst [vmem:[#allocation2 + $0x10] sm:$0xff] %v938_v34  ;;  %v909_v38 = vadd.f32 %v1495_v12, %v1439_v35 }
 0x14d   : > { %v1441_v39 = vpop.f32.mrf.mxu0 }
 0x14e   : > { %v939_v41 = vadd.f32 %v909_v38, %v377_v36  ;;  %v1442_v42 = vadd.f32 %v1441_v39, %v1440_v37 }
 0x14f   : > { %v1443_v43 = vpop.f32.mrf.mxu0 }
 0x150   : > { %955 = vst [vmem:[#allocation2 + $0x38] sm:$0xff] %v939_v41  ;;  %v914_v45 = vadd.f32 %v1442_v42, %v913_v33 }
 0x151   : > { %v1444_v46 = vpop.f32.mrf.mxu0 }
 0x152   : > { %v940_v48 = vadd.f32 %v914_v45, %v378_v44  ;;  %v1445_v49 = vadd.f32 %v1444_v46, %v1443_v43 }
 0x153   : > { %v1446_v50 = vpop.f32.mrf.mxu0 }
 0x154   : > { %956 = vst [vmem:[#allocation2 + $0x60] sm:$0xff] %v940_v48  ;;  %v917_v52 = vadd.f32 %v1445_v49, %v916_v47 }
 0x155   : > { %v1447_v53 = vpop.f32.mrf.mxu0 }
 0x156   : > { %v941_v54 = vadd.f32 %v917_v52, %v379_v51  ;;  %v1448_v55 = vadd.f32 %v1447_v53, %v1446_v50 }
 0x157   : > { %v1449_v57 = vpop.f32.mrf.mxu0 }
 0x158   : > { %957 = vst [vmem:[#allocation2 + $0x70] sm:$0xff] %v941_v54  ;;  %v922_v58 = vadd.f32 %v1498_v26, %v1448_v55 }
 0x159   : > { %v1450_v59 = vpop.f32.mrf.mxu0 }
 0x15a   : > { %v942_v60 = vadd.f32 %v922_v58, %v380_v56  ;;  %v1451_v61 = vadd.f32 %v1450_v59, %v1449_v57 }
 0x15c   : > { %958 = vst [vmem:[#allocation2 + $0x78] sm:$0xff] %v942_v60  ;;  %v925_v63 = vadd.f32 %v1499_v40, %v1451_v61  ;;  %963 = sbr.rel (%p1302_p11) target bundleno = 369 (0x171), region = 66 }
 0x15e   : > { %v943_v0 = vadd.f32 %v925_v63, %v381_v62 }
 0x160   : > { %959 = vst [vmem:[#allocation2 + $0x28] sm:$0xff] %v943_v0 }
 0x161   : > { %v964_v1 = vld [vmem:[#allocation2 + $0x30] sm:$0xff]  ;;  %v965_v2 = vld [vmem:[#allocation2] sm:$0xff]  ;;  %v966_v6 = vld [vmem:[#allocation2 + $0x58] sm:$0xff] }
 0x162   : > { %v1303_v3 = vld [vmem:[%s1876_s2] ss:$0 sm:$0xff]  ;;  %v967_v7 = vld [vmem:[#allocation2 + $0x18] sm:$0xff]  ;;  %v968_v8 = vld [vmem:[#allocation2 + $0x50] sm:$0xff] }
 0x163   : > { %v987_v4 = vadd.f32 %v1303_v3, %v964_v1  ;;  %v988_v5 = vadd.f32 %v1303_v3, %v965_v2  ;;  %v989_v9 = vadd.f32 %v1303_v3, %v966_v6  ;;  %v990_v10 = vadd.f32 %v1303_v3, %v967_v7  ;;  %v969_v11 = vld [vmem:[#allocation2 + $0x68] sm:$0xff]  ;;  %v972_v19 = vld [vmem:[#allocation2 + $0x40] sm:$0xff]  ;;  %v974_v21 = vld [vmem:[#allocation2 + $0x10] sm:$0xff] }
 0x164   : > { %v991_v12 = vadd.f32 %v1303_v3, %v968_v8  ;;  %v970_v13 = vld [vmem:[#allocation2 + $0x8] sm:$0xff]  ;;  %v992_v17 = vadd.f32 %v1303_v3, %v969_v11  ;;  %v973_v20 = vld [vmem:[#allocation2 + $0x20] sm:$0xff]  ;;  %v975_v26 = vld [vmem:[#allocation2 + $0x38] sm:$0xff]  ;;  %v995_v31 = vadd.f32 %v1303_v3, %v972_v19  ;;  %v997_v36 = vadd.f32 %v1303_v3, %v974_v21 }
 0x165   : > { %v971_v14 = vld [vmem:[#allocation2 + $0x48] sm:$0xff]  ;;  %v1003_v15 = vmax.f32 %v987_v4, 0.0  ;;  %v1004_v16 = vmax.f32 %v988_v5, 0.0  ;;  %v993_v18 = vadd.f32 %v1303_v3, %v970_v13  ;;  %v1005_v22 = vmax.f32 %v989_v9, 0.0  ;;  %v976_v27 = vld [vmem:[#allocation2 + $0x60] sm:$0xff]  ;;  %v977_v32 = vld [vmem:[#allocation2 + $0x70] sm:$0xff] }
 0x166   : > { %v1006_v23 = vmax.f32 %v990_v10, 0.0  ;;  %v1007_v24 = vmax.f32 %v991_v12, 0.0  ;;  %v994_v25 = vadd.f32 %v1303_v3, %v971_v14  ;;  %v1008_v29 = vmax.f32 %v992_v17, 0.0  ;;  %v978_v37 = vld [vmem:[#allocation2 + $0x78] sm:$0xff] }
 0x167   : > { %v1344_v28 = vpack.c.bf16 %v1004_v16, %v1003_v15  ;;  %v1009_v30 = vmax.f32 %v993_v18, 0.0  ;;  %v996_v35 = vadd.f32 %v1303_v3, %v973_v20  ;;  %v979_v38 = vld [vmem:[#allocation2 + $0x28] sm:$0xff]  ;;  %v1011_v40 = vmax.f32 %v995_v31, 0.0 }
 0x168   : > { %v1349_v33 = vpack.c.bf16 %v1006_v23, %v1005_v22  ;;  %v1010_v34 = vmax.f32 %v994_v25, 0.0  ;;  %v1354_v39 = vpack.c.bf16 %v1008_v29, %v1007_v24  ;;  %v998_v41 = vadd.f32 %v1303_v3, %v975_v26 }
 0x169   : > { %1345 = vst [vmem:[%s1877_s3] sm:$0xff] %v1344_v28   ;;  %v999_v42 = vadd.f32 %v1303_v3, %v976_v27  ;;  %v1012_v44 = vmax.f32 %v996_v35, 0.0  ;;  %v1013_v45 = vmax.f32 %v997_v36, 0.0  ;;  %v1000_v46 = vadd.f32 %v1303_v3, %v977_v32 }
 0x16a   : > { %1381 = vst [vmem:[%s1877_s3 + $0x8] sm:$0xff] %v1349_v33   ;;  %v1359_v43 = vpack.c.bf16 %v1010_v34, %v1009_v30  ;;  %1382 = vst [vmem:[%s1877_s3 + $0x10] sm:$0xff] %v1354_v39   ;;  %v1014_v47 = vmax.f32 %v998_v41, 0.0  ;;  %v1001_v49 = vadd.f32 %v1303_v3, %v978_v37  ;;  %v1002_v50 = vadd.f32 %v1303_v3, %v979_v38 }
 0x16b   : > { %v1015_v48 = vmax.f32 %v999_v42, 0.0  ;;  %v1364_v51 = vpack.c.bf16 %v1012_v44, %v1011_v40  ;;  %v1016_v52 = vmax.f32 %v1000_v46, 0.0 }
 0x16c   : > { %1383 = vst [vmem:[%s1877_s3 + $0x18] sm:$0xff] %v1359_v43   ;;  %v1369_v53 = vpack.c.bf16 %v1014_v47, %v1013_v45  ;;  %v1017_v54 = vmax.f32 %v1001_v49, 0.0  ;;  %v1018_v55 = vmax.f32 %v1002_v50, 0.0 }
 0x16d   : > { %1384 = vst [vmem:[%s1877_s3 + $0x20] sm:$0xff] %v1364_v51   ;;  %v1374_v56 = vpack.c.bf16 %v1016_v52, %v1015_v48 }
 0x16e   : > { %1385 = vst [vmem:[%s1877_s3 + $0x28] sm:$0xff] %v1369_v53   ;;  %v1379_v57 = vpack.c.bf16 %v1018_v55, %v1017_v54 }
 0x16f   : > { %1386 = vst [vmem:[%s1877_s3 + $0x30] sm:$0xff] %v1374_v56  }
 0x170   : > { %1387 = vst [vmem:[%s1877_s3 + $0x38] sm:$0xff] %v1379_v57  }
 0x171 PF: > { %s13_s16 = sadd.s32 1, %s1637_s16   ;;  %s1878_s12 = smov %s1625_s13 }
 0x172   : > { %p10_p12 = scmp.ge.s32.totalorder %s13_s16, 5   ;;  %s1879_s13 = smov %s1695_s20 }
 0x173   : > { %s1880_s14 = smov %s1633_s15  ;;  %s1881_s15 = smov %s1883_s17 }
 0x174   :  { %12 = sbr.rel (!%p10_p12) target bundleno = 3 (0x3), region = 113 }

// kernel: backbone_with_fpn_forward.15
= control target key start
LH: loop header
LB: loop body
LE: loop exit
PB: predicated region body
PF: predicated region fallthrough
CT: control target
= control target key end

     0   :  { %s1072_s12 = smov 0   ;;  %s1074_s13 = smov 0   ;;  %s1182_s0 = inlined_call_operand.vmem [shape: bf16[32,1152], index: 0, kind: input, shape index: {}]   ;;  %s1183_s1 = inlined_call_operand.vmem [shape: bf16[1152,128], index: 1, kind: input, shape index: {}]   ;;  %s1184_s2 = inlined_call_operand.vmem [shape: f32[1,128], index: 2, kind: input, shape index: {}]   ;;  %s1185_s3 = inlined_call_operand.vmem [shape: bf16[32,128], index: 3, kind: output, shape index: {}]  }
   0x1   :  { %s1076_s14 = smov 0   ;;  %s1078_s15 = smov 0  }
   0x2   :  { %s1080_s16 = smov 0  }
   0x3 LB: > { %s25_s17 = sadd.s32 1, %s1045_s15  ;;  %p48_p1 = scmp.ne.s32.totalorder %s1037_s13, %s1033_s12  ;;  %s1049_s16 = sphi %s1080_s16, %s13_s16   ;;  %s1045_s15 = sphi %s1078_s15, %s1189_s15   ;;  %s1041_s14 = sphi %s1076_s14, %s1188_s14   ;;  %s1037_s13 = sphi %s1074_s13, %s1187_s13   ;;  %s1033_s12 = sphi %s1072_s12, %s1186_s12  }
   0x4   : > { %p26_p0 = scmp.ge.s32.totalorder %s25_s17, 3  ;;  %p49_p2 = scmp.eq.s32.totalorder %s1049_s16, 0 }
   0x5   : > { %s41_s19 = sadd.s32 1, %s1037_s13  ;;  %p809_p5 = scmp.ge.s32.totalorder %s1049_s16, 3 }
   0x6   : > { %s1191_s17 = smov (%p26_p0, %s25_s17), 0  ;;  %p50_p3 = por %p49_p2, %p48_p1 }
   0x7   : > { %s37_s18 = ssub.s32 %s1045_s15, %s1191_s17  ;;  %162 = sbr.rel (%p809_p5) target bundleno = 21 (0x15), region = 20 }
   0x8   : > { %p39_p4 = scmp.eq.s32.totalorder %s37_s18, 0 }
   0xa   : > { %s1107_s20 = scalar_select %p39_p4, %s1037_s13, %s41_s19  }
   0xc   : > { %165 = sbr.rel (!%p50_p3) target bundleno = 21 (0x15), region = 24  ;;  %s167_s21 = sand.u32 (%p50_p3), 1, %s1037_s13  }
   0xd   : > { %s862_s22 = smul.u32 (%p50_p3), 12, %s1045_s15 }
   0xe   : > { %s936_s23 = smul.u32 (%p50_p3), 48, %s167_s21 }
   0xf   : > { %s175_s26 = scalar_lea.vmem (%p50_p3), %s1182_s0, %s862_s22 }
  0x10   : > { %v190_v0 = vld [vmem:[%s175_s26] sm:$0xff] (%p50_p3)  ;;  %v194_v2 = vld [vmem:[%s175_s26 + $0x48] sm:$0xff] (%p50_p3)  ;;  %s169_s27 = scalar_lea.vmem (%p50_p3), [#allocation3], %s936_s23  ;;  %v815_v6 = vld [vmem:[%s175_s26 + $0x50] sm:$0xf] (%p50_p3) }
  0x11   : > { %v192_v1 = vld [vmem:[%s175_s26 + $0x24] sm:$0xff]  ;;  %191 = vst [vmem:[%s169_s27] sm:$0xff] %v190_v0  ;;  %195 = vst [vmem:[%s169_s27 + $0x18] sm:$0xff] %v194_v2  ;;  %v196_v3 = vld [vmem:[%s175_s26 + $0x6c] sm:$0xff] }
  0x12   : > { %193 = vst [vmem:[%s169_s27 + $0xc] sm:$0xff] %v192_v1  ;;  %v811_v4 = vld [vmem:[%s175_s26 + $0x8] sm:$0xf]  ;;  %v813_v5 = vld [vmem:[%s175_s26 + $0x2c] sm:$0xf]  ;;  %197 = vst [vmem:[%s169_s27 + $0x24] sm:$0xff] %v196_v3 }
  0x13   : > { %812 = vst [vmem:[%s169_s27 + $0x8] sm:$0xf] %v811_v4  ;;  %814 = vst [vmem:[%s169_s27 + $0x14] sm:$0xf] %v813_v5  ;;  %v817_v7 = vld [vmem:[%s175_s26 + $0x74] sm:$0xf] }
  0x14   : > { %816 = vst [vmem:[%s169_s27 + $0x20] sm:$0xf] %v815_v6  ;;  %818 = vst [vmem:[%s169_s27 + $0x2c] sm:$0xf] %v817_v7 }
  0x15 PF: > { %p819_p6 = scmp.ge.s32.totalorder %s1049_s16, 1  ;;  %p230_p7 = scmp.lt.s32.totalorder %s1049_s16, 4 }
  0x17   : > { %p231_p8 = pnand %p819_p6, %p230_p7 }
  0x18   : > { %s237_s28 = sand.u32 (!%p231_p8), 1, %s1033_s12   ;;  %s276_s29 = smul.u32 (!%p231_p8), 48, %s1041_s14 }
  0x19   : > { %234 = sbr.rel (%p231_p8) target bundleno = 299 (0x12b), region = 54  ;;  %p821_p10 = scmp.ne.s32.totalorder (!%p231_p8), %s1041_s14, 0 }
  0x1a   : > { %s937_s30 = smul.u32 (!%p231_p8), 48, %s237_s28  ;;  %p277_p9 = scmp.lt.s32.totalorder (!%p231_p8), %s276_s29, 143 }
  0x1c   : > { %s1124_s8 = scalar_lea.vmem (!%p231_p8), [#allocation3], %s937_s30 }
  0x1e   : > { %s1193_s29 = smov (!%p277_p9, %s276_s29), 143  ;;  %301 = sbr.rel (%p821_p10) target bundleno = 38 (0x26), region = 62 }
  0x1f   : > { %s820_s4 = sshll.u32 %s1193_s29, 2 }
  0x20   : > { %s1122_s7 = scalar_lea.vmem %s1183_s1, %s820_s4 }
  0x23   : > { %v1051_v8 = vmov 0.0  }
  0x24   : > { %302 = vst [vmem:[#allocation2 + $0x10] sm:$0xff] %v1051_v8  ;;  %303 = vst [vmem:[#allocation2] sm:$0xff] %v1051_v8 }
  0x25   : > { %304 = vst [vmem:[#allocation2 + $0x18] sm:$0xff] %v1051_v8  ;;  %305 = vst [vmem:[#allocation2 + $0x8] sm:$0xff] %v1051_v8 }
  0x26 PF: > { %v979_v9 = vld [vmem:[%s1122_s7 + $0x78] sm:$0xff]   ;;  %v982_v12 = vld [vmem:[%s1122_s7 + $0x70] sm:$0xff]   ;;  %v985_v15 = vld [vmem:[%s1122_s7 + $0x68] sm:$0xff]   ;;  %p852_p11 = scmp.ne.s32.totalorder %s1041_s14, 2 }
  0x27   : > { %v980_v10 = vld [vmem:[%s1122_s7 + $0x38] sm:$0xff]   ;;  %878 = vmatprep.subr.bf16.mxu0 %v979_v9  ;;  %v983_v13 = vld [vmem:[%s1122_s7 + $0x30] sm:$0xff]   ;;  %v986_v16 = vld [vmem:[%s1122_s7 + $0x28] sm:$0xff]  }
  0x28   : > { %v981_v11 = vld [vmem:[%s1122_s7 + $0xb8] sm:$0xff]   ;;  %879 = vmatpush3.bf16.msra.mxu0 %v980_v10  ;;  %v984_v14 = vld [vmem:[%s1122_s7 + $0xb0] sm:$0xff]   ;;  %v987_v17 = vld [vmem:[%s1122_s7 + $0xa8] sm:$0xff]  }
  0x29   : > { %916 = vmatprep.subr.bf16.mxu1 %v981_v11  ;;  %880 = vmatprep.subr.bf16.mxu0 %v982_v12  ;;  %v988_v18 = vld [vmem:[%s1122_s7 + $0x60] sm:$0xff]   ;;  %v991_v21 = vld [vmem:[%s1122_s7 + $0x58] sm:$0xff]   ;;  %v994_v24 = vld [vmem:[%s1122_s7 + $0x50] sm:$0xff]  }
  0x2a   : > { %917 = vmatpush3.bf16.msra.mxu1 %v981_v11  ;;  %v989_v19 = vld [vmem:[%s1122_s7 + $0x20] sm:$0xff]   ;;  %v993_v22 = vld [vmem:[%s1122_s7 + $0x98] sm:$0xff]   ;;  %v996_v25 = vld [vmem:[%s1122_s7 + $0x90] sm:$0xff]  }
  0x2b   : > { %918 = vmatprep.subr.bf16.mxu1 %v984_v14  ;;  %v990_v20 = vld [vmem:[%s1122_s7 + $0xa0] sm:$0xff]   ;;  %v992_v23 = vld [vmem:[%s1122_s7 + $0x18] sm:$0xff]   ;;  %v995_v26 = vld [vmem:[%s1122_s7 + $0x10] sm:$0xff]  }
  0x2c   : > { %881 = vmatpush3.bf16.msra.mxu0 %v983_v13  ;;  %v997_v27 = vld [vmem:[%s1122_s7 + $0x48] sm:$0xff]   ;;  %v1000_v30 = vld [vmem:[%s1122_s7 + $0x40] sm:$0xff]   ;;  %v306_v44 = vld [vmem:[#allocation2 + $0x10] sm:$0xff] }
  0x2d   : > { %882 = vmatprep.subr.bf16.mxu0 %v985_v15  ;;  %v998_v28 = vld [vmem:[%s1122_s7 + $0x8] sm:$0xff]   ;;  %v1002_v31 = vld [vmem:[%s1122_s7 + $0x80] sm:$0xff]   ;;  %v308_v58 = vld [vmem:[#allocation2 + $0x18] sm:$0xff] }
  0x2e   : > { %919 = vmatpush3.bf16.msra.mxu1 %v984_v14  ;;  %v999_v29 = vld [vmem:[%s1122_s7 + $0x88] sm:$0xff]   ;;  %v1005_v32 = vld [vmem:[%s1124_s8 + $0x4] ss:$12 sps:$4 sm:$0xff]  }
  0x2f   : > { %920 = vmatprep.subr.bf16.mxu1 %v987_v17  ;;  %v1006_v33 = vld [vmem:[%s1124_s8 + $0x8] ss:$12 sps:$4 sm:$0xff]   ;;  %574 = vmatprep.mubr.bf16.mxu0 %v1005_v32  ;;  %v1003_v35 = vld [vmem:[%s1124_s8] ss:$12 sps:$4 sm:$0xff]   ;;  %v1010_v38 = vld [vmem:[%s1124_s8 + $0x18] ss:$12 sps:$4 sm:$0xff]  }
  0x30   : > { %883 = vmatpush3.bf16.msra.mxu0 %v986_v16  ;;  %v1001_v34 = vld [vmem:[%s1122_s7] sm:$0xff]   ;;  %932 = vmatprep.mubr.bf16.mxu1 %v1006_v33  ;;  %v1008_v36 = vld [vmem:[%s1124_s8 + $0x1c] ss:$12 sps:$4 sm:$0xff]  }
  0x31   : > { %884 = vmatprep.subr.bf16.mxu0 %v988_v18  ;;  %v1007_v37 = vld [vmem:[%s1124_s8 + $0x20] ss:$12 sps:$4 sm:$0xff]  }
  0x32   : > { %921 = vmatpush3.bf16.msra.mxu1 %v987_v17  ;;  %v307_v52 = vld [vmem:[#allocation2] sm:$0xff]  ;;  %v309_v0 = vld [vmem:[#allocation2 + $0x8] sm:$0xff] }
  0x33   : > { %922 = vmatprep.subr.bf16.mxu1 %v990_v20 }
  0x34   : > { %885 = vmatpush3.bf16.msra.mxu0 %v989_v19 }
  0x35   : > { %886 = vmatprep.subr.bf16.mxu0 %v991_v21 }
  0x36   : > { %923 = vmatpush3.bf16.msra.mxu1 %v990_v20 }
  0x37   : > { %924 = vmatprep.subr.bf16.mxu1 %v993_v22 }
  0x38   : > { %887 = vmatpush3.bf16.msra.mxu0 %v992_v23 }
  0x39   : > { %888 = vmatprep.subr.bf16.mxu0 %v994_v24 }
  0x3a   : > { %925 = vmatpush3.bf16.msra.mxu1 %v993_v22 }
  0x3b   : > { %926 = vmatprep.subr.bf16.mxu1 %v996_v25 }
  0x3c   : > { %889 = vmatpush3.bf16.msra.mxu0 %v995_v26 }
  0x3d   : > { %890 = vmatprep.subr.bf16.mxu0 %v997_v27 }
  0x3e   : > { %927 = vmatpush3.bf16.msra.mxu1 %v996_v25 }
  0x3f   : > { %928 = vmatprep.subr.bf16.mxu1 %v999_v29 }
  0x40   : > { %891 = vmatpush3.bf16.msra.mxu0 %v998_v28 }
  0x41   : > { %892 = vmatprep.subr.bf16.mxu0 %v1000_v30 }
  0x42   : > { %929 = vmatpush3.bf16.msra.mxu1 %v999_v29 }
  0x43   : > { %930 = vmatprep.subr.bf16.mxu1 %v1002_v31 }
  0x44   : > { %893 = vmatpush3.bf16.msra.mxu0 %v1001_v34 }
  0x46   : > { %931 = vmatpush3.bf16.msra.mxu1 %v1002_v31 }
  0x47   : > { %575 = vmatmul.mubr.bf16.vlgmr.msra.gmra.mxu0 %v1003_v35 }
  0x48   : > { %582 = vmatprep.mubr.bf16.mxu0 %v1008_v36 }
  0x49   : > { %933 = vmatmul.mubr.bf16.vlgmr.msra.gmra.mxu1 %v1007_v37 }
  0x4f   : > { %583 = vmatmul.mubr.bf16.gmra.mxu0 %v1010_v38 }
 0x107   : > { %v894_v39 = vpop.f32.mrf.mxu0 }
 0x109   : > { %v895_v40 = vpop.f32.mrf.mxu0  ;;  %v934_v41 = vpop.f32.mrf.mxu1 }
 0x10a   : > { %v896_v42 = vadd.f32 %v895_v40, %v894_v39 }
 0x10b   : > { %v897_v43 = vpop.f32.mrf.mxu0  ;;  %v625_v45 = vpop.f32.mrf.mxu1 }
 0x10c   : > { %v626_v46 = vadd.f32 %v896_v42, %v625_v45 }
 0x10d   : > { %v898_v47 = vpop.f32.mrf.mxu0  ;;  %v935_v48 = vpop.f32.mrf.mxu1 }
 0x10e   : > { %v640_v49 = vadd.f32 %v626_v46, %v306_v44  ;;  %v899_v50 = vadd.f32 %v898_v47, %v897_v43 }
 0x10f   : > { %v900_v51 = vpop.f32.mrf.mxu0  ;;  %v628_v53 = vpop.f32.mrf.mxu1 }
 0x110   : > { %644 = vst [vmem:[#allocation2 + $0x10] sm:$0xff] %v640_v49  ;;  %v629_v54 = vadd.f32 %v899_v50, %v628_v53 }
 0x111   : > { %v901_v55 = vpop.f32.mrf.mxu0 }
 0x112   : > { %v641_v56 = vadd.f32 %v629_v54, %v307_v52  ;;  %v902_v57 = vadd.f32 %v901_v55, %v900_v51 }
 0x113   : > { %v903_v59 = vpop.f32.mrf.mxu0 }
 0x114   : > { %645 = vst [vmem:[#allocation2] sm:$0xff] %v641_v56  ;;  %v634_v60 = vadd.f32 %v934_v41, %v902_v57 }
 0x115   : > { %v904_v61 = vpop.f32.mrf.mxu0 }
 0x116   : > { %v642_v62 = vadd.f32 %v634_v60, %v308_v58  ;;  %v905_v63 = vadd.f32 %v904_v61, %v903_v59 }
 0x118   : > { %646 = vst [vmem:[#allocation2 + $0x18] sm:$0xff] %v642_v62  ;;  %v637_v1 = vadd.f32 %v935_v48, %v905_v63  ;;  %651 = sbr.rel (%p852_p11) target bundleno = 299 (0x12b), region = 66 }
 0x11a   : > { %v643_v2 = vadd.f32 %v637_v1, %v309_v0 }
 0x11c   : > { %647 = vst [vmem:[#allocation2 + $0x8] sm:$0xff] %v643_v2 }
 0x11d   : > { %v652_v3 = vld [vmem:[#allocation2 + $0x10] sm:$0xff]  ;;  %v653_v4 = vld [vmem:[#allocation2] sm:$0xff] }
 0x11e   : > { %v853_v5 = vld [vmem:[%s1184_s2] ss:$0 sm:$0xff] }
 0x11f   : > { %v663_v6 = vadd.f32 %v853_v5, %v652_v3  ;;  %v664_v7 = vadd.f32 %v853_v5, %v653_v4  ;;  %v654_v8 = vld [vmem:[#allocation2 + $0x18] sm:$0xff] }
 0x120   : > { %v665_v10 = vadd.f32 %v853_v5, %v654_v8 }
 0x121   : > { %v667_v12 = vmax.f32 %v663_v6, 0.0  ;;  %v668_v13 = vmax.f32 %v664_v7, 0.0 }
 0x122   : > { %v669_v14 = vmax.f32 %v665_v10, 0.0 }
 0x123   : > { %v655_v9 = vld [vmem:[#allocation2 + $0x8] sm:$0xff]  ;;  %v870_v16 = vpack.c.bf16 %v668_v13, %v667_v12 }
 0x124   : > { %v666_v11 = vadd.f32 %v853_v5, %v655_v9 }
 0x125   : > { %871 = vst [vmem:[%s1185_s3] sm:$0xff] %v870_v16  }
 0x126   : > { %v670_v15 = vmax.f32 %v666_v11, 0.0 }
 0x128   : > { %v875_v17 = vpack.c.bf16 %v670_v15, %v669_v14 }
 0x12a   : > { %877 = vst [vmem:[%s1185_s3 + $0x8] sm:$0xff] %v875_v17  }
 0x12b PF: > { %s13_s16 = sadd.s32 1, %s1049_s16   ;;  %s1186_s12 = smov %s1037_s13 }
 0x12c   : > { %p10_p12 = scmp.ge.s32.totalorder %s13_s16, 5   ;;  %s1187_s13 = smov %s1107_s20 }
 0x12d   : > { %s1188_s14 = smov %s1045_s15  ;;  %s1189_s15 = smov %s1191_s17 }
 0x12e   :  { %12 = sbr.rel (!%p10_p12) target bundleno = 3 (0x3), region = 113 }

// kernel: backbone_with_fpn_forward.16
= control target key start
LH: loop header
LB: loop body
LE: loop exit
PB: predicated region body
PF: predicated region fallthrough
CT: control target
= control target key end

     0   :  { %s866_s12 = smov 0   ;;  %s868_s13 = smov 0   ;;  %s941_s0 = inlined_call_operand.vmem [shape: bf16[8,1152], index: 0, kind: input, shape index: {}]   ;;  %s942_s1 = inlined_call_operand.vmem [shape: bf16[1152,128], index: 1, kind: input, shape index: {}]   ;;  %s943_s2 = inlined_call_operand.vmem [shape: f32[1,128], index: 2, kind: input, shape index: {}]   ;;  %s944_s3 = inlined_call_operand.vmem [shape: bf16[8,128], index: 3, kind: output, shape index: {}]  }
   0x1   :  { %s870_s14 = smov 0  }
   0x2 LB: > { %s25_s15 = sadd.s32 1, %s837_s13  ;;  %p678_p0 = scmp.ge.s32.totalorder %s841_s14, 1  ;;  %s841_s14 = sphi %s870_s14, %s13_s14   ;;  %s837_s13 = sphi %s868_s13, %s946_s13   ;;  %s833_s12 = sphi %s866_s12, %s945_s12  }
   0x3   : > { %p26_p1 = scmp.ge.s32.totalorder %s25_s15, 3  ;;  %p189_p2 = scmp.lt.s32.totalorder %s841_s14, 4 }
   0x5   : > { %s948_s15 = smov (%p26_p1, %s25_s15), 0  ;;  %p190_p3 = pnand %p678_p0, %p189_p2 }
   0x6   : > { %s230_s16 = smul.u32 (!%p190_p3), 3, %s833_s12  ;;  %p681_p6 = scmp.ne.s32.totalorder (!%p190_p3), %s833_s12, 0 }
   0x7   : > { %193 = sbr.rel (%p190_p3) target bundleno = 272 (0x110), region = 32 }
   0x8   : > { %s240_s17 = smul.u32 (!%p190_p3), 48, %s833_s12  ;;  %p233_p4 = scmp.lt.s32.totalorder (!%p190_p3), %s230_s16, 8 }
   0xa   : > { %p241_p5 = scmp.lt.s32.totalorder (!%p190_p3), %s240_s17, 143 }
   0xc   : > { %s950_s16 = smov (!%p233_p4, %s230_s16), 8  ;;  %s952_s17 = smov (!%p241_p5, %s240_s17), 143 }
   0xd   : > { %s679_s18 = sshll.u32 %s950_s16, 2  ;;  %s680_s22 = sshll.u32 %s952_s17, 2 }
   0xe   : > { %s891_s21 = scalar_lea.vmem %s941_s0, %s679_s18  ;;  %s896_s25 = scalar_lea.vmem %s942_s1, %s680_s22 }
   0xf   : > { %263 = sbr.rel (%p681_p6) target bundleno = 22 (0x16), region = 36 }
  0x14   : > { %v843_v0 = vmov 0.0  }
  0x15   : > { %264 = vst [vmem:[#allocation2] sm:$0xff] %v843_v0 }
  0x16 PF: > { %v792_v1 = vld [vmem:[%s896_s25 + $0x78] sm:$0xff]   ;;  %v844_v2 = vmov 0.0   ;;  %vm845_vm0 = vmmov 0   ;;  %v795_v5 = vld [vmem:[%s896_s25 + $0x70] sm:$0xff]   ;;  %v798_v8 = vld [vmem:[%s896_s25 + $0x68] sm:$0xff]   ;;  %p709_p7 = scmp.ne.s32.totalorder %s833_s12, 2 }
  0x17   : > { %745 = vmatprep.subr.bf16.mxu1 %v844_v2  ;;  %v793_v3 = vld [vmem:[%s896_s25 + $0xb8] sm:$0xff]   ;;  %714 = vmatprep.subr.bf16.mxu0 %v792_v1  ;;  %v796_v6 = vld [vmem:[%s896_s25 + $0xb0] sm:$0xff]   ;;  %v799_v9 = vld [vmem:[%s896_s25 + $0xa8] sm:$0xff]  }
  0x18   : > { %v794_v4 = vld [vmem:[%s896_s25 + $0x38] sm:$0xff]   ;;  %761 = vmatprep.mubr.msk.bf16.mxu1 %vm845_vm0, %v844_v2  ;;  %746 = vmatpush3.bf16.msra.mxu1 %v793_v3  ;;  %v797_v7 = vld [vmem:[%s896_s25 + $0x30] sm:$0xff]   ;;  %v800_v10 = vld [vmem:[%s896_s25 + $0x28] sm:$0xff]  }
  0x19   : > { %715 = vmatpush3.bf16.msra.mxu0 %v794_v4  ;;  %747 = vmatprep.subr.bf16.mxu1 %v844_v2  ;;  %v801_v11 = vld [vmem:[%s896_s25 + $0x60] sm:$0xff]   ;;  %v804_v14 = vld [vmem:[%s896_s25 + $0x58] sm:$0xff]   ;;  %v807_v17 = vld [vmem:[%s896_s25 + $0x50] sm:$0xff]  }
  0x1a   : > { %716 = vmatprep.subr.bf16.mxu0 %v795_v5  ;;  %v802_v12 = vld [vmem:[%s896_s25 + $0xa0] sm:$0xff]   ;;  %v805_v15 = vld [vmem:[%s896_s25 + $0x98] sm:$0xff]   ;;  %v808_v18 = vld [vmem:[%s896_s25 + $0x90] sm:$0xff]  }
  0x1b   : > { %v803_v13 = vld [vmem:[%s896_s25 + $0x20] sm:$0xff]   ;;  %v806_v16 = vld [vmem:[%s896_s25 + $0x18] sm:$0xff]   ;;  %v809_v19 = vld [vmem:[%s896_s25 + $0x10] sm:$0xff]  }
  0x1c   : > { %748 = vmatpush3.bf16.msra.mxu1 %v796_v6  ;;  %v810_v20 = vld [vmem:[%s896_s25 + $0x48] sm:$0xff]   ;;  %v266_v23 = vld [vmem:[%s891_s21] sm:$0xff] }
  0x1d   : > { %717 = vmatpush3.bf16.msra.mxu0 %v797_v7  ;;  %749 = vmatprep.subr.bf16.mxu1 %v844_v2  ;;  %v811_v21 = vld [vmem:[%s896_s25 + $0x88] sm:$0xff]   ;;  %v813_v24 = vld [vmem:[%s896_s25 + $0x40] sm:$0xff]   ;;  %v683_v25 = vcombine.high %v266_v23, %v266_v23  ;;  %v682_v29 = vcombine.low %v266_v23, %v266_v23 }
  0x1e   : > { %718 = vmatprep.subr.bf16.mxu0 %v798_v8  ;;  %v812_v22 = vld [vmem:[%s896_s25 + $0x8] sm:$0xff]   ;;  %v814_v26 = vld [vmem:[%s896_s25 + $0x80] sm:$0xff]  }
  0x1f   : > { %503 = vmatprep.mubr.bf16.mxu0 %v683_v25  ;;  %v815_v27 = vld [vmem:[%s896_s25] sm:$0xff]   ;;  %v818_v28 = vld [vmem:[%s891_s21 + $0x8] ss:$0 sps:$4 sm:$0xff]  }
  0x20   : > { %750 = vmatpush3.bf16.msra.mxu1 %v799_v9  ;;  %v265_v36 = vld [vmem:[#allocation2] sm:$0xff] }
  0x21   : > { %719 = vmatpush3.bf16.msra.mxu0 %v800_v10  ;;  %751 = vmatprep.subr.bf16.mxu1 %v844_v2 }
  0x22   : > { %720 = vmatprep.subr.bf16.mxu0 %v801_v11 }
  0x24   : > { %752 = vmatpush3.bf16.msra.mxu1 %v802_v12 }
  0x25   : > { %721 = vmatpush3.bf16.msra.mxu0 %v803_v13  ;;  %753 = vmatprep.subr.bf16.mxu1 %v844_v2 }
  0x26   : > { %722 = vmatprep.subr.bf16.mxu0 %v804_v14 }
  0x28   : > { %754 = vmatpush3.bf16.msra.mxu1 %v805_v15 }
  0x29   : > { %723 = vmatpush3.bf16.msra.mxu0 %v806_v16  ;;  %755 = vmatprep.subr.bf16.mxu1 %v844_v2 }
  0x2a   : > { %724 = vmatprep.subr.bf16.mxu0 %v807_v17 }
  0x2c   : > { %756 = vmatpush3.bf16.msra.mxu1 %v808_v18 }
  0x2d   : > { %725 = vmatpush3.bf16.msra.mxu0 %v809_v19  ;;  %757 = vmatprep.subr.bf16.mxu1 %v844_v2 }
  0x2e   : > { %726 = vmatprep.subr.bf16.mxu0 %v810_v20 }
  0x30   : > { %758 = vmatpush3.bf16.msra.mxu1 %v811_v21 }
  0x31   : > { %727 = vmatpush3.bf16.msra.mxu0 %v812_v22  ;;  %759 = vmatprep.subr.bf16.mxu1 %v844_v2 }
  0x32   : > { %728 = vmatprep.subr.bf16.mxu0 %v813_v24 }
  0x34   : > { %760 = vmatpush3.bf16.msra.mxu1 %v814_v26 }
  0x35   : > { %729 = vmatpush3.bf16.msra.mxu0 %v815_v27 }
  0x37   : > { %762 = vmatmul.mubr.bf16.vlgmr.msra.gmra.mxu1 %v818_v28 }
  0x38   : > { %504 = vmatmul.mubr.bf16.vlgmr.msra.gmra.mxu0 %v682_v29 }
  0xf7   : > { %v545_v30 = vpop.f32.mrf.mxu1 }
  0xf8   : > { %v730_v31 = vpop.f32.mrf.mxu0 }
  0xf9   : > { %v763_v32 = vpop.f32.mrf.mxu1 }
  0xfa   : > { %v731_v33 = vpop.f32.mrf.mxu0 }
  0xfb   : > { %v732_v34 = vadd.f32 %v731_v33, %v730_v31  ;;  %v548_v35 = vpop.f32.mrf.mxu1 }
  0xfc   : > { %v733_v37 = vpop.f32.mrf.mxu0 }
  0xfd   : > { %v546_v38 = vadd.f32 %v732_v34, %v545_v30  ;;  %v764_v39 = vpop.f32.mrf.mxu1  ;;  %556 = sbr.rel (%p709_p7) target bundleno = 272 (0x110), region = 40 }
  0xfe   : > { %v734_v40 = vpop.f32.mrf.mxu0 }
  0xff   : > { %v551_v41 = vadd.f32 %v546_v38, %v265_v36 }
 0x101   : > { %552 = vst [vmem:[#allocation2] sm:$0xff] %v551_v41 }
 0x102   : > { %v710_v43 = vld [vmem:[%s943_s2] ss:$0 sm:$0xff] }
 0x108   : > { %v557_v42 = vld [vmem:[#allocation2] sm:$0xff] }
 0x109   : > { %v565_v44 = vadd.f32 %v710_v43, %v557_v42 }
 0x10b   : > { %v566_v45 = vmax.f32 %v565_v44, 0.0 }
 0x10d   : > { %v567_v46 = vpack.c.bf16 %v566_v45, %v566_v45 }
 0x10f   : > { %568 = vst [vmem:[%s944_s3] sm:$0xf] %v567_v46 }
 0x110 PF: > { %s13_s14 = sadd.s32 1, %s841_s14   ;;  %s945_s12 = smov %s837_s13 }
 0x111   : > { %p10_p8 = scmp.ge.s32.totalorder %s13_s14, 5   ;;  %s946_s13 = smov %s948_s15 }
 0x113   :  { %12 = sbr.rel (!%p10_p8) target bundleno = 2 (0x2), region = 76 }

// kernel: backbone_with_fpn_forward.19
= control target key start
LH: loop header
LB: loop body
LE: loop exit
PB: predicated region body
PF: predicated region fallthrough
CT: control target
= control target key end

     0   :  { %v200_v0 = vmov 0.0   ;;  %vm201_vm0 = vmmov 0   ;;  %s263_s1 = inlined_call_operand.vmem [shape: bf16[128,128], index: 1, kind: input, shape index: {}]   ;;  %s264_s0 = inlined_call_operand.vmem [shape: bf16[8,128], index: 0, kind: input, shape index: {}]   ;;  %s265_s3 = inlined_call_operand.vmem [shape: bf16[8,128], index: 3, kind: input, shape index: {}]   ;;  %s266_s2 = inlined_call_operand.vmem [shape: f32[1,128], index: 2, kind: input, shape index: {}]   ;;  %s267_s4 = inlined_call_operand.vmem [shape: bf16[8,128], index: 4, kind: output, shape index: {}]  }
   0x1   :  { %170 = vmatprep.subr.bf16.mxu0 %v200_v0  ;;  %v192_v1 = vld [vmem:[%s263_s1 + $0x38] sm:$0xff]   ;;  %186 = vmatprep.mubr.msk.bf16.mxu0 %vm201_vm0, %v200_v0  ;;  %v193_v2 = vld [vmem:[%s263_s1 + $0x30] sm:$0xff]   ;;  %v194_v3 = vld [vmem:[%s263_s1 + $0x28] sm:$0xff]  }
   0x2   :  { %171 = vmatpush3.bf16.msra.mxu0 %v192_v1  ;;  %v195_v4 = vld [vmem:[%s263_s1 + $0x20] sm:$0xff]   ;;  %v196_v5 = vld [vmem:[%s263_s1 + $0x18] sm:$0xff]   ;;  %v197_v6 = vld [vmem:[%s263_s1 + $0x10] sm:$0xff]  }
   0x3   :  { %172 = vmatprep.subr.bf16.mxu0 %v200_v0  ;;  %v198_v7 = vld [vmem:[%s263_s1 + $0x8] sm:$0xff]   ;;  %v199_v8 = vld [vmem:[%s263_s1] sm:$0xff]  }
   0x4   :  { %v24_v9 = vld [vmem:[%s264_s0] sm:$0xf] }
   0x5   :  { %v143_v10 = vld [vmem:[%s265_s3] sm:$0xf] }
   0x6   :  { %173 = vmatpush3.bf16.msra.mxu0 %v193_v2  ;;  %v160_v11 = vld [vmem:[%s266_s2] ss:$0 sm:$0xff]  ;;  %v144_v12 = vunpack.c.l.bf16 %v143_v10 }
   0x7   :  { %174 = vmatprep.subr.bf16.mxu0 %v200_v0 }
   0xa   :  { %175 = vmatpush3.bf16.msra.mxu0 %v194_v3 }
   0xb   :  { %176 = vmatprep.subr.bf16.mxu0 %v200_v0 }
   0xe   :  { %177 = vmatpush3.bf16.msra.mxu0 %v195_v4 }
   0xf   :  { %178 = vmatprep.subr.bf16.mxu0 %v200_v0 }
  0x12   :  { %179 = vmatpush3.bf16.msra.mxu0 %v196_v5 }
  0x13   :  { %180 = vmatprep.subr.bf16.mxu0 %v200_v0 }
  0x16   :  { %181 = vmatpush3.bf16.msra.mxu0 %v197_v6 }
  0x17   :  { %182 = vmatprep.subr.bf16.mxu0 %v200_v0 }
  0x1a   :  { %183 = vmatpush3.bf16.msra.mxu0 %v198_v7 }
  0x1b   :  { %184 = vmatprep.subr.bf16.mxu0 %v200_v0 }
  0x1e   :  { %185 = vmatpush3.bf16.msra.mxu0 %v199_v8 }
  0x21   :  { %187 = vmatmul.mubr.bf16.vlgmr.msra.gmra.mxu0 %v24_v9 }
  0xe1   :  { %v123_v13 = vpop.f32.mrf.mxu0 }
  0xe2   :  { %v142_v14 = vadd.f32 %v160_v11, %v123_v13 }
  0xe3   :  { %v188_v15 = vpop.f32.mrf.mxu0 }
  0xe4   :  { %v145_v16 = vadd.f32 %v144_v12, %v142_v14 }
  0xe5   :  { %v126_v17 = vpop.f32.mrf.mxu0 }
  0xe6   :  { %v146_v18 = vpack.c.bf16 %v145_v16, %v145_v16 }
  0xe7   :  { %v189_v19 = vpop.f32.mrf.mxu0 }
  0xe8   :  { %147 = vst [vmem:[%s267_s4] sm:$0xf] %v146_v18 }

// kernel: backbone_with_fpn_forward.18
= control target key start
LH: loop header
LB: loop body
LE: loop exit
PB: predicated region body
PF: predicated region fallthrough
CT: control target
= control target key end

     0   :  { %v194_v0 = vmov 0.0   ;;  %vm195_vm0 = vmmov 0   ;;  %s249_s1 = inlined_call_operand.vmem [shape: bf16[128,128], index: 1, kind: input, shape index: {}]   ;;  %s250_s0 = inlined_call_operand.vmem [shape: bf16[2,128], index: 0, kind: input, shape index: {}]   ;;  %s251_s2 = inlined_call_operand.vmem [shape: f32[1,128], index: 2, kind: input, shape index: {}]   ;;  %s252_s3 = inlined_call_operand.vmem [shape: bf16[2,128], index: 3, kind: output, shape index: {}]  }
   0x1   :  { %164 = vmatprep.subr.bf16.mxu0 %v194_v0  ;;  %19 = vst [vmem:[#allocation2] sm:$0x3] %v194_v0  ;;  %v186_v1 = vld [vmem:[%s249_s1 + $0x38] sm:$0xff]   ;;  %180 = vmatprep.mubr.msk.bf16.mxu0 %vm195_vm0, %v194_v0  ;;  %v187_v2 = vld [vmem:[%s249_s1 + $0x30] sm:$0xff]   ;;  %v188_v3 = vld [vmem:[%s249_s1 + $0x28] sm:$0xff]  }
   0x2   :  { %165 = vmatpush3.bf16.msra.mxu0 %v186_v1  ;;  %v189_v4 = vld [vmem:[%s249_s1 + $0x20] sm:$0xff]   ;;  %v190_v5 = vld [vmem:[%s249_s1 + $0x18] sm:$0xff]   ;;  %v191_v6 = vld [vmem:[%s249_s1 + $0x10] sm:$0xff]  }
   0x3   :  { %166 = vmatprep.subr.bf16.mxu0 %v194_v0  ;;  %v192_v7 = vld [vmem:[%s249_s1 + $0x8] sm:$0xff]   ;;  %v193_v8 = vld [vmem:[%s249_s1] sm:$0xff]  }
   0x4   :  { %v21_v9 = vld [vmem:[%s250_s0] sm:$0x1] }
   0x5   :  { %v154_v16 = vld [vmem:[%s251_s2] ss:$0 sm:$0xff] }
   0x6   :  { %167 = vmatpush3.bf16.msra.mxu0 %v187_v2 }
   0x7   :  { %168 = vmatprep.subr.bf16.mxu0 %v194_v0 }
   0x8   :  { %v20_v10 = vld [vmem:[#allocation2] sm:$0x3] }
   0xa   :  { %169 = vmatpush3.bf16.msra.mxu0 %v188_v3 }
   0xb   :  { %170 = vmatprep.subr.bf16.mxu0 %v194_v0 }
   0xe   :  { %171 = vmatpush3.bf16.msra.mxu0 %v189_v4 }
   0xf   :  { %172 = vmatprep.subr.bf16.mxu0 %v194_v0 }
  0x12   :  { %173 = vmatpush3.bf16.msra.mxu0 %v190_v5 }
  0x13   :  { %174 = vmatprep.subr.bf16.mxu0 %v194_v0 }
  0x16   :  { %175 = vmatpush3.bf16.msra.mxu0 %v191_v6 }
  0x17   :  { %176 = vmatprep.subr.bf16.mxu0 %v194_v0 }
  0x1a   :  { %177 = vmatpush3.bf16.msra.mxu0 %v192_v7 }
  0x1b   :  { %178 = vmatprep.subr.bf16.mxu0 %v194_v0 }
  0x1e   :  { %179 = vmatpush3.bf16.msra.mxu0 %v193_v8 }
  0x21   :  { %181 = vmatmul.mubr.bf16.vlgmr.msra.gmra.mxu0 %v21_v9 }
  0xe1   :  { %v120_v11 = vpop.f32.mrf.mxu0 }
  0xe2   :  { %v126_v12 = vadd.f32 %v120_v11, %v20_v10 }
  0xe3   :  { %v182_v13 = vpop.f32.mrf.mxu0 }
  0xe4   :  { %127 = vst [vmem:[#allocation2] sm:$0x3] %v126_v12 }
  0xe5   :  { %v123_v14 = vpop.f32.mrf.mxu0 }
  0xe7   :  { %v183_v15 = vpop.f32.mrf.mxu0 }
  0xeb   :  { %v131_v17 = vld [vmem:[#allocation2] sm:$0x3] }
  0xec   :  { %v139_v18 = vadd.f32 %v154_v16, %v131_v17 }
  0xee   :  { %v140_v19 = vpack.c.bf16 %v139_v18, %v139_v18 }
  0xf0   :  { %141 = vst [vmem:[%s252_s3] sm:$0x1] %v140_v19 }

// kernel: backbone_with_fpn_forward.17
= control target key start
LH: loop header
LB: loop body
LE: loop exit
PB: predicated region body
PF: predicated region fallthrough
CT: control target
= control target key end

     0   :  { %s863_s12 = smov 0   ;;  %s865_s13 = smov 0   ;;  %s942_s0 = inlined_call_operand.vmem [shape: bf16[2,1152], index: 0, kind: input, shape index: {}]   ;;  %s943_s1 = inlined_call_operand.vmem [shape: bf16[1152,128], index: 1, kind: input, shape index: {}]   ;;  %s944_s2 = inlined_call_operand.vmem [shape: f32[1,128], index: 2, kind: input, shape index: {}]   ;;  %s945_s3 = inlined_call_operand.vmem [shape: bf16[2,128], index: 3, kind: output, shape index: {}]  }
   0x1   :  { %s867_s14 = smov 0  }
   0x2 LB: > { %s25_s15 = sadd.s32 1, %s833_s13  ;;  %p679_p0 = scmp.ge.s32.totalorder %s837_s14, 1  ;;  %s837_s14 = sphi %s867_s14, %s13_s14   ;;  %s833_s13 = sphi %s865_s13, %s947_s13   ;;  %s829_s12 = sphi %s863_s12, %s946_s12  }
   0x3   : > { %p26_p1 = scmp.ge.s32.totalorder %s25_s15, 3  ;;  %p188_p2 = scmp.lt.s32.totalorder %s837_s14, 4 }
   0x5   : > { %s949_s15 = smov (%p26_p1, %s25_s15), 0  ;;  %p189_p3 = pnand %p679_p0, %p188_p2 }
   0x6   : > { %s227_s16 = smul.u32 (!%p189_p3), 3, %s829_s12  ;;  %p681_p6 = scmp.ne.s32.totalorder (!%p189_p3), %s829_s12, 0 }
   0x7   : > { %192 = sbr.rel (%p189_p3) target bundleno = 271 (0x10f), region = 32 }
   0x8   : > { %s236_s17 = smul.u32 (!%p189_p3), 48, %s829_s12  ;;  %p230_p4 = scmp.lt.s32.totalorder (!%p189_p3), %s227_s16, 8 }
   0xa   : > { %p237_p5 = scmp.lt.s32.totalorder (!%p189_p3), %s236_s17, 143 }
   0xc   : > { %s951_s16 = smov (!%p230_p4, %s227_s16), 8  ;;  %s953_s17 = smov (!%p237_p5, %s236_s17), 143 }
   0xd   : > { %s234_s20 = scalar_lea.vmem %s942_s0, %s951_s16  ;;  %s680_s21 = sshll.u32 %s953_s17, 2 }
   0xe   : > { %s894_s24 = scalar_lea.vmem %s943_s1, %s680_s21  ;;  %258 = sbr.rel (%p681_p6) target bundleno = 21 (0x15), region = 36 }
  0x13   : > { %v839_v0 = vmov 0.0  }
  0x14   : > { %259 = vst [vmem:[#allocation2] sm:$0x3] %v839_v0 }
  0x15 PF: > { %v791_v1 = vld [vmem:[%s894_s24 + $0x78] sm:$0xff]   ;;  %v840_v2 = vmov 0.0   ;;  %vm841_vm0 = vmmov 0   ;;  %v794_v5 = vld [vmem:[%s894_s24 + $0x70] sm:$0xff]   ;;  %v797_v8 = vld [vmem:[%s894_s24 + $0x68] sm:$0xff]   ;;  %v322_v21 = vlaneseq  ;;  %p707_p7 = scmp.ne.s32.totalorder %s829_s12, 2 }
  0x16   : > { %743 = vmatprep.subr.bf16.mxu1 %v840_v2  ;;  %v792_v3 = vld [vmem:[%s894_s24 + $0xb8] sm:$0xff]   ;;  %712 = vmatprep.subr.bf16.mxu0 %v791_v1  ;;  %v795_v6 = vld [vmem:[%s894_s24 + $0xb0] sm:$0xff]   ;;  %v798_v9 = vld [vmem:[%s894_s24 + $0xa8] sm:$0xff]   ;;  %v842_v26 = vmov 1966171168  }
  0x17   : > { %v793_v4 = vld [vmem:[%s894_s24 + $0x38] sm:$0xff]   ;;  %759 = vmatprep.mubr.msk.bf16.mxu1 %vm841_vm0, %v840_v2  ;;  %744 = vmatpush3.bf16.msra.mxu1 %v792_v3  ;;  %v796_v7 = vld [vmem:[%s894_s24 + $0x30] sm:$0xff]   ;;  %v799_v10 = vld [vmem:[%s894_s24 + $0x28] sm:$0xff]   ;;  %v320_v27 = vunpack.c.l.s4 %v842_v26  ;;  %v323_v28 = vshrl.u32 %v322_v21, 7 }
  0x18   : > { %713 = vmatpush3.bf16.msra.mxu0 %v793_v4  ;;  %745 = vmatprep.subr.bf16.mxu1 %v840_v2  ;;  %v800_v11 = vld [vmem:[%s894_s24 + $0x60] sm:$0xff]   ;;  %v803_v14 = vld [vmem:[%s894_s24 + $0x58] sm:$0xff]   ;;  %v806_v17 = vld [vmem:[%s894_s24 + $0x50] sm:$0xff]  }
  0x19   : > { %714 = vmatprep.subr.bf16.mxu0 %v794_v5  ;;  %v801_v12 = vld [vmem:[%s894_s24 + $0xa0] sm:$0xff]   ;;  %v804_v15 = vld [vmem:[%s894_s24 + $0x98] sm:$0xff]   ;;  %v807_v18 = vld [vmem:[%s894_s24 + $0x90] sm:$0xff]   ;;  %v321_v31 = vunpack.c.0.s8 %v320_v27 }
  0x1a   : > { %v802_v13 = vld [vmem:[%s894_s24 + $0x20] sm:$0xff]   ;;  %v805_v16 = vld [vmem:[%s894_s24 + $0x18] sm:$0xff]   ;;  %v808_v19 = vld [vmem:[%s894_s24 + $0x10] sm:$0xff]  }
  0x1b   : > { %746 = vmatpush3.bf16.msra.mxu1 %v795_v6  ;;  %v809_v20 = vld [vmem:[%s894_s24 + $0x48] sm:$0xff]   ;;  %v682_v24 = vld.sshfl [vmem:[%s234_s20] sm:$0x13 pattern:$0x75316420]  ;;  %v324_v33 = vsub.s32 %v321_v31, %v323_v28 }
  0x1c   : > { %715 = vmatpush3.bf16.msra.mxu0 %v796_v7  ;;  %747 = vmatprep.subr.bf16.mxu1 %v840_v2  ;;  %v810_v22 = vld [vmem:[%s894_s24 + $0x88] sm:$0xff]   ;;  %v812_v25 = vld [vmem:[%s894_s24 + $0x40] sm:$0xff]   ;;  %v318_v30 = vcombine.high %v682_v24, %v682_v24 }
  0x1d   : > { %716 = vmatprep.subr.bf16.mxu0 %v797_v8  ;;  %v811_v23 = vld [vmem:[%s894_s24 + $0x8] sm:$0xff]   ;;  %v813_v29 = vld [vmem:[%s894_s24 + $0x80] sm:$0xff]   ;;  %v325_v34 = vrot.slane %v682_v24, %v324_v33 }
  0x1e   : > { %v814_v32 = vld [vmem:[%s894_s24] sm:$0xff]   ;;  %v332_v35 = vrot.slane %v318_v30, %v324_v33 }
  0x1f   : > { %748 = vmatpush3.bf16.msra.mxu1 %v798_v9  ;;  %v333_v36 = vcombine.high %v325_v34, %v325_v34  ;;  %v260_v42 = vld [vmem:[#allocation2] sm:$0x3] }
  0x20   : > { %717 = vmatpush3.bf16.msra.mxu0 %v799_v10  ;;  %749 = vmatprep.subr.bf16.mxu1 %v840_v2 }
  0x21   : > { %718 = vmatprep.subr.bf16.mxu0 %v800_v11  ;;  %513 = vmatprep.mubr.bf16.mxu0 %v332_v35 }
  0x23   : > { %750 = vmatpush3.bf16.msra.mxu1 %v801_v12 }
  0x24   : > { %719 = vmatpush3.bf16.msra.mxu0 %v802_v13  ;;  %751 = vmatprep.subr.bf16.mxu1 %v840_v2 }
  0x25   : > { %720 = vmatprep.subr.bf16.mxu0 %v803_v14 }
  0x27   : > { %752 = vmatpush3.bf16.msra.mxu1 %v804_v15 }
  0x28   : > { %721 = vmatpush3.bf16.msra.mxu0 %v805_v16  ;;  %753 = vmatprep.subr.bf16.mxu1 %v840_v2 }
  0x29   : > { %722 = vmatprep.subr.bf16.mxu0 %v806_v17 }
  0x2b   : > { %754 = vmatpush3.bf16.msra.mxu1 %v807_v18 }
  0x2c   : > { %723 = vmatpush3.bf16.msra.mxu0 %v808_v19  ;;  %755 = vmatprep.subr.bf16.mxu1 %v840_v2 }
  0x2d   : > { %724 = vmatprep.subr.bf16.mxu0 %v809_v20 }
  0x2f   : > { %756 = vmatpush3.bf16.msra.mxu1 %v810_v22 }
  0x30   : > { %725 = vmatpush3.bf16.msra.mxu0 %v811_v23  ;;  %757 = vmatprep.subr.bf16.mxu1 %v840_v2 }
  0x31   : > { %726 = vmatprep.subr.bf16.mxu0 %v812_v25 }
  0x33   : > { %758 = vmatpush3.bf16.msra.mxu1 %v813_v29 }
  0x34   : > { %727 = vmatpush3.bf16.msra.mxu0 %v814_v32 }
  0x36   : > { %760 = vmatmul.mubr.bf16.vlgmr.msra.gmra.mxu1 %v333_v36 }
  0x37   : > { %514 = vmatmul.mubr.bf16.vlgmr.msra.gmra.mxu0 %v325_v34 }
  0xf6   : > { %v555_v37 = vpop.f32.mrf.mxu1 }
  0xf7   : > { %v728_v38 = vpop.f32.mrf.mxu0 }
  0xf8   : > { %v761_v39 = vpop.f32.mrf.mxu1 }
  0xf9   : > { %v729_v40 = vpop.f32.mrf.mxu0 }
  0xfa   : > { %v730_v41 = vadd.f32 %v729_v40, %v728_v38  ;;  %v558_v43 = vpop.f32.mrf.mxu1 }
  0xfb   : > { %v731_v44 = vpop.f32.mrf.mxu0 }
  0xfc   : > { %v556_v45 = vadd.f32 %v730_v41, %v555_v37  ;;  %v762_v46 = vpop.f32.mrf.mxu1  ;;  %566 = sbr.rel (%p707_p7) target bundleno = 271 (0x10f), region = 40 }
  0xfd   : > { %v732_v47 = vpop.f32.mrf.mxu0 }
  0xfe   : > { %v561_v48 = vadd.f32 %v556_v45, %v260_v42 }
 0x100   : > { %562 = vst [vmem:[#allocation2] sm:$0x3] %v561_v48 }
 0x101   : > { %v708_v50 = vld [vmem:[%s944_s2] ss:$0 sm:$0xff] }
 0x107   : > { %v567_v49 = vld [vmem:[#allocation2] sm:$0x3] }
 0x108   : > { %v575_v51 = vadd.f32 %v708_v50, %v567_v49 }
 0x10a   : > { %v576_v52 = vmax.f32 %v575_v51, 0.0 }
 0x10c   : > { %v577_v53 = vpack.c.bf16 %v576_v52, %v576_v52 }
 0x10e   : > { %578 = vst [vmem:[%s945_s3] sm:$0x1] %v577_v53 }
 0x10f PF: > { %s13_s14 = sadd.s32 1, %s837_s14   ;;  %s946_s12 = smov %s833_s13 }
 0x110   : > { %p10_p8 = scmp.ge.s32.totalorder %s13_s14, 5   ;;  %s947_s13 = smov %s949_s15 }
 0x112   :  { %12 = sbr.rel (!%p10_p8) target bundleno = 2 (0x2), region = 76 }

// kernel: backbone_with_fpn_forward.24
= control target key start
LH: loop header
LB: loop body
LE: loop exit
PB: predicated region body
PF: predicated region fallthrough
CT: control target
= control target key end

     0   :  { %s864_s12 = smov 0   ;;  %s866_s13 = smov 0   ;;  %s939_s0 = inlined_call_operand.vmem [shape: bf16[8,1152], index: 0, kind: input, shape index: {}]   ;;  %s940_s1 = inlined_call_operand.vmem [shape: bf16[1152,128], index: 1, kind: input, shape index: {}]   ;;  %s941_s2 = inlined_call_operand.vmem [shape: f32[1,128], index: 2, kind: input, shape index: {}]   ;;  %s942_s3 = inlined_call_operand.vmem [shape: f32[8,128], index: 3, kind: output, shape index: {}]  }
   0x1   :  { %s868_s14 = smov 0  }
   0x2 LB: > { %s25_s15 = sadd.s32 1, %s835_s13  ;;  %p676_p0 = scmp.ge.s32.totalorder %s839_s14, 1  ;;  %s839_s14 = sphi %s868_s14, %s13_s14   ;;  %s835_s13 = sphi %s866_s13, %s944_s13   ;;  %s831_s12 = sphi %s864_s12, %s943_s12  }
   0x3   : > { %p26_p1 = scmp.ge.s32.totalorder %s25_s15, 3  ;;  %p189_p2 = scmp.lt.s32.totalorder %s839_s14, 4 }
   0x5   : > { %s946_s15 = smov (%p26_p1, %s25_s15), 0  ;;  %p190_p3 = pnand %p676_p0, %p189_p2 }
   0x6   : > { %s230_s16 = smul.u32 (!%p190_p3), 3, %s831_s12  ;;  %p679_p6 = scmp.ne.s32.totalorder (!%p190_p3), %s831_s12, 0 }
   0x7   : > { %193 = sbr.rel (%p190_p3) target bundleno = 268 (0x10c), region = 32 }
   0x8   : > { %s240_s17 = smul.u32 (!%p190_p3), 48, %s831_s12  ;;  %p233_p4 = scmp.lt.s32.totalorder (!%p190_p3), %s230_s16, 8 }
   0xa   : > { %p241_p5 = scmp.lt.s32.totalorder (!%p190_p3), %s240_s17, 143 }
   0xc   : > { %s948_s16 = smov (!%p233_p4, %s230_s16), 8  ;;  %s950_s17 = smov (!%p241_p5, %s240_s17), 143 }
   0xd   : > { %s677_s18 = sshll.u32 %s948_s16, 2  ;;  %s678_s22 = sshll.u32 %s950_s17, 2 }
   0xe   : > { %s889_s21 = scalar_lea.vmem %s939_s0, %s677_s18  ;;  %s894_s25 = scalar_lea.vmem %s940_s1, %s678_s22 }
   0xf   : > { %263 = sbr.rel (%p679_p6) target bundleno = 22 (0x16), region = 36 }
  0x14   : > { %v841_v0 = vmov 0.0  }
  0x15   : > { %264 = vst [vmem:[#allocation2] sm:$0xff] %v841_v0 }
  0x16 PF: > { %v790_v1 = vld [vmem:[%s894_s25 + $0x78] sm:$0xff]   ;;  %v842_v2 = vmov 0.0   ;;  %vm843_vm0 = vmmov 0   ;;  %v793_v5 = vld [vmem:[%s894_s25 + $0x70] sm:$0xff]   ;;  %v796_v8 = vld [vmem:[%s894_s25 + $0x68] sm:$0xff]   ;;  %p707_p7 = scmp.ne.s32.totalorder %s831_s12, 2 }
  0x17   : > { %743 = vmatprep.subr.bf16.mxu1 %v842_v2  ;;  %v791_v3 = vld [vmem:[%s894_s25 + $0xb8] sm:$0xff]   ;;  %712 = vmatprep.subr.bf16.mxu0 %v790_v1  ;;  %v794_v6 = vld [vmem:[%s894_s25 + $0xb0] sm:$0xff]   ;;  %v797_v9 = vld [vmem:[%s894_s25 + $0xa8] sm:$0xff]  }
  0x18   : > { %v792_v4 = vld [vmem:[%s894_s25 + $0x38] sm:$0xff]   ;;  %759 = vmatprep.mubr.msk.bf16.mxu1 %vm843_vm0, %v842_v2  ;;  %744 = vmatpush3.bf16.msra.mxu1 %v791_v3  ;;  %v795_v7 = vld [vmem:[%s894_s25 + $0x30] sm:$0xff]   ;;  %v798_v10 = vld [vmem:[%s894_s25 + $0x28] sm:$0xff]  }
  0x19   : > { %713 = vmatpush3.bf16.msra.mxu0 %v792_v4  ;;  %745 = vmatprep.subr.bf16.mxu1 %v842_v2  ;;  %v799_v11 = vld [vmem:[%s894_s25 + $0x60] sm:$0xff]   ;;  %v802_v14 = vld [vmem:[%s894_s25 + $0x58] sm:$0xff]   ;;  %v805_v17 = vld [vmem:[%s894_s25 + $0x50] sm:$0xff]  }
  0x1a   : > { %714 = vmatprep.subr.bf16.mxu0 %v793_v5  ;;  %v800_v12 = vld [vmem:[%s894_s25 + $0xa0] sm:$0xff]   ;;  %v803_v15 = vld [vmem:[%s894_s25 + $0x98] sm:$0xff]   ;;  %v806_v18 = vld [vmem:[%s894_s25 + $0x90] sm:$0xff]  }
  0x1b   : > { %v801_v13 = vld [vmem:[%s894_s25 + $0x20] sm:$0xff]   ;;  %v804_v16 = vld [vmem:[%s894_s25 + $0x18] sm:$0xff]   ;;  %v807_v19 = vld [vmem:[%s894_s25 + $0x10] sm:$0xff]  }
  0x1c   : > { %746 = vmatpush3.bf16.msra.mxu1 %v794_v6  ;;  %v808_v20 = vld [vmem:[%s894_s25 + $0x48] sm:$0xff]   ;;  %v266_v23 = vld [vmem:[%s889_s21] sm:$0xff] }
  0x1d   : > { %715 = vmatpush3.bf16.msra.mxu0 %v795_v7  ;;  %747 = vmatprep.subr.bf16.mxu1 %v842_v2  ;;  %v809_v21 = vld [vmem:[%s894_s25 + $0x88] sm:$0xff]   ;;  %v811_v24 = vld [vmem:[%s894_s25 + $0x40] sm:$0xff]   ;;  %v681_v25 = vcombine.high %v266_v23, %v266_v23  ;;  %v680_v29 = vcombine.low %v266_v23, %v266_v23 }
  0x1e   : > { %716 = vmatprep.subr.bf16.mxu0 %v796_v8  ;;  %v810_v22 = vld [vmem:[%s894_s25 + $0x8] sm:$0xff]   ;;  %v812_v26 = vld [vmem:[%s894_s25 + $0x80] sm:$0xff]  }
  0x1f   : > { %503 = vmatprep.mubr.bf16.mxu0 %v681_v25  ;;  %v813_v27 = vld [vmem:[%s894_s25] sm:$0xff]   ;;  %v816_v28 = vld [vmem:[%s889_s21 + $0x8] ss:$0 sps:$4 sm:$0xff]  }
  0x20   : > { %748 = vmatpush3.bf16.msra.mxu1 %v797_v9  ;;  %v265_v36 = vld [vmem:[#allocation2] sm:$0xff] }
  0x21   : > { %717 = vmatpush3.bf16.msra.mxu0 %v798_v10  ;;  %749 = vmatprep.subr.bf16.mxu1 %v842_v2 }
  0x22   : > { %718 = vmatprep.subr.bf16.mxu0 %v799_v11 }
  0x24   : > { %750 = vmatpush3.bf16.msra.mxu1 %v800_v12 }
  0x25   : > { %719 = vmatpush3.bf16.msra.mxu0 %v801_v13  ;;  %751 = vmatprep.subr.bf16.mxu1 %v842_v2 }
  0x26   : > { %720 = vmatprep.subr.bf16.mxu0 %v802_v14 }
  0x28   : > { %752 = vmatpush3.bf16.msra.mxu1 %v803_v15 }
  0x29   : > { %721 = vmatpush3.bf16.msra.mxu0 %v804_v16  ;;  %753 = vmatprep.subr.bf16.mxu1 %v842_v2 }
  0x2a   : > { %722 = vmatprep.subr.bf16.mxu0 %v805_v17 }
  0x2c   : > { %754 = vmatpush3.bf16.msra.mxu1 %v806_v18 }
  0x2d   : > { %723 = vmatpush3.bf16.msra.mxu0 %v807_v19  ;;  %755 = vmatprep.subr.bf16.mxu1 %v842_v2 }
  0x2e   : > { %724 = vmatprep.subr.bf16.mxu0 %v808_v20 }
  0x30   : > { %756 = vmatpush3.bf16.msra.mxu1 %v809_v21 }
  0x31   : > { %725 = vmatpush3.bf16.msra.mxu0 %v810_v22  ;;  %757 = vmatprep.subr.bf16.mxu1 %v842_v2 }
  0x32   : > { %726 = vmatprep.subr.bf16.mxu0 %v811_v24 }
  0x34   : > { %758 = vmatpush3.bf16.msra.mxu1 %v812_v26 }
  0x35   : > { %727 = vmatpush3.bf16.msra.mxu0 %v813_v27 }
  0x37   : > { %760 = vmatmul.mubr.bf16.vlgmr.msra.gmra.mxu1 %v816_v28 }
  0x38   : > { %504 = vmatmul.mubr.bf16.vlgmr.msra.gmra.mxu0 %v680_v29 }
  0xf7   : > { %v545_v30 = vpop.f32.mrf.mxu1 }
  0xf8   : > { %v728_v31 = vpop.f32.mrf.mxu0 }
  0xf9   : > { %v761_v32 = vpop.f32.mrf.mxu1 }
  0xfa   : > { %v729_v33 = vpop.f32.mrf.mxu0 }
  0xfb   : > { %v730_v34 = vadd.f32 %v729_v33, %v728_v31  ;;  %v548_v35 = vpop.f32.mrf.mxu1 }
  0xfc   : > { %v731_v37 = vpop.f32.mrf.mxu0 }
  0xfd   : > { %v546_v38 = vadd.f32 %v730_v34, %v545_v30  ;;  %v762_v39 = vpop.f32.mrf.mxu1  ;;  %556 = sbr.rel (%p707_p7) target bundleno = 268 (0x10c), region = 40 }
  0xfe   : > { %v732_v40 = vpop.f32.mrf.mxu0 }
  0xff   : > { %v551_v41 = vadd.f32 %v546_v38, %v265_v36 }
 0x101   : > { %552 = vst [vmem:[#allocation2] sm:$0xff] %v551_v41 }
 0x102   : > { %v708_v43 = vld [vmem:[%s941_s2] ss:$0 sm:$0xff] }
 0x108   : > { %v557_v42 = vld [vmem:[#allocation2] sm:$0xff] }
 0x109   : > { %v565_v44 = vadd.f32 %v708_v43, %v557_v42 }
 0x10b   : > { %566 = vst [vmem:[%s942_s3] sm:$0xff] %v565_v44 }
 0x10c PF: > { %s13_s14 = sadd.s32 1, %s839_s14   ;;  %s943_s12 = smov %s835_s13 }
 0x10d   : > { %p10_p8 = scmp.ge.s32.totalorder %s13_s14, 5   ;;  %s944_s13 = smov %s946_s15 }
 0x10f   :  { %12 = sbr.rel (!%p10_p8) target bundleno = 2 (0x2), region = 76 }

// kernel: backbone_with_fpn_forward.20
= control target key start
LH: loop header
LB: loop body
LE: loop exit
PB: predicated region body
PF: predicated region fallthrough
CT: control target
= control target key end

     0   :  { %s370_s1 = inlined_call_operand.vmem [shape: bf16[128,128], index: 1, kind: input, shape index: {}]   ;;  %s371_s0 = inlined_call_operand.vmem [shape: bf16[32,128], index: 0, kind: input, shape index: {}]   ;;  %s372_s2 = inlined_call_operand.vmem [shape: f32[1,128], index: 2, kind: input, shape index: {}]   ;;  %s373_s3 = inlined_call_operand.vmem [shape: bf16[32,128], index: 3, kind: input, shape index: {}]   ;;  %s374_s4 = inlined_call_operand.vmem [shape: bf16[32,128], index: 4, kind: output, shape index: {}]  }
   0x1   :  { %v290_v0 = vld [vmem:[%s370_s1 + $0x38] sm:$0xff]   ;;  %v291_v1 = vld [vmem:[%s370_s1 + $0x30] sm:$0xff]   ;;  %v292_v2 = vld [vmem:[%s370_s1 + $0x28] sm:$0xff]  }
   0x2   :  { %270 = vmatprep.subr.bf16.mxu0 %v290_v0  ;;  %v293_v3 = vld [vmem:[%s370_s1 + $0x20] sm:$0xff]   ;;  %v294_v5 = vld [vmem:[%s370_s1 + $0x18] sm:$0xff]   ;;  %v295_v6 = vld [vmem:[%s370_s1 + $0x10] sm:$0xff]  }
   0x3   :  { %271 = vmatpush3.bf16.msra.mxu0 %v290_v0  ;;  %v298_v4 = vld [vmem:[%s371_s0] sm:$0xff]   ;;  %v296_v7 = vld [vmem:[%s370_s1 + $0x8] sm:$0xff]  }
   0x4   :  { %272 = vmatprep.subr.bf16.mxu0 %v291_v1  ;;  %286 = vmatprep.mubr.bf16.mxu0 %v298_v4  ;;  %v297_v8 = vld [vmem:[%s370_s1] sm:$0xff]   ;;  %v299_v9 = vld [vmem:[%s371_s0 + $0x8] sm:$0xff]  }
   0x5   :  { %v231_v11 = vld [vmem:[%s372_s2] ss:$0 sm:$0xff]  ;;  %v258_v12 = vld [vmem:[%s373_s3 + $0x8] sm:$0xff]  }
   0x6   :  { %v241_v14 = vld [vmem:[%s373_s3] sm:$0xff]   ;;  %v246_v16 = vunpack.c.l.bf16 %v258_v12  ;;  %v247_v17 = vunpack.c.h.bf16 %v258_v12 }
   0x7   :  { %273 = vmatpush3.bf16.msra.mxu0 %v291_v1  ;;  %v242_v20 = vunpack.c.l.bf16 %v241_v14  ;;  %v243_v22 = vunpack.c.h.bf16 %v241_v14 }
   0x8   :  { %274 = vmatprep.subr.bf16.mxu0 %v292_v2 }
   0xb   :  { %275 = vmatpush3.bf16.msra.mxu0 %v292_v2 }
   0xc   :  { %276 = vmatprep.subr.bf16.mxu0 %v293_v3 }
   0xf   :  { %277 = vmatpush3.bf16.msra.mxu0 %v293_v3 }
  0x10   :  { %278 = vmatprep.subr.bf16.mxu0 %v294_v5 }
  0x13   :  { %279 = vmatpush3.bf16.msra.mxu0 %v294_v5 }
  0x14   :  { %280 = vmatprep.subr.bf16.mxu0 %v295_v6 }
  0x17   :  { %281 = vmatpush3.bf16.msra.mxu0 %v295_v6 }
  0x18   :  { %282 = vmatprep.subr.bf16.mxu0 %v296_v7 }
  0x1b   :  { %283 = vmatpush3.bf16.msra.mxu0 %v296_v7 }
  0x1c   :  { %284 = vmatprep.subr.bf16.mxu0 %v297_v8 }
  0x1f   :  { %285 = vmatpush3.bf16.msra.mxu0 %v297_v8 }
  0x22   :  { %287 = vmatmul.mubr.bf16.vlgmr.msra.gmra.mxu0 %v299_v9 }
  0xe2   :  { %v288_v10 = vpop.f32.mrf.mxu0 }
  0xe3   :  { %v183_v15 = vadd.f32 %v288_v10, %v231_v11 }
  0xe4   :  { %v144_v13 = vpop.f32.mrf.mxu0 }
  0xe5   :  { %v181_v19 = vadd.f32 %v231_v11, %v144_v13  ;;  %v195_v24 = vadd.f32 %v246_v16, %v183_v15 }
  0xe6   :  { %v289_v18 = vpop.f32.mrf.mxu0 }
  0xe7   :  { %v184_v21 = vadd.f32 %v289_v18, %v231_v11  ;;  %v193_v27 = vadd.f32 %v242_v20, %v181_v19 }
  0xe8   :  { %v147_v23 = vpop.f32.mrf.mxu0 }
  0xe9   :  { %v196_v25 = vadd.f32 %v247_v17, %v184_v21  ;;  %v182_v26 = vadd.f32 %v231_v11, %v147_v23 }
  0xeb   :  { %v256_v28 = vpack.c.bf16 %v196_v25, %v195_v24  ;;  %v194_v29 = vadd.f32 %v243_v22, %v182_v26 }
  0xed   :  { %259 = vst [vmem:[%s374_s4 + $0x8] sm:$0xff] %v256_v28   ;;  %v251_v30 = vpack.c.bf16 %v194_v29, %v193_v27 }
  0xef   :  { %252 = vst [vmem:[%s374_s4] sm:$0xff] %v251_v30  }

// kernel: backbone_with_fpn_forward.23
= control target key start
LH: loop header
LB: loop body
LE: loop exit
PB: predicated region body
PF: predicated region fallthrough
CT: control target
= control target key end

     0   :  { %s1033_s12 = smov 0   ;;  %s1035_s13 = smov 0   ;;  %s1149_s0 = inlined_call_operand.vmem [shape: bf16[32,1152], index: 0, kind: input, shape index: {}]   ;;  %s1150_s1 = inlined_call_operand.vmem [shape: bf16[1152,128], index: 1, kind: input, shape index: {}]   ;;  %s1151_s2 = inlined_call_operand.vmem [shape: f32[1,128], index: 2, kind: input, shape index: {}]   ;;  %s1152_s3 = inlined_call_operand.vmem [shape: f32[32,128], index: 3, kind: output, shape index: {}]  }
   0x1   :  { %s1037_s14 = smov 0   ;;  %s1039_s15 = smov 0  }
   0x2   :  { %s1041_s16 = smov 0  }
   0x3 LB: > { %s25_s17 = sadd.s32 1, %s1006_s15  ;;  %p48_p1 = scmp.ne.s32.totalorder %s998_s13, %s994_s12  ;;  %s1010_s16 = sphi %s1041_s16, %s13_s16   ;;  %s1006_s15 = sphi %s1039_s15, %s1156_s15   ;;  %s1002_s14 = sphi %s1037_s14, %s1155_s14   ;;  %s998_s13 = sphi %s1035_s13, %s1154_s13   ;;  %s994_s12 = sphi %s1033_s12, %s1153_s12  }
   0x4   : > { %p26_p0 = scmp.ge.s32.totalorder %s25_s17, 3  ;;  %p49_p2 = scmp.eq.s32.totalorder %s1010_s16, 0 }
   0x5   : > { %s41_s19 = sadd.s32 1, %s998_s13  ;;  %p789_p5 = scmp.ge.s32.totalorder %s1010_s16, 3 }
   0x6   : > { %s1158_s17 = smov (%p26_p0, %s25_s17), 0  ;;  %p50_p3 = por %p49_p2, %p48_p1 }
   0x7   : > { %s37_s18 = ssub.s32 %s1006_s15, %s1158_s17  ;;  %162 = sbr.rel (%p789_p5) target bundleno = 21 (0x15), region = 20 }
   0x8   : > { %p39_p4 = scmp.eq.s32.totalorder %s37_s18, 0 }
   0xa   : > { %s1068_s20 = scalar_select %p39_p4, %s998_s13, %s41_s19  }
   0xc   : > { %165 = sbr.rel (!%p50_p3) target bundleno = 21 (0x15), region = 24  ;;  %s167_s21 = sand.u32 (%p50_p3), 1, %s998_s13  }
   0xd   : > { %s838_s22 = smul.u32 (%p50_p3), 12, %s1006_s15 }
   0xe   : > { %s897_s23 = smul.u32 (%p50_p3), 48, %s167_s21 }
   0xf   : > { %s175_s26 = scalar_lea.vmem (%p50_p3), %s1149_s0, %s838_s22 }
  0x10   : > { %v190_v0 = vld [vmem:[%s175_s26] sm:$0xff] (%p50_p3)  ;;  %v194_v2 = vld [vmem:[%s175_s26 + $0x48] sm:$0xff] (%p50_p3)  ;;  %s169_s27 = scalar_lea.vmem (%p50_p3), [#allocation3], %s897_s23  ;;  %v795_v6 = vld [vmem:[%s175_s26 + $0x50] sm:$0xf] (%p50_p3) }
  0x11   : > { %v192_v1 = vld [vmem:[%s175_s26 + $0x24] sm:$0xff]  ;;  %191 = vst [vmem:[%s169_s27] sm:$0xff] %v190_v0  ;;  %195 = vst [vmem:[%s169_s27 + $0x18] sm:$0xff] %v194_v2  ;;  %v196_v3 = vld [vmem:[%s175_s26 + $0x6c] sm:$0xff] }
  0x12   : > { %193 = vst [vmem:[%s169_s27 + $0xc] sm:$0xff] %v192_v1  ;;  %v791_v4 = vld [vmem:[%s175_s26 + $0x8] sm:$0xf]  ;;  %v793_v5 = vld [vmem:[%s175_s26 + $0x2c] sm:$0xf]  ;;  %197 = vst [vmem:[%s169_s27 + $0x24] sm:$0xff] %v196_v3 }
  0x13   : > { %792 = vst [vmem:[%s169_s27 + $0x8] sm:$0xf] %v791_v4  ;;  %794 = vst [vmem:[%s169_s27 + $0x14] sm:$0xf] %v793_v5  ;;  %v797_v7 = vld [vmem:[%s175_s26 + $0x74] sm:$0xf] }
  0x14   : > { %796 = vst [vmem:[%s169_s27 + $0x20] sm:$0xf] %v795_v6  ;;  %798 = vst [vmem:[%s169_s27 + $0x2c] sm:$0xf] %v797_v7 }
  0x15 PF: > { %p799_p6 = scmp.ge.s32.totalorder %s1010_s16, 1  ;;  %p230_p7 = scmp.lt.s32.totalorder %s1010_s16, 4 }
  0x17   : > { %p231_p8 = pnand %p799_p6, %p230_p7 }
  0x18   : > { %s237_s28 = sand.u32 (!%p231_p8), 1, %s994_s12   ;;  %s276_s29 = smul.u32 (!%p231_p8), 48, %s1002_s14 }
  0x19   : > { %234 = sbr.rel (%p231_p8) target bundleno = 295 (0x127), region = 54  ;;  %p801_p10 = scmp.ne.s32.totalorder (!%p231_p8), %s1002_s14, 0 }
  0x1a   : > { %s898_s30 = smul.u32 (!%p231_p8), 48, %s237_s28  ;;  %p277_p9 = scmp.lt.s32.totalorder (!%p231_p8), %s276_s29, 143 }
  0x1c   : > { %s1085_s8 = scalar_lea.vmem (!%p231_p8), [#allocation3], %s898_s30 }
  0x1e   : > { %s1160_s29 = smov (!%p277_p9, %s276_s29), 143  ;;  %301 = sbr.rel (%p801_p10) target bundleno = 38 (0x26), region = 62 }
  0x1f   : > { %s800_s4 = sshll.u32 %s1160_s29, 2 }
  0x20   : > { %s1083_s7 = scalar_lea.vmem %s1150_s1, %s800_s4 }
  0x23   : > { %v1012_v8 = vmov 0.0  }
  0x24   : > { %302 = vst [vmem:[#allocation2 + $0x10] sm:$0xff] %v1012_v8  ;;  %303 = vst [vmem:[#allocation2] sm:$0xff] %v1012_v8 }
  0x25   : > { %304 = vst [vmem:[#allocation2 + $0x18] sm:$0xff] %v1012_v8  ;;  %305 = vst [vmem:[#allocation2 + $0x8] sm:$0xff] %v1012_v8 }
  0x26 PF: > { %v940_v9 = vld [vmem:[%s1083_s7 + $0x78] sm:$0xff]   ;;  %v943_v12 = vld [vmem:[%s1083_s7 + $0x70] sm:$0xff]   ;;  %v946_v15 = vld [vmem:[%s1083_s7 + $0x68] sm:$0xff]   ;;  %p832_p11 = scmp.ne.s32.totalorder %s1002_s14, 2 }
  0x27   : > { %v941_v10 = vld [vmem:[%s1083_s7 + $0x38] sm:$0xff]   ;;  %839 = vmatprep.subr.bf16.mxu0 %v940_v9  ;;  %v944_v13 = vld [vmem:[%s1083_s7 + $0x30] sm:$0xff]   ;;  %v947_v16 = vld [vmem:[%s1083_s7 + $0x28] sm:$0xff]  }
  0x28   : > { %v942_v11 = vld [vmem:[%s1083_s7 + $0xb8] sm:$0xff]   ;;  %840 = vmatpush3.bf16.msra.mxu0 %v941_v10  ;;  %v945_v14 = vld [vmem:[%s1083_s7 + $0xb0] sm:$0xff]   ;;  %v948_v17 = vld [vmem:[%s1083_s7 + $0xa8] sm:$0xff]  }
  0x29   : > { %877 = vmatprep.subr.bf16.mxu1 %v942_v11  ;;  %841 = vmatprep.subr.bf16.mxu0 %v943_v12  ;;  %v949_v18 = vld [vmem:[%s1083_s7 + $0x60] sm:$0xff]   ;;  %v952_v21 = vld [vmem:[%s1083_s7 + $0x58] sm:$0xff]   ;;  %v955_v24 = vld [vmem:[%s1083_s7 + $0x50] sm:$0xff]  }
  0x2a   : > { %878 = vmatpush3.bf16.msra.mxu1 %v942_v11  ;;  %v950_v19 = vld [vmem:[%s1083_s7 + $0x20] sm:$0xff]   ;;  %v954_v22 = vld [vmem:[%s1083_s7 + $0x98] sm:$0xff]   ;;  %v957_v25 = vld [vmem:[%s1083_s7 + $0x90] sm:$0xff]  }
  0x2b   : > { %879 = vmatprep.subr.bf16.mxu1 %v945_v14  ;;  %v951_v20 = vld [vmem:[%s1083_s7 + $0xa0] sm:$0xff]   ;;  %v953_v23 = vld [vmem:[%s1083_s7 + $0x18] sm:$0xff]   ;;  %v956_v26 = vld [vmem:[%s1083_s7 + $0x10] sm:$0xff]  }
  0x2c   : > { %842 = vmatpush3.bf16.msra.mxu0 %v944_v13  ;;  %v958_v27 = vld [vmem:[%s1083_s7 + $0x48] sm:$0xff]   ;;  %v961_v30 = vld [vmem:[%s1083_s7 + $0x40] sm:$0xff]   ;;  %v306_v44 = vld [vmem:[#allocation2 + $0x10] sm:$0xff] }
  0x2d   : > { %843 = vmatprep.subr.bf16.mxu0 %v946_v15  ;;  %v959_v28 = vld [vmem:[%s1083_s7 + $0x8] sm:$0xff]   ;;  %v963_v31 = vld [vmem:[%s1083_s7 + $0x80] sm:$0xff]   ;;  %v308_v58 = vld [vmem:[#allocation2 + $0x18] sm:$0xff] }
  0x2e   : > { %880 = vmatpush3.bf16.msra.mxu1 %v945_v14  ;;  %v960_v29 = vld [vmem:[%s1083_s7 + $0x88] sm:$0xff]   ;;  %v966_v32 = vld [vmem:[%s1085_s8 + $0x4] ss:$12 sps:$4 sm:$0xff]  }
  0x2f   : > { %881 = vmatprep.subr.bf16.mxu1 %v948_v17  ;;  %v967_v33 = vld [vmem:[%s1085_s8 + $0x8] ss:$12 sps:$4 sm:$0xff]   ;;  %574 = vmatprep.mubr.bf16.mxu0 %v966_v32  ;;  %v964_v35 = vld [vmem:[%s1085_s8] ss:$12 sps:$4 sm:$0xff]   ;;  %v971_v38 = vld [vmem:[%s1085_s8 + $0x18] ss:$12 sps:$4 sm:$0xff]  }
  0x30   : > { %844 = vmatpush3.bf16.msra.mxu0 %v947_v16  ;;  %v962_v34 = vld [vmem:[%s1083_s7] sm:$0xff]   ;;  %893 = vmatprep.mubr.bf16.mxu1 %v967_v33  ;;  %v969_v36 = vld [vmem:[%s1085_s8 + $0x1c] ss:$12 sps:$4 sm:$0xff]  }
  0x31   : > { %845 = vmatprep.subr.bf16.mxu0 %v949_v18  ;;  %v968_v37 = vld [vmem:[%s1085_s8 + $0x20] ss:$12 sps:$4 sm:$0xff]  }
  0x32   : > { %882 = vmatpush3.bf16.msra.mxu1 %v948_v17  ;;  %v307_v52 = vld [vmem:[#allocation2] sm:$0xff]  ;;  %v309_v0 = vld [vmem:[#allocation2 + $0x8] sm:$0xff] }
  0x33   : > { %883 = vmatprep.subr.bf16.mxu1 %v951_v20 }
  0x34   : > { %846 = vmatpush3.bf16.msra.mxu0 %v950_v19 }
  0x35   : > { %847 = vmatprep.subr.bf16.mxu0 %v952_v21 }
  0x36   : > { %884 = vmatpush3.bf16.msra.mxu1 %v951_v20 }
  0x37   : > { %885 = vmatprep.subr.bf16.mxu1 %v954_v22 }
  0x38   : > { %848 = vmatpush3.bf16.msra.mxu0 %v953_v23 }
  0x39   : > { %849 = vmatprep.subr.bf16.mxu0 %v955_v24 }
  0x3a   : > { %886 = vmatpush3.bf16.msra.mxu1 %v954_v22 }
  0x3b   : > { %887 = vmatprep.subr.bf16.mxu1 %v957_v25 }
  0x3c   : > { %850 = vmatpush3.bf16.msra.mxu0 %v956_v26 }
  0x3d   : > { %851 = vmatprep.subr.bf16.mxu0 %v958_v27 }
  0x3e   : > { %888 = vmatpush3.bf16.msra.mxu1 %v957_v25 }
  0x3f   : > { %889 = vmatprep.subr.bf16.mxu1 %v960_v29 }
  0x40   : > { %852 = vmatpush3.bf16.msra.mxu0 %v959_v28 }
  0x41   : > { %853 = vmatprep.subr.bf16.mxu0 %v961_v30 }
  0x42   : > { %890 = vmatpush3.bf16.msra.mxu1 %v960_v29 }
  0x43   : > { %891 = vmatprep.subr.bf16.mxu1 %v963_v31 }
  0x44   : > { %854 = vmatpush3.bf16.msra.mxu0 %v962_v34 }
  0x46   : > { %892 = vmatpush3.bf16.msra.mxu1 %v963_v31 }
  0x47   : > { %575 = vmatmul.mubr.bf16.vlgmr.msra.gmra.mxu0 %v964_v35 }
  0x48   : > { %582 = vmatprep.mubr.bf16.mxu0 %v969_v36 }
  0x49   : > { %894 = vmatmul.mubr.bf16.vlgmr.msra.gmra.mxu1 %v968_v37 }
  0x4f   : > { %583 = vmatmul.mubr.bf16.gmra.mxu0 %v971_v38 }
 0x107   : > { %v855_v39 = vpop.f32.mrf.mxu0 }
 0x109   : > { %v856_v40 = vpop.f32.mrf.mxu0  ;;  %v895_v41 = vpop.f32.mrf.mxu1 }
 0x10a   : > { %v857_v42 = vadd.f32 %v856_v40, %v855_v39 }
 0x10b   : > { %v858_v43 = vpop.f32.mrf.mxu0  ;;  %v625_v45 = vpop.f32.mrf.mxu1 }
 0x10c   : > { %v626_v46 = vadd.f32 %v857_v42, %v625_v45 }
 0x10d   : > { %v859_v47 = vpop.f32.mrf.mxu0  ;;  %v896_v48 = vpop.f32.mrf.mxu1 }
 0x10e   : > { %v640_v49 = vadd.f32 %v626_v46, %v306_v44  ;;  %v860_v50 = vadd.f32 %v859_v47, %v858_v43 }
 0x10f   : > { %v861_v51 = vpop.f32.mrf.mxu0  ;;  %v628_v53 = vpop.f32.mrf.mxu1 }
 0x110   : > { %644 = vst [vmem:[#allocation2 + $0x10] sm:$0xff] %v640_v49  ;;  %v629_v54 = vadd.f32 %v860_v50, %v628_v53 }
 0x111   : > { %v862_v55 = vpop.f32.mrf.mxu0 }
 0x112   : > { %v641_v56 = vadd.f32 %v629_v54, %v307_v52  ;;  %v863_v57 = vadd.f32 %v862_v55, %v861_v51 }
 0x113   : > { %v864_v59 = vpop.f32.mrf.mxu0 }
 0x114   : > { %645 = vst [vmem:[#allocation2] sm:$0xff] %v641_v56  ;;  %v634_v60 = vadd.f32 %v895_v41, %v863_v57 }
 0x115   : > { %v865_v61 = vpop.f32.mrf.mxu0 }
 0x116   : > { %v642_v62 = vadd.f32 %v634_v60, %v308_v58  ;;  %v866_v63 = vadd.f32 %v865_v61, %v864_v59 }
 0x118   : > { %646 = vst [vmem:[#allocation2 + $0x18] sm:$0xff] %v642_v62  ;;  %v637_v1 = vadd.f32 %v896_v48, %v866_v63  ;;  %651 = sbr.rel (%p832_p11) target bundleno = 295 (0x127), region = 66 }
 0x11a   : > { %v643_v2 = vadd.f32 %v637_v1, %v309_v0 }
 0x11c   : > { %647 = vst [vmem:[#allocation2 + $0x8] sm:$0xff] %v643_v2 }
 0x11d   : > { %v652_v3 = vld [vmem:[#allocation2 + $0x10] sm:$0xff]  ;;  %v833_v4 = vld [vmem:[%s1151_s2] ss:$0 sm:$0xff] }
 0x11e   : > { %v653_v5 = vld [vmem:[#allocation2] sm:$0xff]  ;;  %v663_v6 = vadd.f32 %v833_v4, %v652_v3 }
 0x11f   : > { %v664_v7 = vadd.f32 %v833_v4, %v653_v5  ;;  %v654_v8 = vld [vmem:[#allocation2 + $0x18] sm:$0xff] }
 0x120   : > { %v665_v10 = vadd.f32 %v833_v4, %v654_v8  ;;  %667 = vst [vmem:[%s1152_s3] sm:$0xff] %v663_v6 }
 0x121   : > { %668 = vst [vmem:[%s1152_s3 + $0x8] sm:$0xff] %v664_v7 }
 0x122   : > { %669 = vst [vmem:[%s1152_s3 + $0x10] sm:$0xff] %v665_v10 }
 0x123   : > { %v655_v9 = vld [vmem:[#allocation2 + $0x8] sm:$0xff] }
 0x124   : > { %v666_v11 = vadd.f32 %v833_v4, %v655_v9 }
 0x126   : > { %670 = vst [vmem:[%s1152_s3 + $0x18] sm:$0xff] %v666_v11 }
 0x127 PF: > { %s13_s16 = sadd.s32 1, %s1010_s16   ;;  %s1153_s12 = smov %s998_s13 }
 0x128   : > { %p10_p12 = scmp.ge.s32.totalorder %s13_s16, 5   ;;  %s1154_s13 = smov %s1068_s20 }
 0x129   : > { %s1155_s14 = smov %s1006_s15  ;;  %s1156_s15 = smov %s1158_s17 }
 0x12a   :  { %12 = sbr.rel (!%p10_p12) target bundleno = 3 (0x3), region = 113 }

// kernel: backbone_with_fpn_forward.21
= control target key start
LH: loop header
LB: loop body
LE: loop exit
PB: predicated region body
PF: predicated region fallthrough
CT: control target
= control target key end

     0   :  { %s842_s1 = inlined_call_operand.vmem [shape: bf16[128,128], index: 1, kind: input, shape index: {}]   ;;  %s843_s0 = inlined_call_operand.vmem [shape: bf16[128,128], index: 0, kind: input, shape index: {}]   ;;  %s844_s2 = inlined_call_operand.vmem [shape: f32[1,128], index: 2, kind: input, shape index: {}]   ;;  %s845_s3 = inlined_call_operand.vmem [shape: bf16[128,128], index: 3, kind: input, shape index: {}]   ;;  %s846_s4 = inlined_call_operand.vmem [shape: bf16[128,128], index: 4, kind: output, shape index: {}]  }
   0x1   :  { %v684_v0 = vld [vmem:[%s842_s1 + $0x38] sm:$0xff]   ;;  %v685_v1 = vld [vmem:[%s842_s1 + $0x30] sm:$0xff]   ;;  %v686_v2 = vld [vmem:[%s842_s1 + $0x28] sm:$0xff]  }
   0x2   :  { %636 = vmatprep.subr.bf16.mxu0 %v684_v0  ;;  %668 = vmatprep.subr.bf16.mxu1 %v684_v0  ;;  %v687_v3 = vld [vmem:[%s842_s1 + $0x20] sm:$0xff]   ;;  %v688_v6 = vld [vmem:[%s842_s1 + $0x18] sm:$0xff]   ;;  %v689_v7 = vld [vmem:[%s842_s1 + $0x10] sm:$0xff]  }
   0x3   :  { %637 = vmatpush3.bf16.msra.mxu0 %v684_v0  ;;  %676 = vmatpush3.bf16.msra.mxu1 %v684_v0  ;;  %v692_v4 = vld [vmem:[%s843_s0] sm:$0xff]   ;;  %v690_v8 = vld [vmem:[%s842_s1 + $0x8] sm:$0xff]   ;;  %v696_v12 = vld [vmem:[%s843_s0 + $0x10] sm:$0xff]  }
   0x4   :  { %638 = vmatprep.subr.bf16.mxu0 %v685_v1  ;;  %669 = vmatprep.subr.bf16.mxu1 %v685_v1  ;;  %v693_v5 = vld [vmem:[%s843_s0 + $0x20] sm:$0xff]   ;;  %v694_v10 = vld [vmem:[%s843_s0 + $0x8] sm:$0xff]   ;;  %v697_v13 = vld [vmem:[%s843_s0 + $0x30] sm:$0xff]  }
   0x5   :  { %652 = vmatprep.mubr.bf16.mxu0 %v692_v4  ;;  %660 = vmatprep.mubr.bf16.mxu1 %v693_v5  ;;  %v691_v9 = vld [vmem:[%s842_s1] sm:$0xff]   ;;  %v695_v11 = vld [vmem:[%s843_s0 + $0x28] sm:$0xff]   ;;  %v698_v14 = vld [vmem:[%s843_s0 + $0x18] sm:$0xff]  }
   0x6   :  { %v699_v15 = vld [vmem:[%s843_s0 + $0x38] sm:$0xff]   ;;  %v776_v16 = vld [vmem:[%s844_s2] ss:$0 sm:$0xff]  ;;  %v606_v17 = vld [vmem:[%s845_s3 + $0x8] sm:$0xff]  }
   0x7   :  { %639 = vmatpush3.bf16.msra.mxu0 %v685_v1  ;;  %677 = vmatpush3.bf16.msra.mxu1 %v685_v1  ;;  %v610_v18 = vld [vmem:[%s845_s3 + $0x28] sm:$0xff]   ;;  %v535_v21 = vld [vmem:[%s845_s3] sm:$0xff]   ;;  %v540_v24 = vunpack.c.l.bf16 %v606_v17  ;;  %v541_v29 = vunpack.c.h.bf16 %v606_v17  ;;  %v608_v49 = vld [vmem:[%s845_s3 + $0x18] sm:$0xff]  }
   0x8   :  { %640 = vmatprep.subr.bf16.mxu0 %v686_v2  ;;  %670 = vmatprep.subr.bf16.mxu1 %v686_v2  ;;  %v609_v22 = vld [vmem:[%s845_s3 + $0x20] sm:$0xff]   ;;  %v556_v26 = vunpack.c.l.bf16 %v610_v18  ;;  %v557_v30 = vunpack.c.h.bf16 %v610_v18  ;;  %v536_v32 = vunpack.c.l.bf16 %v535_v21  ;;  %v537_v39 = vunpack.c.h.bf16 %v535_v21  ;;  %v612_v50 = vld [vmem:[%s845_s3 + $0x38] sm:$0xff]   ;;  %v607_v59 = vld [vmem:[%s845_s3 + $0x10] sm:$0xff]  }
   0x9   :  { %v552_v34 = vunpack.c.l.bf16 %v609_v22  ;;  %v553_v40 = vunpack.c.h.bf16 %v609_v22  ;;  %v611_v60 = vld [vmem:[%s845_s3 + $0x30] sm:$0xff]   ;;  %v548_v62 = vunpack.c.l.bf16 %v608_v49  ;;  %v564_v0 = vunpack.c.l.bf16 %v612_v50 }
   0xa   :  { %v549_v5 = vunpack.c.h.bf16 %v608_v49  ;;  %v561_v17 = vunpack.c.h.bf16 %v611_v60 }
   0xb   :  { %641 = vmatpush3.bf16.msra.mxu0 %v686_v2  ;;  %678 = vmatpush3.bf16.msra.mxu1 %v686_v2 }
   0xc   :  { %642 = vmatprep.subr.bf16.mxu0 %v687_v3  ;;  %671 = vmatprep.subr.bf16.mxu1 %v687_v3 }
   0xf   :  { %643 = vmatpush3.bf16.msra.mxu0 %v687_v3  ;;  %679 = vmatpush3.bf16.msra.mxu1 %v687_v3 }
  0x10   :  { %644 = vmatprep.subr.bf16.mxu0 %v688_v6  ;;  %672 = vmatprep.subr.bf16.mxu1 %v688_v6 }
  0x13   :  { %645 = vmatpush3.bf16.msra.mxu0 %v688_v6  ;;  %680 = vmatpush3.bf16.msra.mxu1 %v688_v6  ;;  %v565_v6 = vunpack.c.h.bf16 %v612_v50 }
  0x14   :  { %646 = vmatprep.subr.bf16.mxu0 %v689_v7  ;;  %673 = vmatprep.subr.bf16.mxu1 %v689_v7 }
  0x17   :  { %647 = vmatpush3.bf16.msra.mxu0 %v689_v7  ;;  %681 = vmatpush3.bf16.msra.mxu1 %v689_v7 }
  0x18   :  { %648 = vmatprep.subr.bf16.mxu0 %v690_v8  ;;  %674 = vmatprep.subr.bf16.mxu1 %v690_v8 }
  0x1b   :  { %649 = vmatpush3.bf16.msra.mxu0 %v690_v8  ;;  %682 = vmatpush3.bf16.msra.mxu1 %v690_v8  ;;  %v544_v8 = vunpack.c.l.bf16 %v607_v59 }
  0x1c   :  { %650 = vmatprep.subr.bf16.mxu0 %v691_v9  ;;  %675 = vmatprep.subr.bf16.mxu1 %v691_v9 }
  0x1f   :  { %651 = vmatpush3.bf16.msra.mxu0 %v691_v9  ;;  %683 = vmatpush3.bf16.msra.mxu1 %v691_v9 }
  0x22   :  { %653 = vmatmul.mubr.bf16.vlgmr.msra.gmra.mxu0 %v694_v10  ;;  %661 = vmatmul.mubr.bf16.vlgmr.msra.gmra.mxu1 %v695_v11  ;;  %v560_v10 = vunpack.c.l.bf16 %v611_v60 }
  0x23   :  { %656 = vmatprep.mubr.bf16.mxu0 %v696_v12  ;;  %664 = vmatprep.mubr.bf16.mxu1 %v697_v13 }
  0x2a   :  { %657 = vmatmul.mubr.bf16.gmra.mxu0 %v698_v14  ;;  %665 = vmatmul.mubr.bf16.gmra.mxu1 %v699_v15  ;;  %v545_v15 = vunpack.c.h.bf16 %v607_v59 }
  0xe2   :  { %v654_v19 = vpop.f32.mrf.mxu0  ;;  %v662_v20 = vpop.f32.mrf.mxu1 }
  0xe3   :  { %v339_v23 = vadd.f32 %v654_v19, %v776_v16  ;;  %v347_v25 = vadd.f32 %v662_v20, %v776_v16 }
  0xe4   :  { %v216_v27 = vpop.f32.mrf.mxu0  ;;  %v248_v28 = vpop.f32.mrf.mxu1 }
  0xe5   :  { %v337_v31 = vadd.f32 %v776_v16, %v216_v27  ;;  %v345_v33 = vadd.f32 %v776_v16, %v248_v28  ;;  %v387_v41 = vadd.f32 %v540_v24, %v339_v23  ;;  %v395_v42 = vadd.f32 %v556_v26, %v347_v25 }
  0xe6   :  { %v655_v35 = vpop.f32.mrf.mxu0  ;;  %v663_v36 = vpop.f32.mrf.mxu1 }
  0xe7   :  { %v340_v37 = vadd.f32 %v655_v35, %v776_v16  ;;  %v348_v38 = vadd.f32 %v663_v36, %v776_v16  ;;  %v385_v51 = vadd.f32 %v536_v32, %v337_v31  ;;  %v393_v52 = vadd.f32 %v552_v34, %v345_v33 }
  0xe8   :  { %v219_v43 = vpop.f32.mrf.mxu0  ;;  %v251_v44 = vpop.f32.mrf.mxu1 }
  0xe9   :  { %v388_v45 = vadd.f32 %v541_v29, %v340_v37  ;;  %v396_v46 = vadd.f32 %v557_v30, %v348_v38  ;;  %v338_v47 = vadd.f32 %v776_v16, %v219_v43  ;;  %v346_v48 = vadd.f32 %v776_v16, %v251_v44 }
  0xea   :  { %v658_v53 = vpop.f32.mrf.mxu0  ;;  %v666_v54 = vpop.f32.mrf.mxu1 }
  0xeb   :  { %v574_v55 = vpack.c.bf16 %v388_v45, %v387_v41  ;;  %v594_v56 = vpack.c.bf16 %v396_v46, %v395_v42  ;;  %v386_v57 = vadd.f32 %v537_v39, %v338_v47  ;;  %v394_v58 = vadd.f32 %v553_v40, %v346_v48 }
  0xec   :  { %v343_v61 = vadd.f32 %v658_v53, %v776_v16  ;;  %v351_v63 = vadd.f32 %v666_v54, %v776_v16  ;;  %v232_v1 = vpop.f32.mrf.mxu0  ;;  %v264_v2 = vpop.f32.mrf.mxu1 }
  0xed   :  { %613 = vst [vmem:[%s846_s4 + $0x8] sm:$0xff] %v574_v55   ;;  %617 = vst [vmem:[%s846_s4 + $0x28] sm:$0xff] %v594_v56   ;;  %v569_v3 = vpack.c.bf16 %v386_v57, %v385_v51  ;;  %v589_v4 = vpack.c.bf16 %v394_v58, %v393_v52  ;;  %v341_v7 = vadd.f32 %v776_v16, %v232_v1 }
  0xee   :  { %v349_v9 = vadd.f32 %v776_v16, %v264_v2  ;;  %v659_v11 = vpop.f32.mrf.mxu0  ;;  %v667_v12 = vpop.f32.mrf.mxu1  ;;  %v391_v18 = vadd.f32 %v548_v62, %v343_v61  ;;  %v399_v19 = vadd.f32 %v564_v0, %v351_v63 }
  0xef   :  { %570 = vst [vmem:[%s846_s4] sm:$0xff] %v569_v3   ;;  %616 = vst [vmem:[%s846_s4 + $0x20] sm:$0xff] %v589_v4   ;;  %v344_v13 = vadd.f32 %v659_v11, %v776_v16  ;;  %v352_v14 = vadd.f32 %v667_v12, %v776_v16  ;;  %v389_v26 = vadd.f32 %v544_v8, %v341_v7 }
  0xf0   :  { %v235_v20 = vpop.f32.mrf.mxu0  ;;  %v267_v21 = vpop.f32.mrf.mxu1  ;;  %v397_v27 = vadd.f32 %v560_v10, %v349_v9 }
  0xf1   :  { %v392_v22 = vadd.f32 %v549_v5, %v344_v13  ;;  %v400_v23 = vadd.f32 %v565_v6, %v352_v14  ;;  %v342_v24 = vadd.f32 %v776_v16, %v235_v20  ;;  %v350_v25 = vadd.f32 %v776_v16, %v267_v21 }
  0xf3   :  { %v584_v28 = vpack.c.bf16 %v392_v22, %v391_v18  ;;  %v604_v29 = vpack.c.bf16 %v400_v23, %v399_v19  ;;  %v390_v30 = vadd.f32 %v545_v15, %v342_v24  ;;  %v398_v31 = vadd.f32 %v561_v17, %v350_v25 }
  0xf5   :  { %615 = vst [vmem:[%s846_s4 + $0x18] sm:$0xff] %v584_v28   ;;  %619 = vst [vmem:[%s846_s4 + $0x38] sm:$0xff] %v604_v29   ;;  %v579_v32 = vpack.c.bf16 %v390_v30, %v389_v26  ;;  %v599_v33 = vpack.c.bf16 %v398_v31, %v397_v27 }
  0xf7   :  { %614 = vst [vmem:[%s846_s4 + $0x10] sm:$0xff] %v579_v32   ;;  %618 = vst [vmem:[%s846_s4 + $0x30] sm:$0xff] %v599_v33  }

// kernel: backbone_with_fpn_forward.25
= control target key start
LH: loop header
LB: loop body
LE: loop exit
PB: predicated region body
PF: predicated region fallthrough
CT: control target
= control target key end

     0   :  { %s869_s12 = smov 0   ;;  %s871_s13 = smov 0   ;;  %s948_s0 = inlined_call_operand.vmem [shape: bf16[2,1152], index: 0, kind: input, shape index: {}]   ;;  %s949_s1 = inlined_call_operand.vmem [shape: bf16[1152,128], index: 1, kind: input, shape index: {}]   ;;  %s950_s2 = inlined_call_operand.vmem [shape: f32[1,128], index: 2, kind: input, shape index: {}]   ;;  %s951_s3 = inlined_call_operand.vmem [shape: f32[2,128], index: 3, kind: output, shape index: {}]  }
   0x1   :  { %s873_s14 = smov 0  }
   0x2 LB: > { %s25_s15 = sadd.s32 1, %s839_s13  ;;  %p685_p0 = scmp.ge.s32.totalorder %s843_s14, 1  ;;  %s843_s14 = sphi %s873_s14, %s13_s14   ;;  %s839_s13 = sphi %s871_s13, %s953_s13   ;;  %s835_s12 = sphi %s869_s12, %s952_s12  }
   0x3   : > { %p26_p1 = scmp.ge.s32.totalorder %s25_s15, 3  ;;  %p188_p2 = scmp.lt.s32.totalorder %s843_s14, 4 }
   0x5   : > { %s955_s15 = smov (%p26_p1, %s25_s15), 0  ;;  %p189_p3 = pnand %p685_p0, %p188_p2 }
   0x6   : > { %s228_s16 = smul.u32 (!%p189_p3), 3, %s835_s12  ;;  %p687_p6 = scmp.ne.s32.totalorder (!%p189_p3), %s835_s12, 0 }
   0x7   : > { %192 = sbr.rel (%p189_p3) target bundleno = 267 (0x10b), region = 32 }
   0x8   : > { %s237_s17 = smul.u32 (!%p189_p3), 48, %s835_s12  ;;  %p231_p4 = scmp.lt.s32.totalorder (!%p189_p3), %s228_s16, 8 }
   0xa   : > { %p238_p5 = scmp.lt.s32.totalorder (!%p189_p3), %s237_s17, 143 }
   0xc   : > { %s957_s16 = smov (!%p231_p4, %s228_s16), 8  ;;  %s959_s17 = smov (!%p238_p5, %s237_s17), 143 }
   0xd   : > { %s235_s20 = scalar_lea.vmem %s948_s0, %s957_s16  ;;  %s686_s21 = sshll.u32 %s959_s17, 2 }
   0xe   : > { %s900_s24 = scalar_lea.vmem %s949_s1, %s686_s21  ;;  %260 = sbr.rel (%p687_p6) target bundleno = 21 (0x15), region = 36 }
  0x13   : > { %v845_v0 = vmov 0.0  }
  0x14   : > { %261 = vst [vmem:[#allocation2] sm:$0x3] %v845_v0 }
  0x15 PF: > { %v797_v1 = vld [vmem:[%s900_s24 + $0x78] sm:$0xff]   ;;  %v846_v2 = vmov 0.0   ;;  %vm847_vm0 = vmmov 0   ;;  %v800_v5 = vld [vmem:[%s900_s24 + $0x70] sm:$0xff]   ;;  %v803_v8 = vld [vmem:[%s900_s24 + $0x68] sm:$0xff]   ;;  %v324_v21 = vlaneseq  ;;  %p713_p7 = scmp.ne.s32.totalorder %s835_s12, 2 }
  0x16   : > { %749 = vmatprep.subr.bf16.mxu1 %v846_v2  ;;  %v798_v3 = vld [vmem:[%s900_s24 + $0xb8] sm:$0xff]   ;;  %718 = vmatprep.subr.bf16.mxu0 %v797_v1  ;;  %v801_v6 = vld [vmem:[%s900_s24 + $0xb0] sm:$0xff]   ;;  %v804_v9 = vld [vmem:[%s900_s24 + $0xa8] sm:$0xff]   ;;  %v848_v26 = vmov 1966171168  }
  0x17   : > { %v799_v4 = vld [vmem:[%s900_s24 + $0x38] sm:$0xff]   ;;  %765 = vmatprep.mubr.msk.bf16.mxu1 %vm847_vm0, %v846_v2  ;;  %750 = vmatpush3.bf16.msra.mxu1 %v798_v3  ;;  %v802_v7 = vld [vmem:[%s900_s24 + $0x30] sm:$0xff]   ;;  %v805_v10 = vld [vmem:[%s900_s24 + $0x28] sm:$0xff]   ;;  %v322_v27 = vunpack.c.l.s4 %v848_v26  ;;  %v325_v28 = vshrl.u32 %v324_v21, 7 }
  0x18   : > { %719 = vmatpush3.bf16.msra.mxu0 %v799_v4  ;;  %751 = vmatprep.subr.bf16.mxu1 %v846_v2  ;;  %v806_v11 = vld [vmem:[%s900_s24 + $0x60] sm:$0xff]   ;;  %v809_v14 = vld [vmem:[%s900_s24 + $0x58] sm:$0xff]   ;;  %v812_v17 = vld [vmem:[%s900_s24 + $0x50] sm:$0xff]  }
  0x19   : > { %720 = vmatprep.subr.bf16.mxu0 %v800_v5  ;;  %v807_v12 = vld [vmem:[%s900_s24 + $0xa0] sm:$0xff]   ;;  %v810_v15 = vld [vmem:[%s900_s24 + $0x98] sm:$0xff]   ;;  %v813_v18 = vld [vmem:[%s900_s24 + $0x90] sm:$0xff]   ;;  %v323_v31 = vunpack.c.0.s8 %v322_v27 }
  0x1a   : > { %v808_v13 = vld [vmem:[%s900_s24 + $0x20] sm:$0xff]   ;;  %v811_v16 = vld [vmem:[%s900_s24 + $0x18] sm:$0xff]   ;;  %v814_v19 = vld [vmem:[%s900_s24 + $0x10] sm:$0xff]  }
  0x1b   : > { %752 = vmatpush3.bf16.msra.mxu1 %v801_v6  ;;  %v815_v20 = vld [vmem:[%s900_s24 + $0x48] sm:$0xff]   ;;  %v688_v24 = vld.sshfl [vmem:[%s235_s20] sm:$0x13 pattern:$0x75316420]  ;;  %v326_v33 = vsub.s32 %v323_v31, %v325_v28 }
  0x1c   : > { %721 = vmatpush3.bf16.msra.mxu0 %v802_v7  ;;  %753 = vmatprep.subr.bf16.mxu1 %v846_v2  ;;  %v816_v22 = vld [vmem:[%s900_s24 + $0x88] sm:$0xff]   ;;  %v818_v25 = vld [vmem:[%s900_s24 + $0x40] sm:$0xff]   ;;  %v320_v30 = vcombine.high %v688_v24, %v688_v24 }
  0x1d   : > { %722 = vmatprep.subr.bf16.mxu0 %v803_v8  ;;  %v817_v23 = vld [vmem:[%s900_s24 + $0x8] sm:$0xff]   ;;  %v819_v29 = vld [vmem:[%s900_s24 + $0x80] sm:$0xff]   ;;  %v327_v34 = vrot.slane %v688_v24, %v326_v33 }
  0x1e   : > { %v820_v32 = vld [vmem:[%s900_s24] sm:$0xff]   ;;  %v334_v35 = vrot.slane %v320_v30, %v326_v33 }
  0x1f   : > { %754 = vmatpush3.bf16.msra.mxu1 %v804_v9  ;;  %v335_v36 = vcombine.high %v327_v34, %v327_v34  ;;  %v262_v42 = vld [vmem:[#allocation2] sm:$0x3] }
  0x20   : > { %723 = vmatpush3.bf16.msra.mxu0 %v805_v10  ;;  %755 = vmatprep.subr.bf16.mxu1 %v846_v2 }
  0x21   : > { %724 = vmatprep.subr.bf16.mxu0 %v806_v11  ;;  %515 = vmatprep.mubr.bf16.mxu0 %v334_v35 }
  0x23   : > { %756 = vmatpush3.bf16.msra.mxu1 %v807_v12 }
  0x24   : > { %725 = vmatpush3.bf16.msra.mxu0 %v808_v13  ;;  %757 = vmatprep.subr.bf16.mxu1 %v846_v2 }
  0x25   : > { %726 = vmatprep.subr.bf16.mxu0 %v809_v14 }
  0x27   : > { %758 = vmatpush3.bf16.msra.mxu1 %v810_v15 }
  0x28   : > { %727 = vmatpush3.bf16.msra.mxu0 %v811_v16  ;;  %759 = vmatprep.subr.bf16.mxu1 %v846_v2 }
  0x29   : > { %728 = vmatprep.subr.bf16.mxu0 %v812_v17 }
  0x2b   : > { %760 = vmatpush3.bf16.msra.mxu1 %v813_v18 }
  0x2c   : > { %729 = vmatpush3.bf16.msra.mxu0 %v814_v19  ;;  %761 = vmatprep.subr.bf16.mxu1 %v846_v2 }
  0x2d   : > { %730 = vmatprep.subr.bf16.mxu0 %v815_v20 }
  0x2f   : > { %762 = vmatpush3.bf16.msra.mxu1 %v816_v22 }
  0x30   : > { %731 = vmatpush3.bf16.msra.mxu0 %v817_v23  ;;  %763 = vmatprep.subr.bf16.mxu1 %v846_v2 }
  0x31   : > { %732 = vmatprep.subr.bf16.mxu0 %v818_v25 }
  0x33   : > { %764 = vmatpush3.bf16.msra.mxu1 %v819_v29 }
  0x34   : > { %733 = vmatpush3.bf16.msra.mxu0 %v820_v32 }
  0x36   : > { %766 = vmatmul.mubr.bf16.vlgmr.msra.gmra.mxu1 %v335_v36 }
  0x37   : > { %516 = vmatmul.mubr.bf16.vlgmr.msra.gmra.mxu0 %v327_v34 }
  0xf6   : > { %v557_v37 = vpop.f32.mrf.mxu1 }
  0xf7   : > { %v734_v38 = vpop.f32.mrf.mxu0 }
  0xf8   : > { %v767_v39 = vpop.f32.mrf.mxu1 }
  0xf9   : > { %v735_v40 = vpop.f32.mrf.mxu0 }
  0xfa   : > { %v736_v41 = vadd.f32 %v735_v40, %v734_v38  ;;  %v560_v43 = vpop.f32.mrf.mxu1 }
  0xfb   : > { %v737_v44 = vpop.f32.mrf.mxu0 }
  0xfc   : > { %v558_v45 = vadd.f32 %v736_v41, %v557_v37  ;;  %v768_v46 = vpop.f32.mrf.mxu1  ;;  %568 = sbr.rel (%p713_p7) target bundleno = 267 (0x10b), region = 40 }
  0xfd   : > { %v738_v47 = vpop.f32.mrf.mxu0 }
  0xfe   : > { %v563_v48 = vadd.f32 %v558_v45, %v262_v42 }
 0x100   : > { %564 = vst [vmem:[#allocation2] sm:$0x3] %v563_v48 }
 0x101   : > { %v714_v50 = vld [vmem:[%s950_s2] ss:$0 sm:$0xff] }
 0x107   : > { %v569_v49 = vld [vmem:[#allocation2] sm:$0x3] }
 0x108   : > { %v577_v51 = vadd.f32 %v714_v50, %v569_v49 }
 0x10a   : > { %578 = vst [vmem:[%s951_s3] sm:$0x3] %v577_v51 }
 0x10b PF: > { %s13_s14 = sadd.s32 1, %s843_s14   ;;  %s952_s12 = smov %s839_s13 }
 0x10c   : > { %p10_p8 = scmp.ge.s32.totalorder %s13_s14, 5   ;;  %s953_s13 = smov %s955_s15 }
 0x10e   :  { %12 = sbr.rel (!%p10_p8) target bundleno = 2 (0x2), region = 76 }

// kernel: backbone_with_fpn_forward.22
= control target key start
LH: loop header
LB: loop body
LE: loop exit
PB: predicated region body
PF: predicated region fallthrough
CT: control target
= control target key end

     0   :  { %s1501_s12 = smov 0   ;;  %s1503_s13 = smov 0   ;;  %s1739_s0 = inlined_call_operand.vmem [shape: bf16[128,1152], index: 0, kind: input, shape index: {}]   ;;  %s1740_s1 = inlined_call_operand.vmem [shape: bf16[1152,128], index: 1, kind: input, shape index: {}]   ;;  %s1741_s2 = inlined_call_operand.vmem [shape: f32[1,128], index: 2, kind: input, shape index: {}]   ;;  %s1742_s3 = inlined_call_operand.vmem [shape: f32[128,128], index: 3, kind: output, shape index: {}]  }
   0x1   :  { %s1505_s14 = smov 0   ;;  %s1507_s15 = smov 0  }
   0x2   :  { %s1509_s16 = smov 0  }
   0x3 LB: > { %s25_s17 = sadd.s32 1, %s1474_s15  ;;  %p48_p1 = scmp.ne.s32.totalorder %s1466_s13, %s1462_s12  ;;  %s1478_s16 = sphi %s1509_s16, %s13_s16   ;;  %s1474_s15 = sphi %s1507_s15, %s1746_s15   ;;  %s1470_s14 = sphi %s1505_s14, %s1745_s14   ;;  %s1466_s13 = sphi %s1503_s13, %s1744_s13   ;;  %s1462_s12 = sphi %s1501_s12, %s1743_s12  }
   0x4   : > { %p26_p0 = scmp.ge.s32.totalorder %s25_s17, 3  ;;  %p49_p2 = scmp.eq.s32.totalorder %s1478_s16, 0 }
   0x5   : > { %s41_s19 = sadd.s32 1, %s1466_s13  ;;  %p1137_p5 = scmp.ge.s32.totalorder %s1478_s16, 3 }
   0x6   : > { %s1748_s17 = smov (%p26_p0, %s25_s17), 0  ;;  %p50_p3 = por %p49_p2, %p48_p1 }
   0x7   : > { %s37_s18 = ssub.s32 %s1474_s15, %s1748_s17  ;;  %162 = sbr.rel (%p1137_p5) target bundleno = 35 (0x23), region = 20 }
   0x8   : > { %p39_p4 = scmp.eq.s32.totalorder %s37_s18, 0 }
   0xa   : > { %s1536_s20 = scalar_select %p39_p4, %s1466_s13, %s41_s19  }
   0xc   : > { %165 = sbr.rel (!%p50_p3) target bundleno = 35 (0x23), region = 24  ;;  %s167_s21 = sand.u32 (%p50_p3), 1, %s1466_s13  }
   0xd   : > { %s1228_s22 = smul.u32 (%p50_p3), 12, %s1474_s15 }
   0xe   : > { %s1341_s23 = smul.u32 (%p50_p3), 192, %s167_s21 }
   0xf   : > { %s1544_s26 = scalar_lea.vmem (%p50_p3), %s1739_s0, %s1228_s22 }
  0x10   : > { %v190_v0 = vld [vmem:[%s1544_s26] sm:$0xff] (%p50_p3)  ;;  %v194_v2 = vld [vmem:[%s1544_s26 + $0x48] sm:$0xff] (%p50_p3)  ;;  %s1549_s27 = scalar_lea.vmem (%p50_p3), [#allocation3], %s1341_s23  ;;  %v198_v4 = vld [vmem:[%s1544_s26 + $0x90] sm:$0xff] (%p50_p3) }
  0x11   : > { %v192_v1 = vld [vmem:[%s1544_s26 + $0x24] sm:$0xff]  ;;  %191 = vst [vmem:[%s1549_s27] sm:$0xff] %v190_v0  ;;  %195 = vst [vmem:[%s1549_s27 + $0x18] sm:$0xff] %v194_v2  ;;  %v196_v3 = vld [vmem:[%s1544_s26 + $0x6c] sm:$0xff] }
  0x12   : > { %193 = vst [vmem:[%s1549_s27 + $0xc] sm:$0xff] %v192_v1  ;;  %v200_v5 = vld [vmem:[%s1544_s26 + $0xb4] sm:$0xff]  ;;  %197 = vst [vmem:[%s1549_s27 + $0x24] sm:$0xff] %v196_v3  ;;  %v204_v7 = vld [vmem:[%s1544_s26 + $0xfc] sm:$0xff] }
  0x13   : > { %199 = vst [vmem:[%s1549_s27 + $0x30] sm:$0xff] %v198_v4  ;;  %201 = vst [vmem:[%s1549_s27 + $0x3c] sm:$0xff] %v200_v5  ;;  %v202_v6 = vld [vmem:[%s1544_s26 + $0xd8] sm:$0xff]  ;;  %v206_v8 = vld [vmem:[%s1544_s26 + $0x120] sm:$0xff] }
  0x14   : > { %203 = vst [vmem:[%s1549_s27 + $0x48] sm:$0xff] %v202_v6  ;;  %205 = vst [vmem:[%s1549_s27 + $0x54] sm:$0xff] %v204_v7  ;;  %v208_v9 = vld [vmem:[%s1544_s26 + $0x144] sm:$0xff]  ;;  %v212_v11 = vld [vmem:[%s1544_s26 + $0x18c] sm:$0xff] }
  0x15   : > { %207 = vst [vmem:[%s1549_s27 + $0x60] sm:$0xff] %v206_v8  ;;  %v210_v10 = vld [vmem:[%s1544_s26 + $0x168] sm:$0xff]  ;;  %209 = vst [vmem:[%s1549_s27 + $0x6c] sm:$0xff] %v208_v9  ;;  %v214_v12 = vld [vmem:[%s1544_s26 + $0x1b0] sm:$0xff] }
  0x16   : > { %211 = vst [vmem:[%s1549_s27 + $0x78] sm:$0xff] %v210_v10  ;;  %213 = vst [vmem:[%s1549_s27 + $0x84] sm:$0xff] %v212_v11  ;;  %v216_v13 = vld [vmem:[%s1544_s26 + $0x1d4] sm:$0xff]  ;;  %v220_v15 = vld [vmem:[%s1544_s26 + $0x21c] sm:$0xff] }
  0x17   : > { %v218_v14 = vld [vmem:[%s1544_s26 + $0x1f8] sm:$0xff]  ;;  %215 = vst [vmem:[%s1549_s27 + $0x90] sm:$0xff] %v214_v12  ;;  %217 = vst [vmem:[%s1549_s27 + $0x9c] sm:$0xff] %v216_v13  ;;  %v1139_v16 = vld [vmem:[%s1544_s26 + $0x8] sm:$0xf] }
  0x18   : > { %219 = vst [vmem:[%s1549_s27 + $0xa8] sm:$0xff] %v218_v14  ;;  %v1141_v17 = vld [vmem:[%s1544_s26 + $0x2c] sm:$0xf]  ;;  %221 = vst [vmem:[%s1549_s27 + $0xb4] sm:$0xff] %v220_v15  ;;  %v1143_v18 = vld [vmem:[%s1544_s26 + $0x50] sm:$0xf] }
  0x19   : > { %1140 = vst [vmem:[%s1549_s27 + $0x8] sm:$0xf] %v1139_v16  ;;  %1142 = vst [vmem:[%s1549_s27 + $0x14] sm:$0xf] %v1141_v17  ;;  %v1145_v19 = vld [vmem:[%s1544_s26 + $0x74] sm:$0xf] }
  0x1a   : > { %v1147_v20 = vld [vmem:[%s1544_s26 + $0x98] sm:$0xf]  ;;  %1144 = vst [vmem:[%s1549_s27 + $0x20] sm:$0xf] %v1143_v18  ;;  %1146 = vst [vmem:[%s1549_s27 + $0x2c] sm:$0xf] %v1145_v19 }
  0x1b   : > { %1148 = vst [vmem:[%s1549_s27 + $0x38] sm:$0xf] %v1147_v20  ;;  %v1149_v21 = vld [vmem:[%s1544_s26 + $0xbc] sm:$0xf]  ;;  %v1151_v22 = vld [vmem:[%s1544_s26 + $0xe0] sm:$0xf] }
  0x1c   : > { %v1153_v23 = vld [vmem:[%s1544_s26 + $0x104] sm:$0xf]  ;;  %1150 = vst [vmem:[%s1549_s27 + $0x44] sm:$0xf] %v1149_v21  ;;  %1152 = vst [vmem:[%s1549_s27 + $0x50] sm:$0xf] %v1151_v22 }
  0x1d   : > { %1154 = vst [vmem:[%s1549_s27 + $0x5c] sm:$0xf] %v1153_v23  ;;  %v1155_v24 = vld [vmem:[%s1544_s26 + $0x128] sm:$0xf]  ;;  %v1157_v25 = vld [vmem:[%s1544_s26 + $0x14c] sm:$0xf] }
  0x1e   : > { %v1159_v26 = vld [vmem:[%s1544_s26 + $0x170] sm:$0xf]  ;;  %1156 = vst [vmem:[%s1549_s27 + $0x68] sm:$0xf] %v1155_v24  ;;  %1158 = vst [vmem:[%s1549_s27 + $0x74] sm:$0xf] %v1157_v25 }
  0x1f   : > { %1160 = vst [vmem:[%s1549_s27 + $0x80] sm:$0xf] %v1159_v26  ;;  %v1161_v27 = vld [vmem:[%s1544_s26 + $0x194] sm:$0xf]  ;;  %v1163_v28 = vld [vmem:[%s1544_s26 + $0x1b8] sm:$0xf] }
  0x20   : > { %v1165_v29 = vld [vmem:[%s1544_s26 + $0x1dc] sm:$0xf]  ;;  %1162 = vst [vmem:[%s1549_s27 + $0x8c] sm:$0xf] %v1161_v27  ;;  %1164 = vst [vmem:[%s1549_s27 + $0x98] sm:$0xf] %v1163_v28 }
  0x21   : > { %1166 = vst [vmem:[%s1549_s27 + $0xa4] sm:$0xf] %v1165_v29  ;;  %v1167_v30 = vld [vmem:[%s1544_s26 + $0x200] sm:$0xf]  ;;  %v1169_v31 = vld [vmem:[%s1544_s26 + $0x224] sm:$0xf] }
  0x22   : > { %1168 = vst [vmem:[%s1549_s27 + $0xb0] sm:$0xf] %v1167_v30  ;;  %1170 = vst [vmem:[%s1549_s27 + $0xbc] sm:$0xf] %v1169_v31 }
  0x23 PF: > { %p1171_p6 = scmp.ge.s32.totalorder %s1478_s16, 1  ;;  %p278_p7 = scmp.lt.s32.totalorder %s1478_s16, 4 }
  0x25   : > { %p279_p8 = pnand %p1171_p6, %p278_p7 }
  0x26   : > { %s285_s28 = sand.u32 (!%p279_p8), 1, %s1462_s12   ;;  %s324_s29 = smul.u32 (!%p279_p8), 48, %s1470_s14 }
  0x27   : > { %282 = sbr.rel (%p279_p8) target bundleno = 364 (0x16c), region = 54  ;;  %p1173_p10 = scmp.ne.s32.totalorder (!%p279_p8), %s1470_s14, 0 }
  0x28   : > { %s1342_s30 = smul.u32 (!%p279_p8), 192, %s285_s28  ;;  %p325_p9 = scmp.lt.s32.totalorder (!%p279_p8), %s324_s29, 143 }
  0x2a   : > { %s1621_s8 = scalar_lea.vmem (!%p279_p8), [#allocation3], %s1342_s30 }
  0x2c   : > { %s1750_s29 = smov (!%p325_p9, %s324_s29), 143  ;;  %349 = sbr.rel (%p1173_p10) target bundleno = 58 (0x3a), region = 62 }
  0x2d   : > { %s1172_s4 = sshll.u32 %s1750_s29, 2 }
  0x2e   : > { %s1619_s7 = scalar_lea.vmem %s1740_s1, %s1172_s4 }
  0x31   : > { %v1480_v32 = vmov 0.0  }
  0x32   : > { %350 = vst [vmem:[#allocation2 + $0x30] sm:$0xff] %v1480_v32  ;;  %351 = vst [vmem:[#allocation2] sm:$0xff] %v1480_v32 }
  0x33   : > { %352 = vst [vmem:[#allocation2 + $0x58] sm:$0xff] %v1480_v32  ;;  %353 = vst [vmem:[#allocation2 + $0x18] sm:$0xff] %v1480_v32 }
  0x34   : > { %354 = vst [vmem:[#allocation2 + $0x50] sm:$0xff] %v1480_v32  ;;  %355 = vst [vmem:[#allocation2 + $0x68] sm:$0xff] %v1480_v32 }
  0x35   : > { %356 = vst [vmem:[#allocation2 + $0x8] sm:$0xff] %v1480_v32  ;;  %357 = vst [vmem:[#allocation2 + $0x48] sm:$0xff] %v1480_v32 }
  0x36   : > { %358 = vst [vmem:[#allocation2 + $0x40] sm:$0xff] %v1480_v32  ;;  %359 = vst [vmem:[#allocation2 + $0x20] sm:$0xff] %v1480_v32 }
  0x37   : > { %360 = vst [vmem:[#allocation2 + $0x10] sm:$0xff] %v1480_v32  ;;  %361 = vst [vmem:[#allocation2 + $0x38] sm:$0xff] %v1480_v32 }
  0x38   : > { %362 = vst [vmem:[#allocation2 + $0x60] sm:$0xff] %v1480_v32  ;;  %363 = vst [vmem:[#allocation2 + $0x70] sm:$0xff] %v1480_v32 }
  0x39   : > { %364 = vst [vmem:[#allocation2 + $0x78] sm:$0xff] %v1480_v32  ;;  %365 = vst [vmem:[#allocation2 + $0x28] sm:$0xff] %v1480_v32 }
  0x3a PF: > { %v1384_v33 = vld [vmem:[%s1619_s7 + $0x78] sm:$0xff]   ;;  %v1387_v36 = vld [vmem:[%s1619_s7 + $0x70] sm:$0xff]   ;;  %v1390_v39 = vld [vmem:[%s1619_s7 + $0x68] sm:$0xff]   ;;  %p1222_p11 = scmp.ne.s32.totalorder %s1470_s14, 2 }
  0x3b   : > { %v1385_v34 = vld [vmem:[%s1619_s7 + $0x38] sm:$0xff]   ;;  %1229 = vmatprep.subr.bf16.mxu0 %v1384_v33  ;;  %v1388_v37 = vld [vmem:[%s1619_s7 + $0x30] sm:$0xff]   ;;  %v1391_v40 = vld [vmem:[%s1619_s7 + $0x28] sm:$0xff]  }
  0x3c   : > { %v1386_v35 = vld [vmem:[%s1619_s7 + $0xb8] sm:$0xff]   ;;  %1230 = vmatpush3.bf16.msra.mxu0 %v1385_v34  ;;  %v1389_v38 = vld [vmem:[%s1619_s7 + $0xb0] sm:$0xff]   ;;  %v1392_v41 = vld [vmem:[%s1619_s7 + $0xa8] sm:$0xff]  }
  0x3d   : > { %1309 = vmatprep.subr.bf16.mxu1 %v1386_v35  ;;  %1231 = vmatprep.subr.bf16.mxu0 %v1387_v36  ;;  %v1393_v42 = vld [vmem:[%s1619_s7 + $0x60] sm:$0xff]   ;;  %v1396_v45 = vld [vmem:[%s1619_s7 + $0x58] sm:$0xff]   ;;  %v1399_v48 = vld [vmem:[%s1619_s7 + $0x50] sm:$0xff]  }
  0x3e   : > { %1310 = vmatpush3.bf16.msra.mxu1 %v1386_v35  ;;  %v1394_v43 = vld [vmem:[%s1619_s7 + $0x20] sm:$0xff]   ;;  %v1398_v46 = vld [vmem:[%s1619_s7 + $0x98] sm:$0xff]   ;;  %v1401_v49 = vld [vmem:[%s1619_s7 + $0x90] sm:$0xff]  }
  0x3f   : > { %1311 = vmatprep.subr.bf16.mxu1 %v1389_v38  ;;  %v1395_v44 = vld [vmem:[%s1619_s7 + $0xa0] sm:$0xff]   ;;  %v1397_v47 = vld [vmem:[%s1619_s7 + $0x18] sm:$0xff]   ;;  %v1400_v50 = vld [vmem:[%s1619_s7 + $0x10] sm:$0xff]  }
  0x40   : > { %1232 = vmatpush3.bf16.msra.mxu0 %v1388_v37  ;;  %v1402_v51 = vld [vmem:[%s1619_s7 + $0x48] sm:$0xff]   ;;  %v1405_v54 = vld [vmem:[%s1619_s7 + $0x40] sm:$0xff]   ;;  %v1420_v1 = vld [vmem:[%s1621_s8 + $0x50] ss:$12 sps:$4 sm:$0xff]  }
  0x41   : > { %1233 = vmatprep.subr.bf16.mxu0 %v1390_v39  ;;  %v1403_v52 = vld [vmem:[%s1619_s7 + $0x8] sm:$0xff]   ;;  %v1407_v55 = vld [vmem:[%s1619_s7 + $0x80] sm:$0xff]   ;;  %v1418_v3 = vld [vmem:[%s1621_s8 + $0x30] ss:$12 sps:$4 sm:$0xff]  }
  0x42   : > { %1312 = vmatpush3.bf16.msra.mxu1 %v1389_v38  ;;  %v1404_v53 = vld [vmem:[%s1619_s7 + $0x88] sm:$0xff]   ;;  %v1410_v56 = vld [vmem:[%s1621_s8 + $0x4] ss:$12 sps:$4 sm:$0xff]   ;;  %v1416_v0 = vld [vmem:[%s1621_s8 + $0x34] ss:$12 sps:$4 sm:$0xff]  }
  0x43   : > { %1313 = vmatprep.subr.bf16.mxu1 %v1392_v41  ;;  %v1411_v57 = vld [vmem:[%s1621_s8 + $0x8] ss:$12 sps:$4 sm:$0xff]   ;;  %v1406_v58 = vld [vmem:[%s1619_s7] sm:$0xff]   ;;  %766 = vmatprep.mubr.bf16.mxu0 %v1410_v56  ;;  %v1421_v4 = vld [vmem:[%s1621_s8 + $0x4c] ss:$12 sps:$4 sm:$0xff]  }
  0x44   : > { %1234 = vmatpush3.bf16.msra.mxu0 %v1391_v40  ;;  %1325 = vmatprep.mubr.bf16.mxu1 %v1411_v57  ;;  %v1408_v59 = vld [vmem:[%s1621_s8] ss:$12 sps:$4 sm:$0xff]   ;;  %v1413_v60 = vld [vmem:[%s1621_s8 + $0x1c] ss:$12 sps:$4 sm:$0xff]   ;;  %v1419_v62 = vld [vmem:[%s1621_s8 + $0x38] ss:$12 sps:$4 sm:$0xff]  }
  0x45   : > { %1235 = vmatprep.subr.bf16.mxu0 %v1393_v42  ;;  %v1412_v61 = vld [vmem:[%s1621_s8 + $0x20] ss:$12 sps:$4 sm:$0xff]   ;;  %v1415_v63 = vld [vmem:[%s1621_s8 + $0x18] ss:$12 sps:$4 sm:$0xff]   ;;  %v1427_v2 = vld [vmem:[%s1621_s8 + $0x68] ss:$12 sps:$4 sm:$0xff]  }
  0x46   : > { %1314 = vmatpush3.bf16.msra.mxu1 %v1392_v41  ;;  %v1428_v5 = vld [vmem:[%s1621_s8 + $0x80] ss:$12 sps:$4 sm:$0xff]   ;;  %v1435_v6 = vld [vmem:[%s1621_s8 + $0x98] ss:$12 sps:$4 sm:$0xff]   ;;  %v1423_v7 = vld [vmem:[%s1621_s8 + $0x48] ss:$12 sps:$4 sm:$0xff]  }
  0x47   : > { %1315 = vmatprep.subr.bf16.mxu1 %v1395_v44  ;;  %v1424_v8 = vld [vmem:[%s1621_s8 + $0x64] ss:$12 sps:$4 sm:$0xff]   ;;  %v1426_v10 = vld [vmem:[%s1621_s8 + $0x60] ss:$12 sps:$4 sm:$0xff]   ;;  %v1429_v11 = vld [vmem:[%s1621_s8 + $0x7c] ss:$12 sps:$4 sm:$0xff]  }
  0x48   : > { %1236 = vmatpush3.bf16.msra.mxu0 %v1394_v43  ;;  %v1436_v9 = vld [vmem:[%s1621_s8 + $0xb0] ss:$12 sps:$4 sm:$0xff]   ;;  %v1431_v12 = vld [vmem:[%s1621_s8 + $0x78] ss:$12 sps:$4 sm:$0xff]   ;;  %v1432_v13 = vld [vmem:[%s1621_s8 + $0x94] ss:$12 sps:$4 sm:$0xff]  }
  0x49   : > { %1237 = vmatprep.subr.bf16.mxu0 %v1396_v45  ;;  %v1434_v14 = vld [vmem:[%s1621_s8 + $0x90] ss:$12 sps:$4 sm:$0xff]   ;;  %v1437_v15 = vld [vmem:[%s1621_s8 + $0xac] ss:$12 sps:$4 sm:$0xff]   ;;  %v1439_v16 = vld [vmem:[%s1621_s8 + $0xa8] ss:$12 sps:$4 sm:$0xff]  }
  0x4a   : > { %1316 = vmatpush3.bf16.msra.mxu1 %v1395_v44  ;;  %v366_v22 = vld [vmem:[#allocation2 + $0x30] sm:$0xff]  ;;  %v367_v30 = vld [vmem:[#allocation2] sm:$0xff]  ;;  %v368_v37 = vld [vmem:[#allocation2 + $0x58] sm:$0xff] }
  0x4b   : > { %1317 = vmatprep.subr.bf16.mxu1 %v1398_v46  ;;  %v369_v44 = vld [vmem:[#allocation2 + $0x18] sm:$0xff] }
  0x4c   : > { %1238 = vmatpush3.bf16.msra.mxu0 %v1397_v47 }
  0x4d   : > { %1239 = vmatprep.subr.bf16.mxu0 %v1399_v48 }
  0x4e   : > { %1318 = vmatpush3.bf16.msra.mxu1 %v1398_v46 }
  0x4f   : > { %1319 = vmatprep.subr.bf16.mxu1 %v1401_v49 }
  0x50   : > { %1240 = vmatpush3.bf16.msra.mxu0 %v1400_v50 }
  0x51   : > { %1241 = vmatprep.subr.bf16.mxu0 %v1402_v51 }
  0x52   : > { %1320 = vmatpush3.bf16.msra.mxu1 %v1401_v49 }
  0x53   : > { %1321 = vmatprep.subr.bf16.mxu1 %v1404_v53 }
  0x54   : > { %1242 = vmatpush3.bf16.msra.mxu0 %v1403_v52  ;;  %v370_v52 = vld [vmem:[#allocation2 + $0x50] sm:$0xff] }
  0x55   : > { %1243 = vmatprep.subr.bf16.mxu0 %v1405_v54 }
  0x56   : > { %1322 = vmatpush3.bf16.msra.mxu1 %v1404_v53 }
  0x57   : > { %1323 = vmatprep.subr.bf16.mxu1 %v1407_v55 }
  0x58   : > { %1244 = vmatpush3.bf16.msra.mxu0 %v1406_v58 }
  0x5a   : > { %1324 = vmatpush3.bf16.msra.mxu1 %v1407_v55 }
  0x5b   : > { %767 = vmatmul.mubr.bf16.vlgmr.msra.gmra.mxu0 %v1408_v59  ;;  %v371_v59 = vld [vmem:[#allocation2 + $0x68] sm:$0xff] }
  0x5c   : > { %774 = vmatprep.mubr.bf16.mxu0 %v1413_v60 }
  0x5d   : > { %1326 = vmatmul.mubr.bf16.vlgmr.msra.gmra.mxu1 %v1412_v61 }
  0x5e   : > { %1329 = vmatprep.mubr.bf16.mxu1 %v1419_v62 }
  0x63   : > { %775 = vmatmul.mubr.bf16.gmra.mxu0 %v1415_v63 }
  0x64   : > { %782 = vmatprep.mubr.bf16.mxu0 %v1416_v0 }
  0x65   : > { %1330 = vmatmul.mubr.bf16.gmra.mxu1 %v1420_v1  ;;  %v372_v1 = vld [vmem:[#allocation2 + $0x8] sm:$0xff] }
  0x66   : > { %1333 = vmatprep.mubr.bf16.mxu1 %v1427_v2 }
  0x6b   : > { %783 = vmatmul.mubr.bf16.gmra.mxu0 %v1418_v3 }
  0x6c   : > { %790 = vmatprep.mubr.bf16.mxu0 %v1421_v4 }
  0x6d   : > { %1334 = vmatmul.mubr.bf16.gmra.mxu1 %v1428_v5 }
  0x6e   : > { %1337 = vmatprep.mubr.bf16.mxu1 %v1435_v6 }
  0x73   : > { %791 = vmatmul.mubr.bf16.gmra.mxu0 %v1423_v7 }
  0x74   : > { %798 = vmatprep.mubr.bf16.mxu0 %v1424_v8  ;;  %v373_v8 = vld [vmem:[#allocation2 + $0x48] sm:$0xff] }
  0x75   : > { %1338 = vmatmul.mubr.bf16.gmra.mxu1 %v1436_v9 }
  0x7b   : > { %799 = vmatmul.mubr.bf16.gmra.mxu0 %v1426_v10 }
  0x7c   : > { %806 = vmatprep.mubr.bf16.mxu0 %v1429_v11 }
  0x83   : > { %807 = vmatmul.mubr.bf16.gmra.mxu0 %v1431_v12 }
  0x84   : > { %814 = vmatprep.mubr.bf16.mxu0 %v1432_v13 }
  0x8b   : > { %815 = vmatmul.mubr.bf16.gmra.mxu0 %v1434_v14 }
  0x8c   : > { %822 = vmatprep.mubr.bf16.mxu0 %v1437_v15 }
  0x93   : > { %823 = vmatmul.mubr.bf16.gmra.mxu0 %v1439_v16  ;;  %v374_v16 = vld [vmem:[#allocation2 + $0x40] sm:$0xff] }
 0x11b   : > { %v1245_v17 = vpop.f32.mrf.mxu0 }
 0x11d   : > { %v1246_v18 = vpop.f32.mrf.mxu0  ;;  %v1327_v19 = vpop.f32.mrf.mxu1 }
 0x11e   : > { %v1247_v20 = vadd.f32 %v1246_v18, %v1245_v17 }
 0x11f   : > { %v1248_v21 = vpop.f32.mrf.mxu0  ;;  %v865_v23 = vpop.f32.mrf.mxu1 }
 0x120   : > { %v866_v24 = vadd.f32 %v1247_v20, %v865_v23  ;;  %v375_v23 = vld [vmem:[#allocation2 + $0x20] sm:$0xff] }
 0x121   : > { %v1249_v25 = vpop.f32.mrf.mxu0  ;;  %v1328_v26 = vpop.f32.mrf.mxu1 }
 0x122   : > { %v928_v27 = vadd.f32 %v866_v24, %v366_v22  ;;  %v1250_v28 = vadd.f32 %v1249_v25, %v1248_v21 }
 0x123   : > { %v1251_v29 = vpop.f32.mrf.mxu0  ;;  %v868_v31 = vpop.f32.mrf.mxu1 }
 0x124   : > { %944 = vst [vmem:[#allocation2 + $0x30] sm:$0xff] %v928_v27  ;;  %v869_v32 = vadd.f32 %v1250_v28, %v868_v31 }
 0x125   : > { %v1252_v33 = vpop.f32.mrf.mxu0  ;;  %v1331_v34 = vpop.f32.mrf.mxu1 }
 0x126   : > { %v929_v35 = vadd.f32 %v869_v32, %v367_v30  ;;  %v1253_v36 = vadd.f32 %v1252_v33, %v1251_v29  ;;  %v376_v29 = vld [vmem:[#allocation2 + $0x10] sm:$0xff] }
 0x127   : > { %v1254_v38 = vpop.f32.mrf.mxu0  ;;  %v881_v41 = vpop.f32.mrf.mxu1 }
 0x128   : > { %945 = vst [vmem:[#allocation2] sm:$0xff] %v929_v35  ;;  %v874_v39 = vadd.f32 %v1327_v19, %v1253_v36  ;;  %v377_v36 = vld [vmem:[#allocation2 + $0x38] sm:$0xff] }
 0x129   : > { %v1255_v40 = vpop.f32.mrf.mxu0  ;;  %v1332_v48 = vpop.f32.mrf.mxu1 }
 0x12a   : > { %v930_v42 = vadd.f32 %v874_v39, %v368_v37  ;;  %v1256_v43 = vadd.f32 %v1255_v40, %v1254_v38 }
 0x12b   : > { %v1257_v45 = vpop.f32.mrf.mxu0  ;;  %v884_v55 = vpop.f32.mrf.mxu1 }
 0x12c   : > { %946 = vst [vmem:[#allocation2 + $0x58] sm:$0xff] %v930_v42  ;;  %v877_v46 = vadd.f32 %v1328_v26, %v1256_v43 }
 0x12d   : > { %v1258_v47 = vpop.f32.mrf.mxu0  ;;  %v1335_v62 = vpop.f32.mrf.mxu1 }
 0x12e   : > { %v931_v49 = vadd.f32 %v877_v46, %v369_v44  ;;  %v1259_v50 = vadd.f32 %v1258_v47, %v1257_v45  ;;  %v378_v44 = vld [vmem:[#allocation2 + $0x60] sm:$0xff] }
 0x12f   : > { %v1260_v51 = vpop.f32.mrf.mxu0  ;;  %v897_v5 = vpop.f32.mrf.mxu1 }
 0x130   : > { %947 = vst [vmem:[#allocation2 + $0x18] sm:$0xff] %v931_v49  ;;  %v882_v53 = vadd.f32 %v1259_v50, %v881_v41 }
 0x131   : > { %v1261_v54 = vpop.f32.mrf.mxu0  ;;  %v1336_v12 = vpop.f32.mrf.mxu1 }
 0x132   : > { %v932_v56 = vadd.f32 %v882_v53, %v370_v52  ;;  %v1262_v57 = vadd.f32 %v1261_v54, %v1260_v51  ;;  %v379_v51 = vld [vmem:[#allocation2 + $0x70] sm:$0xff] }
 0x133   : > { %v1263_v58 = vpop.f32.mrf.mxu0  ;;  %v900_v19 = vpop.f32.mrf.mxu1 }
 0x134   : > { %948 = vst [vmem:[#allocation2 + $0x50] sm:$0xff] %v932_v56  ;;  %v885_v60 = vadd.f32 %v1262_v57, %v884_v55  ;;  %v380_v56 = vld [vmem:[#allocation2 + $0x78] sm:$0xff] }
 0x135   : > { %v1264_v61 = vpop.f32.mrf.mxu0  ;;  %v1339_v26 = vpop.f32.mrf.mxu1 }
 0x136   : > { %v933_v63 = vadd.f32 %v885_v60, %v371_v59  ;;  %v1265_v0 = vadd.f32 %v1264_v61, %v1263_v58 }
 0x137   : > { %v1266_v2 = vpop.f32.mrf.mxu0  ;;  %v913_v33 = vpop.f32.mrf.mxu1 }
 0x138   : > { %949 = vst [vmem:[#allocation2 + $0x68] sm:$0xff] %v933_v63  ;;  %v890_v3 = vadd.f32 %v1331_v34, %v1265_v0 }
 0x139   : > { %v1267_v4 = vpop.f32.mrf.mxu0  ;;  %v1340_v40 = vpop.f32.mrf.mxu1 }
 0x13a   : > { %v934_v6 = vadd.f32 %v890_v3, %v372_v1  ;;  %v1268_v7 = vadd.f32 %v1267_v4, %v1266_v2 }
 0x13b   : > { %v1269_v9 = vpop.f32.mrf.mxu0  ;;  %v916_v47 = vpop.f32.mrf.mxu1 }
 0x13c   : > { %950 = vst [vmem:[#allocation2 + $0x8] sm:$0xff] %v934_v6  ;;  %v893_v10 = vadd.f32 %v1332_v48, %v1268_v7 }
 0x13d   : > { %v1270_v11 = vpop.f32.mrf.mxu0 }
 0x13e   : > { %v935_v13 = vadd.f32 %v893_v10, %v373_v8  ;;  %v1271_v14 = vadd.f32 %v1270_v11, %v1269_v9 }
 0x13f   : > { %v1272_v15 = vpop.f32.mrf.mxu0 }
 0x140   : > { %951 = vst [vmem:[#allocation2 + $0x48] sm:$0xff] %v935_v13  ;;  %v898_v17 = vadd.f32 %v1271_v14, %v897_v5 }
 0x141   : > { %v1273_v18 = vpop.f32.mrf.mxu0 }
 0x142   : > { %v936_v20 = vadd.f32 %v898_v17, %v374_v16  ;;  %v1274_v21 = vadd.f32 %v1273_v18, %v1272_v15 }
 0x143   : > { %v1275_v22 = vpop.f32.mrf.mxu0 }
 0x144   : > { %952 = vst [vmem:[#allocation2 + $0x40] sm:$0xff] %v936_v20  ;;  %v901_v24 = vadd.f32 %v1274_v21, %v900_v19 }
 0x145   : > { %v1276_v25 = vpop.f32.mrf.mxu0 }
 0x146   : > { %v937_v27 = vadd.f32 %v901_v24, %v375_v23  ;;  %v1277_v28 = vadd.f32 %v1276_v25, %v1275_v22 }
 0x147   : > { %v1278_v30 = vpop.f32.mrf.mxu0 }
 0x148   : > { %953 = vst [vmem:[#allocation2 + $0x20] sm:$0xff] %v937_v27  ;;  %v906_v31 = vadd.f32 %v1335_v62, %v1277_v28  ;;  %v381_v62 = vld [vmem:[#allocation2 + $0x28] sm:$0xff] }
 0x149   : > { %v1279_v32 = vpop.f32.mrf.mxu0 }
 0x14a   : > { %v938_v34 = vadd.f32 %v906_v31, %v376_v29  ;;  %v1280_v35 = vadd.f32 %v1279_v32, %v1278_v30 }
 0x14b   : > { %v1281_v37 = vpop.f32.mrf.mxu0 }
 0x14c   : > { %954 = vst [vmem:[#allocation2 + $0x10] sm:$0xff] %v938_v34  ;;  %v909_v38 = vadd.f32 %v1336_v12, %v1280_v35 }
 0x14d   : > { %v1282_v39 = vpop.f32.mrf.mxu0 }
 0x14e   : > { %v939_v41 = vadd.f32 %v909_v38, %v377_v36  ;;  %v1283_v42 = vadd.f32 %v1282_v39, %v1281_v37 }
 0x14f   : > { %v1284_v43 = vpop.f32.mrf.mxu0 }
 0x150   : > { %955 = vst [vmem:[#allocation2 + $0x38] sm:$0xff] %v939_v41  ;;  %v914_v45 = vadd.f32 %v1283_v42, %v913_v33 }
 0x151   : > { %v1285_v46 = vpop.f32.mrf.mxu0 }
 0x152   : > { %v940_v48 = vadd.f32 %v914_v45, %v378_v44  ;;  %v1286_v49 = vadd.f32 %v1285_v46, %v1284_v43 }
 0x153   : > { %v1287_v50 = vpop.f32.mrf.mxu0 }
 0x154   : > { %956 = vst [vmem:[#allocation2 + $0x60] sm:$0xff] %v940_v48  ;;  %v917_v52 = vadd.f32 %v1286_v49, %v916_v47 }
 0x155   : > { %v1288_v53 = vpop.f32.mrf.mxu0 }
 0x156   : > { %v941_v54 = vadd.f32 %v917_v52, %v379_v51  ;;  %v1289_v55 = vadd.f32 %v1288_v53, %v1287_v50 }
 0x157   : > { %v1290_v57 = vpop.f32.mrf.mxu0 }
 0x158   : > { %957 = vst [vmem:[#allocation2 + $0x70] sm:$0xff] %v941_v54  ;;  %v922_v58 = vadd.f32 %v1339_v26, %v1289_v55 }
 0x159   : > { %v1291_v59 = vpop.f32.mrf.mxu0 }
 0x15a   : > { %v942_v60 = vadd.f32 %v922_v58, %v380_v56  ;;  %v1292_v61 = vadd.f32 %v1291_v59, %v1290_v57 }
 0x15c   : > { %958 = vst [vmem:[#allocation2 + $0x78] sm:$0xff] %v942_v60  ;;  %v925_v63 = vadd.f32 %v1340_v40, %v1292_v61  ;;  %963 = sbr.rel (%p1222_p11) target bundleno = 364 (0x16c), region = 66 }
 0x15e   : > { %v943_v0 = vadd.f32 %v925_v63, %v381_v62 }
 0x160   : > { %959 = vst [vmem:[#allocation2 + $0x28] sm:$0xff] %v943_v0 }
 0x161   : > { %v964_v1 = vld [vmem:[#allocation2 + $0x30] sm:$0xff]  ;;  %v1223_v2 = vld [vmem:[%s1741_s2] ss:$0 sm:$0xff]  ;;  %v966_v6 = vld [vmem:[#allocation2 + $0x58] sm:$0xff] }
 0x162   : > { %v965_v3 = vld [vmem:[#allocation2] sm:$0xff]  ;;  %v987_v4 = vadd.f32 %v1223_v2, %v964_v1  ;;  %v967_v7 = vld [vmem:[#allocation2 + $0x18] sm:$0xff]  ;;  %v968_v8 = vld [vmem:[#allocation2 + $0x50] sm:$0xff]  ;;  %v989_v9 = vadd.f32 %v1223_v2, %v966_v6 }
 0x163   : > { %v988_v5 = vadd.f32 %v1223_v2, %v965_v3  ;;  %v990_v10 = vadd.f32 %v1223_v2, %v967_v7  ;;  %v991_v11 = vadd.f32 %v1223_v2, %v968_v8  ;;  %v969_v12 = vld [vmem:[#allocation2 + $0x68] sm:$0xff]  ;;  %v972_v18 = vld [vmem:[#allocation2 + $0x40] sm:$0xff]  ;;  %v974_v20 = vld [vmem:[#allocation2 + $0x10] sm:$0xff] }
 0x164   : > { %v970_v13 = vld [vmem:[#allocation2 + $0x8] sm:$0xff]  ;;  %1003 = vst [vmem:[%s1742_s3] sm:$0xff] %v987_v4  ;;  %v992_v15 = vadd.f32 %v1223_v2, %v969_v12  ;;  %v973_v19 = vld [vmem:[#allocation2 + $0x20] sm:$0xff]  ;;  %1005 = vst [vmem:[%s1742_s3 + $0x10] sm:$0xff] %v989_v9  ;;  %v995_v21 = vadd.f32 %v1223_v2, %v972_v18  ;;  %v997_v23 = vadd.f32 %v1223_v2, %v974_v20 }
 0x165   : > { %v971_v14 = vld [vmem:[#allocation2 + $0x48] sm:$0xff]  ;;  %1004 = vst [vmem:[%s1742_s3 + $0x8] sm:$0xff] %v988_v5  ;;  %v993_v16 = vadd.f32 %v1223_v2, %v970_v13  ;;  %1006 = vst [vmem:[%s1742_s3 + $0x18] sm:$0xff] %v990_v10  ;;  %v996_v22 = vadd.f32 %v1223_v2, %v973_v19  ;;  %v975_v24 = vld [vmem:[#allocation2 + $0x38] sm:$0xff] }
 0x166   : > { %v994_v17 = vadd.f32 %v1223_v2, %v971_v14  ;;  %1007 = vst [vmem:[%s1742_s3 + $0x20] sm:$0xff] %v991_v11  ;;  %v976_v25 = vld [vmem:[#allocation2 + $0x60] sm:$0xff]  ;;  %v977_v26 = vld [vmem:[#allocation2 + $0x70] sm:$0xff]  ;;  %1008 = vst [vmem:[%s1742_s3 + $0x28] sm:$0xff] %v992_v15  ;;  %v998_v27 = vadd.f32 %v1223_v2, %v975_v24 }
 0x167   : > { %1009 = vst [vmem:[%s1742_s3 + $0x30] sm:$0xff] %v993_v16  ;;  %v999_v28 = vadd.f32 %v1223_v2, %v976_v25  ;;  %v1000_v29 = vadd.f32 %v1223_v2, %v977_v26  ;;  %v978_v30 = vld [vmem:[#allocation2 + $0x78] sm:$0xff]  ;;  %v979_v31 = vld [vmem:[#allocation2 + $0x28] sm:$0xff]  ;;  %1011 = vst [vmem:[%s1742_s3 + $0x40] sm:$0xff] %v995_v21 }
 0x168   : > { %1010 = vst [vmem:[%s1742_s3 + $0x38] sm:$0xff] %v994_v17  ;;  %1012 = vst [vmem:[%s1742_s3 + $0x48] sm:$0xff] %v996_v22  ;;  %v1001_v32 = vadd.f32 %v1223_v2, %v978_v30  ;;  %v1002_v33 = vadd.f32 %v1223_v2, %v979_v31 }
 0x169   : > { %1013 = vst [vmem:[%s1742_s3 + $0x50] sm:$0xff] %v997_v23  ;;  %1014 = vst [vmem:[%s1742_s3 + $0x58] sm:$0xff] %v998_v27 }
 0x16a   : > { %1015 = vst [vmem:[%s1742_s3 + $0x60] sm:$0xff] %v999_v28  ;;  %1016 = vst [vmem:[%s1742_s3 + $0x68] sm:$0xff] %v1000_v29 }
 0x16b   : > { %1017 = vst [vmem:[%s1742_s3 + $0x70] sm:$0xff] %v1001_v32  ;;  %1018 = vst [vmem:[%s1742_s3 + $0x78] sm:$0xff] %v1002_v33 }
 0x16c PF: > { %s13_s16 = sadd.s32 1, %s1478_s16   ;;  %s1743_s12 = smov %s1466_s13 }
 0x16d   : > { %p10_p12 = scmp.ge.s32.totalorder %s13_s16, 5   ;;  %s1744_s13 = smov %s1536_s20 }
 0x16e   : > { %s1745_s14 = smov %s1474_s15  ;;  %s1746_s15 = smov %s1748_s17 }
 0x16f   :  { %12 = sbr.rel (!%p10_p12) target bundleno = 3 (0x3), region = 113 }

</bundles_post_ra>
